<compile_context>
chip_gen: v7x
topology: tpu7x:2x2x1
jax: 0.10.0
libtpu: 0.0.40
codegen_flags: <defaults>
</compile_context>

<pallas_src>
import functools

import jax
import jax.numpy as jnp
from jax.experimental import pallas as pl
from jax.experimental.pallas import tpu as pltpu

D_IN = 1845       # real input / output feature dim
D_IN_PAD = 1920   # 15 * 128 -> lane-dense
D_H1 = 512
D_H2 = 128
D_Z = 50          # real latent dim
D_Z_PAD = 64      # padded latent dim (half a lane group)
D_LAT = 128       # fused mu/logvar slab width
BN_EPS = 1e-5

# Offsets of the packed 1-row vectors inside the single [1, VEC_TOTAL] slab.
# Every offset / width is a multiple of 128 -> static, lane-aligned slices.
OFF_GAMMA = 0                       # 512
OFF_BETA = OFF_GAMMA + D_H1         # 512
OFF_BMID = OFF_BETA + D_H1          # 128
OFF_BENC = OFF_BMID + D_H2          # 128
OFF_BD0 = OFF_BENC + D_LAT          # 128
OFF_BDM = OFF_BD0 + D_H2            # 512
OFF_BOUT = OFF_BDM + D_H1           # 1920
VEC_TOTAL = OFF_BOUT + D_IN_PAD     # 3840


def _vae_kernel(
    x_ref, eps_ref, vec_ref,
    w_in_ref, w_mid_ref, w_enc_ref, w_d0_ref, w_dm_ref, w_out_ref,
    recon_ref, latent_ref,
    *, n_valid,
):
    gamma = vec_ref[:, OFF_GAMMA:OFF_GAMMA + D_H1]
    beta = vec_ref[:, OFF_BETA:OFF_BETA + D_H1]
    b_mid = vec_ref[:, OFF_BMID:OFF_BMID + D_H2]
    b_enc = vec_ref[:, OFF_BENC:OFF_BENC + D_LAT]
    b_d0 = vec_ref[:, OFF_BD0:OFF_BD0 + D_H2]
    b_dm = vec_ref[:, OFF_BDM:OFF_BDM + D_H1]
    b_out = vec_ref[:, OFF_BOUT:OFF_BOUT + D_IN_PAD]

    # ---- encode ----
    # input_linear: 1920(pad of 1845) -> 512.  The Linear bias is omitted:
    # training-mode BatchNorm subtracts the batch mean, so a per-feature bias
    # added before it is an exact no-op.
    x = x_ref[...].astype(jnp.bfloat16)
    h1 = jnp.dot(x, w_in_ref[...], preferred_element_type=jnp.float32)

    # BatchNorm1d(512), training mode: batch mean / biased batch variance.
    b_pad = h1.shape[0]
    if n_valid == b_pad:
        # Common case: no padded rows -> no masking work at all.
        mean = jnp.mean(h1, axis=0, keepdims=True)
        diff = h1 - mean
        var = jnp.mean(diff * diff, axis=0, keepdims=True)
    else:
        rows = jax.lax.broadcasted_iota(jnp.int32, h1.shape, 0)
        row_mask = (rows < n_valid).astype(jnp.float32)
        inv_n = 1.0 / float(n_valid)
        mean = jnp.sum(h1 * row_mask, axis=0, keepdims=True) * inv_n
        diff = (h1 - mean) * row_mask
        var = jnp.sum(diff * diff, axis=0, keepdims=True) * inv_n
    h1 = (h1 - mean) * jax.lax.rsqrt(var + BN_EPS)
    h1 = h1 * gamma + beta
    h1 = jnp.maximum(h1, 0.0)                                   # ReLU

    # enc_middle: 512 -> 128
    h2 = jnp.dot(h1.astype(jnp.bfloat16), w_mid_ref[...],
                 preferred_element_type=jnp.float32)
    h2 = jnp.maximum(h2 + b_mid, 0.0)

    # fused enc_1 / enc_2: 128 -> 128 (mu in lanes 0:50, logvar in 64:114)
    lat = jnp.dot(h2.astype(jnp.bfloat16), w_enc_ref[...],
                  preferred_element_type=jnp.float32)
    lat = lat + b_enc
    latent_ref[...] = lat                                       # single dense store

    mu = lat[:, :D_Z_PAD]          # [B, 64]; lanes 50:64 are exactly 0
    logvar = lat[:, D_Z_PAD:]      # [B, 64]; lanes 50:64 are exactly 0

    # ---- reparameterize ----
    std = jnp.exp(0.5 * logvar)                                 # pad lanes -> exp(0)=1
    z = eps_ref[...] * std + mu                                 # eps pad lanes are 0 -> z pad = 0

    # ---- decode ----
    h3 = jnp.dot(z.astype(jnp.bfloat16), w_d0_ref[...],
                 preferred_element_type=jnp.float32)            # 64(pad of 50) -> 128
    h3 = jnp.maximum(h3 + b_d0, 0.0)

    h4 = jnp.dot(h3.astype(jnp.bfloat16), w_dm_ref[...],
                 preferred_element_type=jnp.float32)            # 128 -> 512
    h4 = jnp.maximum(h4 + b_dm, 0.0)

    logits = jnp.dot(h4.astype(jnp.bfloat16), w_out_ref[...],
                     preferred_element_type=jnp.float32)        # 512 -> 1920
    logits = logits + b_out
    # sigmoid(x) == 0.5 * (tanh(0.5 x) + 1): one EUP op per element.
    recon_ref[...] = 0.5 * (jnp.tanh(0.5 * logits) + 1.0)       # lane-dense store


@jax.jit
def vae_sanger_forward(x, eps, packed):
    """Full VAE_Sanger forward pass in one Pallas kernel.

    x:      [B, 1845] float32
    eps:    [B, 50]   float32 (standard-normal noise for reparameterization)
    packed: dict from pack_params() (padded / fused / bf16 weights)
    returns (reconstruction [B,1845], mu [B,50], logvar [B,50]) in float32
    """
    B = x.shape[0]
    B_pad = ((B + 7) // 8) * 8

    x_p = jnp.pad(x, ((0, B_pad - B), (0, D_IN_PAD - D_IN)))
    eps_p = jnp.pad(eps, ((0, B_pad - B), (0, D_Z_PAD - D_Z)))

    out_shapes = (
        jax.ShapeDtypeStruct((B_pad, D_IN_PAD), jnp.float32),   # reconstruction (padded)
        jax.ShapeDtypeStruct((B_pad, D_LAT), jnp.float32),      # [mu | logvar] slab
    )
    args = (
        x_p, eps_p,
        packed["vecs"],
        packed["w_in"], packed["w_mid"], packed["w_enc"],
        packed["w_d0"], packed["w_dm"], packed["w_out"],
    )
    recon_p, latent = pl.pallas_call(
        functools.partial(_vae_kernel, n_valid=B),
        out_shape=out_shapes,
        in_specs=[pl.BlockSpec(memory_space=pltpu.MemorySpace.VMEM)] * len(args),
        out_specs=tuple(
            pl.BlockSpec(memory_space=pltpu.MemorySpace.VMEM) for _ in out_shapes
        ),
        compiler_params=pltpu.CompilerParams(vmem_limit_bytes=48 * 1024 * 1024),
    )(*args)

    recon = recon_p[:B, :D_IN]
    mu = latent[:B, :D_Z]
    logvar = latent[:B, D_Z_PAD:D_Z_PAD + D_Z]
    return recon, mu, logvar


def init_params(key):
    """Natural (f32, un-padded) params mimicking PyTorch nn.Linear defaults."""
    def linear(key, fan_in, fan_out):
        kw, kb = jax.random.split(key)
        bound = 1.0 / jnp.sqrt(fan_in)
        w = jax.random.uniform(kw, (fan_in, fan_out), jnp.float32, -bound, bound)
        b = jax.random.uniform(kb, (1, fan_out), jnp.float32, -bound, bound)
        return w, b

    keys = jax.random.split(key, 7)
    w_in, b_in = linear(keys[0], D_IN, D_H1)
    w_mid, b_mid = linear(keys[1], D_H1, D_H2)
    w_mu, b_mu = linear(keys[2], D_H2, D_Z)
    w_lv, b_lv = linear(keys[3], D_H2, D_Z)
    w_d0, b_d0 = linear(keys[4], D_Z, D_H2)
    w_dm, b_dm = linear(keys[5], D_H2, D_H1)
    w_out, b_out = linear(keys[6], D_H1, D_IN)
    return {
        "w_in": w_in, "b_in": b_in,
        "gamma": jnp.ones((1, D_H1), jnp.float32),
        "beta": jnp.zeros((1, D_H1), jnp.float32),
        "w_mid": w_mid, "b_mid": b_mid,
        "w_mu": w_mu, "b_mu": b_mu,
        "w_lv": w_lv, "b_lv": b_lv,
        "w_d0": w_d0, "b_d0": b_d0,
        "w_dm": w_dm, "b_dm": b_dm,
        "w_out": w_out, "b_out": b_out,
    }


def pack_params(p):
    """Pad / fuse / cast natural params into the kernel layout."""
    bf16 = jnp.bfloat16

    w_in = jnp.zeros((D_IN_PAD, D_H1), jnp.float32).at[:D_IN].set(p["w_in"])
    w_out = jnp.zeros((D_H1, D_IN_PAD), jnp.float32).at[:, :D_IN].set(p["w_out"])
    b_out = jnp.zeros((1, D_IN_PAD), jnp.float32).at[:, :D_IN].set(p["b_out"])

    # Fuse enc_1 / enc_2 into one 128->128 weight (mu @ 0:50, logvar @ 64:114).
    w_enc = jnp.zeros((D_H2, D_LAT), jnp.float32)
    w_enc = w_enc.at[:, :D_Z].set(p["w_mu"])
    w_enc = w_enc.at[:, D_Z_PAD:D_Z_PAD + D_Z].set(p["w_lv"])
    b_enc = jnp.zeros((1, D_LAT), jnp.float32)
    b_enc = b_enc.at[:, :D_Z].set(p["b_mu"])
    b_enc = b_enc.at[:, D_Z_PAD:D_Z_PAD + D_Z].set(p["b_lv"])

    # dec_0 padded so z's pad lanes (50:64) are inert.
    w_d0 = jnp.zeros((D_Z_PAD, D_H2), jnp.float32).at[:D_Z].set(p["w_d0"])

    # One concatenated slab for every remaining 1-row vector (single DMA).
    # Note: input_linear's bias b_in is intentionally dropped — it is exactly
    # cancelled by the training-mode BatchNorm mean subtraction.
    vecs = jnp.concatenate(
        [p["gamma"], p["beta"], p["b_mid"], b_enc, p["b_d0"], p["b_dm"], b_out],
        axis=1,
    )
    assert vecs.shape == (1, VEC_TOTAL)

    return {
        "vecs": vecs,
        "w_in": w_in.astype(bf16),
        "w_mid": p["w_mid"].astype(bf16),
        "w_enc": w_enc.astype(bf16),
        "w_d0": w_d0.astype(bf16),
        "w_dm": p["w_dm"].astype(bf16),
        "w_out": w_out.astype(bf16),
    }


def _reference_forward(x, eps, p):
    """Pure-JAX reference with the same bf16-operand / f32-accumulate matmul
    strategy as the kernel (for a tight numerical check)."""
    def mm(a, w, b):
        return jnp.dot(a.astype(jnp.bfloat16), w.astype(jnp.bfloat16),
                       preferred_element_type=jnp.float32) + b

    h1 = mm(x, p["w_in"], p["b_in"])
    mean = jnp.mean(h1, axis=0, keepdims=True)
    var = jnp.mean((h1 - mean) ** 2, axis=0, keepdims=True)
    h1 = (h1 - mean) * jax.lax.rsqrt(var + BN_EPS) * p["gamma"] + p["beta"]
    h1 = jax.nn.relu(h1)
    h2 = jax.nn.relu(mm(h1, p["w_mid"], p["b_mid"]))
    mu = mm(h2, p["w_mu"], p["b_mu"])
    logvar = mm(h2, p["w_lv"], p["b_lv"])
    z = eps * jnp.exp(0.5 * logvar) + mu
    h3 = jax.nn.relu(mm(z, p["w_d0"], p["b_d0"]))
    h4 = jax.nn.relu(mm(h3, p["w_dm"], p["b_dm"]))
    recon = jax.nn.sigmoid(mm(h4, p["w_out"], p["b_out"]))
    return recon, mu, logvar


if __name__ == "__main__":
    key = jax.random.PRNGKey(0)
    k_params, k_x, k_eps = jax.random.split(key, 3)

    B = 8  # small batch (>1 so batch-stat BatchNorm is well-defined)
    params = init_params(k_params)
    packed = pack_params(params)

    x = jax.random.uniform(k_x, (B, D_IN), jnp.float32)       # data-like, in [0,1]
    eps = jax.random.normal(k_eps, (B, D_Z), jnp.float32)     # reparam noise

    recon, mu, logvar = vae_sanger_forward(x, eps, packed)
    jax.block_until_ready((recon, mu, logvar))

    # sanity check against pure-JAX reference (same bf16 matmul strategy)
    r_ref, mu_ref, lv_ref = _reference_forward(x, eps, params)
    assert recon.shape == (B, D_IN) and mu.shape == (B, D_Z) and logvar.shape == (B, D_Z)
    assert jnp.allclose(recon, r_ref, atol=2e-3, rtol=2e-3)
    assert jnp.allclose(mu, mu_ref, atol=2e-3, rtol=2e-3)
    assert jnp.allclose(logvar, lv_ref, atol=2e-3, rtol=2e-3)

    print("KERNEL_OK")
</pallas_src>

<mosaic_0001>
module attributes {stable_mosaic.version = 11 : i64} {
  func.func @_vae_kernel(%arg0: memref<8x1920xf32, #tpu.memory_space<vmem>>, %arg1: memref<8x64xf32, #tpu.memory_space<vmem>>, %arg2: memref<1x3840xf32, #tpu.memory_space<vmem>>, %arg3: memref<1920x512xbf16, #tpu.memory_space<vmem>>, %arg4: memref<512x128xbf16, #tpu.memory_space<vmem>>, %arg5: memref<128x128xbf16, #tpu.memory_space<vmem>>, %arg6: memref<64x128xbf16, #tpu.memory_space<vmem>>, %arg7: memref<128x512xbf16, #tpu.memory_space<vmem>>, %arg8: memref<512x1920xbf16, #tpu.memory_space<vmem>>, %arg9: memref<8x1920xf32, #tpu.memory_space<vmem>>, %arg10: memref<8x128xf32, #tpu.memory_space<vmem>>) attributes {dimension_semantics = [], scalar_prefetch = 0 : i64, scratch_operands = 0 : i64, tpu.core_type = #tpu.core_type<tc>} {
    %c0 = arith.constant 0 : index
    %c0_0 = arith.constant 0 : index
    %0 = vector.load %arg2[%c0, %c0_0] : memref<1x3840xf32, #tpu.memory_space<vmem>>, vector<1x512xf32>
    %c0_1 = arith.constant 0 : index
    %c512 = arith.constant 512 : index
    %1 = vector.load %arg2[%c0_1, %c512] : memref<1x3840xf32, #tpu.memory_space<vmem>>, vector<1x512xf32>
    %c0_2 = arith.constant 0 : index
    %c1024 = arith.constant 1024 : index
    %2 = vector.load %arg2[%c0_2, %c1024] : memref<1x3840xf32, #tpu.memory_space<vmem>>, vector<1x128xf32>
    %c0_3 = arith.constant 0 : index
    %c1152 = arith.constant 1152 : index
    %3 = vector.load %arg2[%c0_3, %c1152] : memref<1x3840xf32, #tpu.memory_space<vmem>>, vector<1x128xf32>
    %c0_4 = arith.constant 0 : index
    %c1280 = arith.constant 1280 : index
    %4 = vector.load %arg2[%c0_4, %c1280] : memref<1x3840xf32, #tpu.memory_space<vmem>>, vector<1x128xf32>
    %c0_5 = arith.constant 0 : index
    %c1408 = arith.constant 1408 : index
    %5 = vector.load %arg2[%c0_5, %c1408] : memref<1x3840xf32, #tpu.memory_space<vmem>>, vector<1x512xf32>
    %c0_6 = arith.constant 0 : index
    %c1920 = arith.constant 1920 : index
    %6 = vector.load %arg2[%c0_6, %c1920] : memref<1x3840xf32, #tpu.memory_space<vmem>>, vector<1x1920xf32>
    %c0_7 = arith.constant 0 : index
    %c0_8 = arith.constant 0 : index
    %7 = vector.load %arg0[%c0_7, %c0_8] : memref<8x1920xf32, #tpu.memory_space<vmem>>, vector<8x1920xf32>
    %8 = arith.truncf %7 : vector<8x1920xf32> to vector<8x1920xbf16>
    %c0_9 = arith.constant 0 : index
    %c0_10 = arith.constant 0 : index
    %9 = vector.load %arg3[%c0_9, %c0_10] : memref<1920x512xbf16, #tpu.memory_space<vmem>>, vector<1920x512xbf16>
    %cst = arith.constant dense<0.000000e+00> : vector<8x512xf32>
    %10 = tpu.matmul %8, %9, %cst {dimension_numbers = #tpu.dot_dimension_numbers<[1], [0], [0], [1], [0, 0, 1, 1], [], []>} : vector<8x1920xbf16>, vector<1920x512xbf16>, vector<8x512xf32> -> vector<8x512xf32>
    %cst_11 = arith.constant dense<0.000000e+00> : vector<512xf32>
    %11 = vector.multi_reduction <add>, %10, %cst_11 [0] : vector<8x512xf32> to vector<512xf32>
    %12 = vector.shape_cast %11 : vector<512xf32> to vector<1x512xf32>
    %cst_12 = arith.constant 8.000000e+00 : f32
    %13 = vector.broadcast %cst_12 : f32 to vector<1x512xf32>
    %14 = arith.divf %12, %13 : vector<1x512xf32>
    %15 = vector.broadcast %14 : vector<1x512xf32> to vector<8x512xf32>
    %16 = arith.subf %10, %15 : vector<8x512xf32>
    %17 = arith.mulf %16, %16 : vector<8x512xf32>
    %cst_13 = arith.constant dense<0.000000e+00> : vector<512xf32>
    %18 = vector.multi_reduction <add>, %17, %cst_13 [0] : vector<8x512xf32> to vector<512xf32>
    %19 = vector.shape_cast %18 : vector<512xf32> to vector<1x512xf32>
    %cst_14 = arith.constant 8.000000e+00 : f32
    %20 = vector.broadcast %cst_14 : f32 to vector<1x512xf32>
    %21 = arith.divf %19, %20 : vector<1x512xf32>
    %22 = vector.broadcast %14 : vector<1x512xf32> to vector<8x512xf32>
    %23 = arith.subf %10, %22 : vector<8x512xf32>
    %cst_15 = arith.constant 9.99999974E-6 : f32
    %24 = vector.broadcast %cst_15 : f32 to vector<1x512xf32>
    %25 = arith.addf %21, %24 : vector<1x512xf32>
    %26 = math.rsqrt %25 : vector<1x512xf32>
    %27 = vector.broadcast %26 : vector<1x512xf32> to vector<8x512xf32>
    %28 = arith.mulf %23, %27 : vector<8x512xf32>
    %29 = vector.broadcast %0 : vector<1x512xf32> to vector<8x512xf32>
    %30 = arith.mulf %28, %29 : vector<8x512xf32>
    %31 = vector.broadcast %1 : vector<1x512xf32> to vector<8x512xf32>
    %32 = arith.addf %30, %31 : vector<8x512xf32>
    %cst_16 = arith.constant 0.000000e+00 : f32
    %33 = vector.broadcast %cst_16 : f32 to vector<8x512xf32>
    %34 = arith.maximumf %32, %33 : vector<8x512xf32>
    %35 = arith.truncf %34 : vector<8x512xf32> to vector<8x512xbf16>
    %c0_17 = arith.constant 0 : index
    %c0_18 = arith.constant 0 : index
    %36 = vector.load %arg4[%c0_17, %c0_18] : memref<512x128xbf16, #tpu.memory_space<vmem>>, vector<512x128xbf16>
    %cst_19 = arith.constant dense<0.000000e+00> : vector<8x128xf32>
    %37 = tpu.matmul %35, %36, %cst_19 {dimension_numbers = #tpu.dot_dimension_numbers<[1], [0], [0], [1], [0, 0, 1, 1], [], []>} : vector<8x512xbf16>, vector<512x128xbf16>, vector<8x128xf32> -> vector<8x128xf32>
    %38 = vector.broadcast %2 : vector<1x128xf32> to vector<8x128xf32>
    %39 = arith.addf %37, %38 : vector<8x128xf32>
    %cst_20 = arith.constant 0.000000e+00 : f32
    %40 = vector.broadcast %cst_20 : f32 to vector<8x128xf32>
    %41 = arith.maximumf %39, %40 : vector<8x128xf32>
    %42 = arith.truncf %41 : vector<8x128xf32> to vector<8x128xbf16>
    %c0_21 = arith.constant 0 : index
    %c0_22 = arith.constant 0 : index
    %43 = vector.load %arg5[%c0_21, %c0_22] : memref<128x128xbf16, #tpu.memory_space<vmem>>, vector<128x128xbf16>
    %cst_23 = arith.constant dense<0.000000e+00> : vector<8x128xf32>
    %44 = tpu.matmul %42, %43, %cst_23 {dimension_numbers = #tpu.dot_dimension_numbers<[1], [0], [0], [1], [0, 0, 1, 1], [], []>} : vector<8x128xbf16>, vector<128x128xbf16>, vector<8x128xf32> -> vector<8x128xf32>
    %45 = vector.broadcast %3 : vector<1x128xf32> to vector<8x128xf32>
    %46 = arith.addf %44, %45 : vector<8x128xf32>
    %c0_24 = arith.constant 0 : index
    %c0_25 = arith.constant 0 : index
    %47 = vector.load %arg10[%c0_24, %c0_25] : memref<8x128xf32, #tpu.memory_space<vmem>>, vector<8x128xf32>
    tpu.vector_store %arg10[%c0_24, %c0_25], %46 {strides = array<i32>} : memref<8x128xf32, #tpu.memory_space<vmem>>, vector<8x128xf32>,
    %48 = vector.extract_strided_slice %46 {offsets = [0, 0], sizes = [8, 64], strides = [1, 1]} : vector<8x128xf32> to vector<8x64xf32>
    %49 = vector.extract_strided_slice %46 {offsets = [0, 64], sizes = [8, 64], strides = [1, 1]} : vector<8x128xf32> to vector<8x64xf32>
    %cst_26 = arith.constant 5.000000e-01 : f32
    %50 = vector.broadcast %cst_26 : f32 to vector<8x64xf32>
    %51 = arith.mulf %50, %49 : vector<8x64xf32>
    %52 = math.exp %51 : vector<8x64xf32>
    %c0_27 = arith.constant 0 : index
    %c0_28 = arith.constant 0 : index
    %53 = vector.load %arg1[%c0_27, %c0_28] : memref<8x64xf32, #tpu.memory_space<vmem>>, vector<8x64xf32>
    %54 = arith.mulf %53, %52 : vector<8x64xf32>
    %55 = arith.addf %54, %48 : vector<8x64xf32>
    %56 = arith.truncf %55 : vector<8x64xf32> to vector<8x64xbf16>
    %c0_29 = arith.constant 0 : index
    %c0_30 = arith.constant 0 : index
    %57 = vector.load %arg6[%c0_29, %c0_30] : memref<64x128xbf16, #tpu.memory_space<vmem>>, vector<64x128xbf16>
    %cst_31 = arith.constant dense<0.000000e+00> : vector<8x128xf32>
    %58 = tpu.matmul %56, %57, %cst_31 {dimension_numbers = #tpu.dot_dimension_numbers<[1], [0], [0], [1], [0, 0, 1, 1], [], []>} : vector<8x64xbf16>, vector<64x128xbf16>, vector<8x128xf32> -> vector<8x128xf32>
    %59 = vector.broadcast %4 : vector<1x128xf32> to vector<8x128xf32>
    %60 = arith.addf %58, %59 : vector<8x128xf32>
    %cst_32 = arith.constant 0.000000e+00 : f32
    %61 = vector.broadcast %cst_32 : f32 to vector<8x128xf32>
    %62 = arith.maximumf %60, %61 : vector<8x128xf32>
    %63 = arith.truncf %62 : vector<8x128xf32> to vector<8x128xbf16>
    %c0_33 = arith.constant 0 : index
    %c0_34 = arith.constant 0 : index
    %64 = vector.load %arg7[%c0_33, %c0_34] : memref<128x512xbf16, #tpu.memory_space<vmem>>, vector<128x512xbf16>
    %cst_35 = arith.constant dense<0.000000e+00> : vector<8x512xf32>
    %65 = tpu.matmul %63, %64, %cst_35 {dimension_numbers = #tpu.dot_dimension_numbers<[1], [0], [0], [1], [0, 0, 1, 1], [], []>} : vector<8x128xbf16>, vector<128x512xbf16>, vector<8x512xf32> -> vector<8x512xf32>
    %66 = vector.broadcast %5 : vector<1x512xf32> to vector<8x512xf32>
    %67 = arith.addf %65, %66 : vector<8x512xf32>
    %cst_36 = arith.constant 0.000000e+00 : f32
    %68 = vector.broadcast %cst_36 : f32 to vector<8x512xf32>
    %69 = arith.maximumf %67, %68 : vector<8x512xf32>
    %70 = arith.truncf %69 : vector<8x512xf32> to vector<8x512xbf16>
    %c0_37 = arith.constant 0 : index
    %c0_38 = arith.constant 0 : index
    %71 = vector.load %arg8[%c0_37, %c0_38] : memref<512x1920xbf16, #tpu.memory_space<vmem>>, vector<512x1920xbf16>
    %cst_39 = arith.constant dense<0.000000e+00> : vector<8x1920xf32>
    %72 = tpu.matmul %70, %71, %cst_39 {dimension_numbers = #tpu.dot_dimension_numbers<[1], [0], [0], [1], [0, 0, 1, 1], [], []>} : vector<8x512xbf16>, vector<512x1920xbf16>, vector<8x1920xf32> -> vector<8x1920xf32>
    %73 = vector.broadcast %6 : vector<1x1920xf32> to vector<8x1920xf32>
    %74 = arith.addf %72, %73 : vector<8x1920xf32>
    %cst_40 = arith.constant 5.000000e-01 : f32
    %75 = vector.broadcast %cst_40 : f32 to vector<8x1920xf32>
    %76 = arith.mulf %75, %74 : vector<8x1920xf32>
    %77 = math.tanh %76 : vector<8x1920xf32>
    %cst_41 = arith.constant 1.000000e+00 : f32
    %78 = vector.broadcast %cst_41 : f32 to vector<8x1920xf32>
    %79 = arith.addf %77, %78 : vector<8x1920xf32>
    %cst_42 = arith.constant 5.000000e-01 : f32
    %80 = vector.broadcast %cst_42 : f32 to vector<8x1920xf32>
    %81 = arith.mulf %80, %79 : vector<8x1920xf32>
    %c0_43 = arith.constant 0 : index
    %c0_44 = arith.constant 0 : index
    %82 = vector.load %arg9[%c0_43, %c0_44] : memref<8x1920xf32, #tpu.memory_space<vmem>>, vector<8x1920xf32>
    tpu.vector_store %arg9[%c0_43, %c0_44], %81 {strides = array<i32>} : memref<8x1920xf32, #tpu.memory_space<vmem>>, vector<8x1920xf32>,
    return
  }
}

</mosaic_0001>

<bundles_post_ra>
// kernel: vae_sanger_forward.1
= control target key start
LH: loop header
LB: loop body
LE: loop exit
PB: predicated region body
PF: predicated region fallthrough
CT: control target
= control target key end

     0   :  { %16 = vsyncpa [#allocation3], 0  ;;  %s11846_s0 = inlined_call_operand.vmem [shape: f32[8,1920], index: 0, kind: input, shape index: {}]   ;;  %s11847_s1 = inlined_call_operand.vmem [shape: f32[8,64], index: 1, kind: input, shape index: {}]   ;;  %s11848_s2 = inlined_call_operand.hbm [shape: f32[1,3840], index: 2, kind: input, shape index: {}]   ;;  %s11849_s3 = inlined_call_operand.hbm [shape: bf16[1920,512], index: 3, kind: input, shape index: {}]   ;;  %s11850_s4 = inlined_call_operand.hbm [shape: bf16[512,128], index: 4, kind: input, shape index: {}]   ;;  %s11851_s5 = inlined_call_operand.hbm [shape: bf16[128,128], index: 5, kind: input, shape index: {}]   ;;  %s11852_s6 = inlined_call_operand.hbm [shape: bf16[64,128], index: 6, kind: input, shape index: {}]   ;;  %s11853_s7 = inlined_call_operand.hbm [shape: bf16[128,512], index: 7, kind: input, shape index: {}]   ;;  %s11854_s8 = inlined_call_operand.hbm [shape: bf16[512,1920], index: 8, kind: input, shape index: {}]   ;;  %s11855_s9 = inlined_call_operand.hbm [shape: f32[8,1920], index: 9, kind: output, shape index: {0}]   ;;  %s11856_s10 = inlined_call_operand.vmem [shape: f32[8,128], index: 10, kind: output, shape index: {1}]  }
   0x1   :  { %17 = vsyncpa [#allocation6], 0 }
   0x2   :  { %18 = vsyncpa [#allocation9], 0 }
   0x3   :  { %19 = vsyncpa [#allocation12], 0 }
   0x4   :  { %20 = vsyncpa [#allocation4], 0  ;;  %s11492_s13 = smov [#allocation5]   ;;  %s11306_s17 = scalar_lea.hbm %s11849_s3, 61440 }
   0x5   :  { %s40_s14 = sshll.u32 %s11492_s13, 4  ;;  %p11307_p0 = scmp.ne.s32.totalorder %s11849_s3, %s11306_s17  ;;  %s41_s14 = int_to_ptr.vmem [resolvable:$true] %s40_s14 }
   0x6   :  { %p11310_p1 = scmp.lt.u32.totalorder %s11306_s17, %s11849_s3 }
   0x8   :  { %p11312_p2 = pnand %p11310_p1, %p11307_p0 }
   0xa   :  { %11315 = shalt.err (!%p11312_p2)
}
   0xb   :  { %s11316_s22 = scalar_lea.vmem %s41_s14, 61440  ;;  %p11321_p4 = scmp.lt.s32.totalorder %s41_s14, %s41_s14 }
   0xc   :  { %p11317_p3 = scmp.ne.s32.totalorder %s41_s14, %s11316_s22  ;;  %p11322_p5 = scmp.lt.s32.totalorder %s11316_s22, %s11316_s22 }
   0xe   :  { %p11323_p6 = por %p11322_p5, %p11321_p4 }
  0x10   :  { %p11324_p7 = pnand %p11323_p6, %p11317_p3 }
  0x12   :  { %11327 = shalt.err (!%p11324_p7)
}
  0x13   :  { %s11493_s23 = smov 256   ;;  %s11494_s24 = smov 16  }
  0x14   :  { %46 = dma.hbm_to_vmem [thread:$0]  %s11849_s3, 61440, %s41_s14, [#allocation6], %s11493_s23, %s11493_s23, %s11494_s24  }
  0x15   :  { %s11495_s27 = smov [#allocation8]   ;;  %s11496_s29 = smov [#allocation11]  }
  0x16   :  { %s64_s28 = sshll.u32 %s11495_s27, 4  ;;  %s88_s30 = sshll.u32 %s11496_s29, 4  ;;  %s65_s28 = int_to_ptr.vmem [resolvable:$true] %s64_s28  ;;  %s89_s30 = int_to_ptr.vmem [resolvable:$true] %s88_s30 }
  0x17   :  { %s11328_s13 = scalar_lea.hbm %s11851_s5, 1024 }
  0x18   :  { %p11329_p8 = scmp.ne.s32.totalorder %s11851_s5, %s11328_s13  ;;  %p11332_p9 = scmp.lt.u32.totalorder %s11328_s13, %s11851_s5 }
  0x1a   :  { %p11334_p10 = pnand %p11332_p9, %p11329_p8 }
  0x1c   :  { %11337 = shalt.err (!%p11334_p10)
}
  0x1d   :  { %s11338_s3 = scalar_lea.vmem %s65_s28, 1024  ;;  %p11343_p12 = scmp.lt.s32.totalorder %s65_s28, %s65_s28 }
  0x1e   :  { %p11339_p11 = scmp.ne.s32.totalorder %s65_s28, %s11338_s3  ;;  %p11344_p13 = scmp.lt.s32.totalorder %s11338_s3, %s11338_s3 }
  0x20   :  { %p11345_p0 = por %p11344_p13, %p11343_p12 }
  0x22   :  { %p11346_p1 = pnand %p11345_p0, %p11339_p11 }
  0x24   :  { %11349 = shalt.err (!%p11346_p1)
}
  0x25   :  { %s11497_s14 = smov 64   ;;  %s11498_s19 = smov 4  }
  0x26   :  { %70 = dma.hbm_to_vmem [thread:$0]  %s11851_s5, 1024, %s65_s28, [#allocation9], %s11497_s14, %s11497_s14, %s11498_s19  }
  0x27   :  { %s11350_s26 = scalar_lea.hbm %s11853_s7, 4096 }
  0x28   :  { %p11351_p2 = scmp.ne.s32.totalorder %s11853_s7, %s11350_s26  ;;  %p11354_p3 = scmp.lt.u32.totalorder %s11350_s26, %s11853_s7 }
  0x2a   :  { %p11356_p4 = pnand %p11354_p3, %p11351_p2 }
  0x2c   :  { %11359 = shalt.err (!%p11356_p4)
}
  0x2d   :  { %s11360_s13 = scalar_lea.vmem %s89_s30, 4096  ;;  %p11365_p6 = scmp.lt.s32.totalorder %s89_s30, %s89_s30 }
  0x2e   :  { %p11361_p5 = scmp.ne.s32.totalorder %s89_s30, %s11360_s13  ;;  %p11366_p7 = scmp.lt.s32.totalorder %s11360_s13, %s11360_s13 }
  0x30   :  { %p11367_p8 = por %p11366_p7, %p11365_p6 }
  0x32   :  { %p11368_p9 = pnand %p11367_p8, %p11361_p5 }
  0x34   :  { %11371 = shalt.err (!%p11368_p9)
}
  0x35   :  { %94 = dma.hbm_to_vmem [thread:$0]  %s11853_s7, 4096, %s89_s30, [#allocation12], %s11493_s23, %s11493_s23, %s11494_s24  }
  0x36   :  { %s11499_s15 = smov [#allocation2]   ;;  %s11500_s17 = smov [#allocation7]  }
  0x37   :  { %s31_s16 = sshll.u32 %s11499_s15, 4  ;;  %s52_s18 = sshll.u32 %s11500_s17, 4  ;;  %s32_s16 = int_to_ptr.vmem [resolvable:$true] %s31_s16  ;;  %s53_s18 = int_to_ptr.vmem [resolvable:$true] %s52_s18 }
  0x38   :  { %s11372_s21 = scalar_lea.hbm %s11848_s2, 480 }
  0x39   :  { %p11373_p10 = scmp.ne.s32.totalorder %s11848_s2, %s11372_s21  ;;  %p11376_p11 = scmp.lt.u32.totalorder %s11372_s21, %s11848_s2 }
  0x3b   :  { %p11378_p12 = pnand %p11376_p11, %p11373_p10 }
  0x3d   :  { %11381 = shalt.err (!%p11378_p12)
}
  0x3e   :  { %s11382_s7 = scalar_lea.vmem %s32_s16, 480  ;;  %p11387_p0 = scmp.lt.s32.totalorder %s32_s16, %s32_s16 }
  0x3f   :  { %p11383_p13 = scmp.ne.s32.totalorder %s32_s16, %s11382_s7  ;;  %p11388_p1 = scmp.lt.s32.totalorder %s11382_s7, %s11382_s7 }
  0x41   :  { %p11389_p2 = por %p11388_p1, %p11387_p0 }
  0x43   :  { %p11390_p3 = pnand %p11389_p2, %p11383_p13 }
  0x45   :  { %11393 = shalt.err (!%p11390_p3)
}
  0x46   :  { %34 = dma.hbm_to_vmem [thread:$0]  %s11848_s2, 480, %s32_s16, [#allocation3]  }
  0x47   :  { %s11394_s11 = scalar_lea.hbm %s11850_s4, 4096 }
  0x48   :  { %p11395_p4 = scmp.ne.s32.totalorder %s11850_s4, %s11394_s11  ;;  %p11398_p5 = scmp.lt.u32.totalorder %s11394_s11, %s11850_s4 }
  0x4a   :  { %p11400_p6 = pnand %p11398_p5, %p11395_p4 }
  0x4c   :  { %11403 = shalt.err (!%p11400_p6)
}
  0x4d   :  { %s11404_s15 = scalar_lea.vmem %s53_s18, 4096  ;;  %p11409_p8 = scmp.lt.s32.totalorder %s53_s18, %s53_s18 }
  0x4e   :  { %p11405_p7 = scmp.ne.s32.totalorder %s53_s18, %s11404_s15  ;;  %p11410_p9 = scmp.lt.s32.totalorder %s11404_s15, %s11404_s15 }
  0x50   :  { %p11411_p10 = por %p11410_p9, %p11409_p8 }
  0x52   :  { %p11412_p11 = pnand %p11411_p10, %p11405_p7 }
  0x54   :  { %11415 = shalt.err (!%p11412_p11)
}
  0x55   :  { %58 = dma.hbm_to_vmem [thread:$0]  %s11850_s4, 4096, %s53_s18, [#allocation6], %s11497_s14, %s11497_s14, %s11498_s19  }
  0x56   :  { %s11501_s17 = smov [#allocation10]   ;;  %s11502_s20 = smov [#allocation13]  }
  0x57   :  { %s76_s3 = sshll.u32 %s11501_s17, 4  ;;  %s100_s21 = sshll.u32 %s11502_s20, 4  ;;  %s77_s3 = int_to_ptr.vmem [resolvable:$true] %s76_s3  ;;  %s101_s21 = int_to_ptr.vmem [resolvable:$true] %s100_s21 }
  0x58   :  { %s11416_s26 = scalar_lea.hbm %s11852_s6, 512 }
  0x59   :  { %p11417_p12 = scmp.ne.s32.totalorder %s11852_s6, %s11416_s26  ;;  %p11420_p13 = scmp.lt.u32.totalorder %s11416_s26, %s11852_s6 }
  0x5b   :  { %p11422_p0 = pnand %p11420_p13, %p11417_p12 }
  0x5d   :  { %11425 = shalt.err (!%p11422_p0)
}
  0x5e   :  { %s11426_s4 = scalar_lea.vmem %s77_s3, 512  ;;  %p11431_p2 = scmp.lt.s32.totalorder %s77_s3, %s77_s3 }
  0x5f   :  { %p11427_p1 = scmp.ne.s32.totalorder %s77_s3, %s11426_s4  ;;  %p11432_p3 = scmp.lt.s32.totalorder %s11426_s4, %s11426_s4 }
  0x61   :  { %p11433_p4 = por %p11432_p3, %p11431_p2 }
  0x63   :  { %p11434_p5 = pnand %p11433_p4, %p11427_p1 }
  0x65   :  { %11437 = shalt.err (!%p11434_p5)
}
  0x66   :  { %82 = dma.hbm_to_vmem [thread:$0]  %s11852_s6, 512, %s77_s3, [#allocation9], %s11497_s14, %s11497_s14, %s11498_s19  }
  0x67   :  { %s11438_s12 = scalar_lea.hbm %s11854_s8, 61440 }
  0x68   :  { %p11439_p6 = scmp.ne.s32.totalorder %s11854_s8, %s11438_s12  ;;  %p11442_p7 = scmp.lt.u32.totalorder %s11438_s12, %s11854_s8 }
  0x6a   :  { %p11444_p8 = pnand %p11442_p7, %p11439_p6 }
  0x6c   :  { %11447 = shalt.err (!%p11444_p8)
}
  0x6d   :  { %s11448_s2 = scalar_lea.vmem %s101_s21, 61440  ;;  %p11453_p10 = scmp.lt.s32.totalorder %s101_s21, %s101_s21 }
  0x6e   :  { %p11449_p9 = scmp.ne.s32.totalorder %s101_s21, %s11448_s2  ;;  %p11454_p11 = scmp.lt.s32.totalorder %s11448_s2, %s11448_s2 }
  0x70   :  { %p11455_p12 = por %p11454_p11, %p11453_p10 }
  0x72   :  { %p11456_p13 = pnand %p11455_p12, %p11449_p9 }
  0x74   :  { %11459 = shalt.err (!%p11456_p13)
}
  0x75   :  { %s11503_s6 = smov 960   ;;  %s11504_s19 = smov 60  }
  0x76   :  { %106 = dma.hbm_to_vmem [thread:$0]  %s11854_s8, 61440, %s101_s21, [#allocation12], %s11503_s6, %s11503_s6, %s11504_s19  }
  0x77   :  { %11482 = dma.done.wait [#allocation3], 480  }
  0x78   :  { %11483 = vsyncadd [#allocation3], 4294966816 }
  0x79   :  { %11484 = dma.done.wait [#allocation6], 65536  }
  0x7a   :  { %11485 = vsyncadd [#allocation6], 4294901760 }
  0x7b   :  { %11486 = dma.done.wait [#allocation9], 1536  }
  0x7c   :  { %11487 = vsyncadd [#allocation9], 4294965760 }
  0x7d   :  { %11488 = dma.done.wait [#allocation12], 65536  }
  0x7e   :  { %11489 = vsyncadd [#allocation12], 4294901760  ;;  %v9750_v0 = vld [vmem:[#allocation5 + $0x4] ss:$16 sps:$4 sm:$0xff]   ;;  %v9752_v1 = vld [vmem:[#allocation5 + $0xc] ss:$16 sps:$4 sm:$0xff]  }
  0x7f   :  { %3047 = vmatprep.subr.bf16.mxu0 %v9750_v0  ;;  %v9754_v2 = vld [vmem:[#allocation5] ss:$16 sps:$4 sm:$0xff]   ;;  %v9755_v3 = vld [vmem:[#allocation5 + $0x8] ss:$16 sps:$4 sm:$0xff]   ;;  %3375 = vmatprep.subr.bf16.mxu1 %v9752_v1  ;;  %v9756_v4 = vld [vmem:[#allocation5 + $0x24] ss:$16 sps:$4 sm:$0xff]  }
  0x80   :  { %3048 = vmatpush1.bf16.msra.mxu0 %v9754_v2  ;;  %3376 = vmatpush1.bf16.msra.mxu1 %v9755_v3  ;;  %v9758_v5 = vld [vmem:[#allocation5 + $0x2c] ss:$16 sps:$4 sm:$0xff]   ;;  %v9760_v6 = vld [vmem:[#allocation5 + $0x20] ss:$16 sps:$4 sm:$0xff]   ;;  %v9761_v7 = vld [vmem:[#allocation5 + $0x28] ss:$16 sps:$4 sm:$0xff]  }
  0x81   :  { %3049 = vmatprep.subr.bf16.mxu0 %v9756_v4  ;;  %3377 = vmatprep.subr.bf16.mxu1 %v9758_v5  ;;  %v9762_v8 = vld [vmem:[#allocation5 + $0x44] ss:$16 sps:$4 sm:$0xff]   ;;  %v9764_v9 = vld [vmem:[#allocation5 + $0x4c] ss:$16 sps:$4 sm:$0xff]   ;;  %v9766_v10 = vld [vmem:[#allocation5 + $0x40] ss:$16 sps:$4 sm:$0xff]  }
  0x82   :  { %v9767_v11 = vld [vmem:[#allocation5 + $0x48] ss:$16 sps:$4 sm:$0xff]   ;;  %v9768_v12 = vld [vmem:[#allocation5 + $0x64] ss:$16 sps:$4 sm:$0xff]   ;;  %v9770_v13 = vld [vmem:[#allocation5 + $0x6c] ss:$16 sps:$4 sm:$0xff]  }
  0x83   :  { %v9772_v14 = vld [vmem:[#allocation5 + $0x60] ss:$16 sps:$4 sm:$0xff]   ;;  %v9773_v15 = vld [vmem:[#allocation5 + $0x68] ss:$16 sps:$4 sm:$0xff]   ;;  %v9774_v16 = vld [vmem:[#allocation5 + $0x84] ss:$16 sps:$4 sm:$0xff]  }
  0x84   :  { %3050 = vmatpush1.bf16.msra.mxu0 %v9760_v6  ;;  %3378 = vmatpush1.bf16.msra.mxu1 %v9761_v7  ;;  %v9776_v17 = vld [vmem:[#allocation5 + $0x8c] ss:$16 sps:$4 sm:$0xff]   ;;  %v9778_v18 = vld [vmem:[#allocation5 + $0x80] ss:$16 sps:$4 sm:$0xff]   ;;  %v9779_v19 = vld [vmem:[#allocation5 + $0x88] ss:$16 sps:$4 sm:$0xff]  }
  0x85   :  { %3051 = vmatprep.subr.bf16.mxu0 %v9762_v8  ;;  %3379 = vmatprep.subr.bf16.mxu1 %v9764_v9  ;;  %v9780_v20 = vld [vmem:[#allocation5 + $0xa4] ss:$16 sps:$4 sm:$0xff]   ;;  %v9782_v21 = vld [vmem:[#allocation5 + $0xac] ss:$16 sps:$4 sm:$0xff]   ;;  %v9784_v22 = vld [vmem:[#allocation5 + $0xa0] ss:$16 sps:$4 sm:$0xff]  }
  0x86   :  { %v9785_v23 = vld [vmem:[#allocation5 + $0xa8] ss:$16 sps:$4 sm:$0xff]   ;;  %v9786_v24 = vld [vmem:[#allocation5 + $0xc4] ss:$16 sps:$4 sm:$0xff]   ;;  %v9788_v25 = vld [vmem:[#allocation5 + $0xcc] ss:$16 sps:$4 sm:$0xff]  }
  0x87   :  { %v9790_v26 = vld [vmem:[#allocation5 + $0xc0] ss:$16 sps:$4 sm:$0xff]   ;;  %v9791_v27 = vld [vmem:[#allocation5 + $0xc8] ss:$16 sps:$4 sm:$0xff]   ;;  %v9792_v28 = vld [vmem:[#allocation5 + $0xe4] ss:$16 sps:$4 sm:$0xff]  }
  0x88   :  { %3052 = vmatpush1.bf16.msra.mxu0 %v9766_v10  ;;  %3380 = vmatpush1.bf16.msra.mxu1 %v9767_v11  ;;  %v9794_v29 = vld [vmem:[#allocation5 + $0xec] ss:$16 sps:$4 sm:$0xff]   ;;  %v9796_v30 = vld [vmem:[#allocation5 + $0xe0] ss:$16 sps:$4 sm:$0xff]   ;;  %v9797_v31 = vld [vmem:[#allocation5 + $0xe8] ss:$16 sps:$4 sm:$0xff]  }
  0x89   :  { %3053 = vmatprep.subr.bf16.mxu0 %v9768_v12  ;;  %3381 = vmatprep.subr.bf16.mxu1 %v9770_v13  ;;  %v9798_v32 = vld [vmem:[#allocation5 + $0x104] ss:$16 sps:$4 sm:$0xff]   ;;  %v9800_v33 = vld [vmem:[#allocation5 + $0x10c] ss:$16 sps:$4 sm:$0xff]   ;;  %v9802_v34 = vld [vmem:[#allocation5 + $0x100] ss:$16 sps:$4 sm:$0xff]  }
  0x8a   :  { %v9803_v35 = vld [vmem:[#allocation5 + $0x108] ss:$16 sps:$4 sm:$0xff]   ;;  %v9804_v36 = vld [vmem:[#allocation5 + $0x124] ss:$16 sps:$4 sm:$0xff]   ;;  %v9806_v37 = vld [vmem:[#allocation5 + $0x12c] ss:$16 sps:$4 sm:$0xff]  }
  0x8b   :  { %v9808_v38 = vld [vmem:[#allocation5 + $0x120] ss:$16 sps:$4 sm:$0xff]   ;;  %v9809_v39 = vld [vmem:[#allocation5 + $0x128] ss:$16 sps:$4 sm:$0xff]   ;;  %v9810_v40 = vld [vmem:[#allocation5 + $0x144] ss:$16 sps:$4 sm:$0xff]  }
  0x8c   :  { %3054 = vmatpush1.bf16.msra.mxu0 %v9772_v14  ;;  %3382 = vmatpush1.bf16.msra.mxu1 %v9773_v15  ;;  %v9812_v41 = vld [vmem:[#allocation5 + $0x14c] ss:$16 sps:$4 sm:$0xff]   ;;  %v9814_v42 = vld [vmem:[#allocation5 + $0x140] ss:$16 sps:$4 sm:$0xff]   ;;  %v9815_v43 = vld [vmem:[#allocation5 + $0x148] ss:$16 sps:$4 sm:$0xff]  }
  0x8d   :  { %3055 = vmatprep.subr.bf16.mxu0 %v9774_v16  ;;  %3383 = vmatprep.subr.bf16.mxu1 %v9776_v17  ;;  %v9816_v44 = vld [vmem:[#allocation5 + $0x164] ss:$16 sps:$4 sm:$0xff]   ;;  %v9818_v45 = vld [vmem:[#allocation5 + $0x16c] ss:$16 sps:$4 sm:$0xff]   ;;  %v9820_v47 = vld [vmem:[#allocation5 + $0x160] ss:$16 sps:$4 sm:$0xff]  }
  0x8e   :  { %v138_v46 = vld [vmem:[%s11846_s0 + $0x8] sm:$0xff]  ;;  %v9822_v50 = vld [vmem:[#allocation5 + $0x184] ss:$16 sps:$4 sm:$0xff]   ;;  %vm11507_vm0 = vmmov 0   ;;  %vm4342_vm1 = vcmask 523264  }
  0x8f   :  { %v153_v48 = vpack.c.bf16 %v138_v46, %v138_v46  ;;  %v9821_v49 = vld [vmem:[#allocation5 + $0x168] ss:$16 sps:$4 sm:$0xff]   ;;  %v9824_v51 = vld [vmem:[#allocation5 + $0x18c] ss:$16 sps:$4 sm:$0xff]   ;;  %v9826_v52 = vld [vmem:[#allocation5 + $0x180] ss:$16 sps:$4 sm:$0xff]  }
  0x90   :  { %3056 = vmatpush1.bf16.msra.mxu0 %v9778_v18  ;;  %3384 = vmatpush1.bf16.msra.mxu1 %v9779_v19  ;;  %v9827_v53 = vld [vmem:[#allocation5 + $0x188] ss:$16 sps:$4 sm:$0xff]   ;;  %v9828_v54 = vld [vmem:[#allocation5 + $0x1a4] ss:$16 sps:$4 sm:$0xff]   ;;  %v9830_v55 = vld [vmem:[#allocation5 + $0x1ac] ss:$16 sps:$4 sm:$0xff]  }
  0x91   :  { %3057 = vmatprep.subr.bf16.mxu0 %v9780_v20  ;;  %3385 = vmatprep.subr.bf16.mxu1 %v9782_v21  ;;  %v9832_v56 = vld [vmem:[#allocation5 + $0x1a0] ss:$16 sps:$4 sm:$0xff]   ;;  %v9833_v57 = vld [vmem:[#allocation5 + $0x1a8] ss:$16 sps:$4 sm:$0xff]   ;;  %v9834_v58 = vld [vmem:[#allocation5 + $0x1c4] ss:$16 sps:$4 sm:$0xff]  }
  0x92   :  { %3079 = vmatprep.mubr.bf16.mxu0 %v153_v48  ;;  %3407 = vmatprep.mubr.bf16.mxu1 %v153_v48  ;;  %v9836_v59 = vld [vmem:[#allocation5 + $0x1cc] ss:$16 sps:$4 sm:$0xff]   ;;  %v9838_v60 = vld [vmem:[#allocation5 + $0x1c0] ss:$16 sps:$4 sm:$0xff]   ;;  %v9839_v61 = vld [vmem:[#allocation5 + $0x1c8] ss:$16 sps:$4 sm:$0xff]  }
  0x93   :  { %v9840_v62 = vld [vmem:[#allocation5 + $0x1e4] ss:$16 sps:$4 sm:$0xff]   ;;  %v9842_v63 = vld [vmem:[#allocation5 + $0x1ec] ss:$16 sps:$4 sm:$0xff]   ;;  %v9844_v0 = vld [vmem:[#allocation5 + $0x1e0] ss:$16 sps:$4 sm:$0xff]  }
  0x94   :  { %3058 = vmatpush1.bf16.msra.mxu0 %v9784_v22  ;;  %3386 = vmatpush1.bf16.msra.mxu1 %v9785_v23  ;;  %v9845_v1 = vld [vmem:[#allocation5 + $0x1e8] ss:$16 sps:$4 sm:$0xff]   ;;  %v9848_v3 = vld [vmem:[#allocation5 + $0x204] ss:$16 sps:$4 sm:$0xff]   ;;  %v9851_v4 = vld [vmem:[#allocation5 + $0x20c] ss:$16 sps:$4 sm:$0xff]  }
  0x95   :  { %3059 = vmatprep.subr.bf16.mxu0 %v9786_v24  ;;  %3387 = vmatprep.subr.bf16.mxu1 %v9788_v25  ;;  %v137_v2 = vld [vmem:[%s11846_s0] sm:$0xff]  ;;  %v9857_v9 = vld [vmem:[#allocation5 + $0x22c] ss:$16 sps:$4 sm:$0xff]  }
  0x96   :  { %v152_v5 = vpack.c.bf16 %v137_v2, %v137_v2  ;;  %v9846_v6 = vld [vmem:[#allocation5 + $0x200] ss:$16 sps:$4 sm:$0xff]   ;;  %v9849_v7 = vld [vmem:[#allocation5 + $0x208] ss:$16 sps:$4 sm:$0xff]   ;;  %v9854_v8 = vld [vmem:[#allocation5 + $0x224] ss:$16 sps:$4 sm:$0xff]  }
  0x97   :  { %v9852_v10 = vld [vmem:[#allocation5 + $0x220] ss:$16 sps:$4 sm:$0xff]   ;;  %v9855_v11 = vld [vmem:[#allocation5 + $0x228] ss:$16 sps:$4 sm:$0xff]   ;;  %v9860_v12 = vld [vmem:[#allocation5 + $0x244] ss:$16 sps:$4 sm:$0xff]  }
  0x98   :  { %3060 = vmatpush1.bf16.msra.mxu0 %v9790_v26  ;;  %3388 = vmatpush1.bf16.msra.mxu1 %v9791_v27  ;;  %v9863_v13 = vld [vmem:[#allocation5 + $0x24c] ss:$16 sps:$4 sm:$0xff]   ;;  %v9858_v14 = vld [vmem:[#allocation5 + $0x240] ss:$16 sps:$4 sm:$0xff]   ;;  %v9861_v15 = vld [vmem:[#allocation5 + $0x248] ss:$16 sps:$4 sm:$0xff]  }
  0x99   :  { %3061 = vmatprep.subr.bf16.mxu0 %v9792_v28  ;;  %3389 = vmatprep.subr.bf16.mxu1 %v9794_v29  ;;  %v9866_v16 = vld [vmem:[#allocation5 + $0x264] ss:$16 sps:$4 sm:$0xff]   ;;  %v9869_v17 = vld [vmem:[#allocation5 + $0x26c] ss:$16 sps:$4 sm:$0xff]   ;;  %v9864_v18 = vld [vmem:[#allocation5 + $0x260] ss:$16 sps:$4 sm:$0xff]  }
  0x9a   :  { %v9867_v19 = vld [vmem:[#allocation5 + $0x268] ss:$16 sps:$4 sm:$0xff]   ;;  %v9872_v20 = vld [vmem:[#allocation5 + $0x284] ss:$16 sps:$4 sm:$0xff]   ;;  %v9875_v21 = vld [vmem:[#allocation5 + $0x28c] ss:$16 sps:$4 sm:$0xff]  }
  0x9b   :  { %v9870_v22 = vld [vmem:[#allocation5 + $0x280] ss:$16 sps:$4 sm:$0xff]   ;;  %v9873_v23 = vld [vmem:[#allocation5 + $0x288] ss:$16 sps:$4 sm:$0xff]   ;;  %v9878_v24 = vld [vmem:[#allocation5 + $0x2a4] ss:$16 sps:$4 sm:$0xff]  }
  0x9c   :  { %3062 = vmatpush1.bf16.msra.mxu0 %v9796_v30  ;;  %3390 = vmatpush1.bf16.msra.mxu1 %v9797_v31  ;;  %v9881_v25 = vld [vmem:[#allocation5 + $0x2ac] ss:$16 sps:$4 sm:$0xff]   ;;  %v9876_v26 = vld [vmem:[#allocation5 + $0x2a0] ss:$16 sps:$4 sm:$0xff]   ;;  %v9879_v27 = vld [vmem:[#allocation5 + $0x2a8] ss:$16 sps:$4 sm:$0xff]  }
  0x9d   :  { %3063 = vmatprep.subr.bf16.mxu0 %v9798_v32  ;;  %3391 = vmatprep.subr.bf16.mxu1 %v9800_v33  ;;  %v9884_v28 = vld [vmem:[#allocation5 + $0x2c4] ss:$16 sps:$4 sm:$0xff]   ;;  %v9887_v29 = vld [vmem:[#allocation5 + $0x2cc] ss:$16 sps:$4 sm:$0xff]   ;;  %v9882_v31 = vld [vmem:[#allocation5 + $0x2c0] ss:$16 sps:$4 sm:$0xff]  }
  0x9e   :  { %v140_v30 = vld [vmem:[%s11846_s0 + $0x18] sm:$0xff]  ;;  %v9908_v46 = vld [vmem:[#allocation5 + $0x344] ss:$16 sps:$4 sm:$0xff]  }
  0x9f   :  { %v155_v32 = vpack.c.bf16 %v140_v30, %v140_v30  ;;  %v9885_v33 = vld [vmem:[#allocation5 + $0x2c8] ss:$16 sps:$4 sm:$0xff]   ;;  %v9906_v48 = vld [vmem:[#allocation5 + $0x340] ss:$16 sps:$4 sm:$0xff]   ;;  %v9938_v2 = vld [vmem:[#allocation5 + $0x3e4] ss:$16 sps:$4 sm:$0xff]  }
  0xa0   :  { %3064 = vmatpush1.bf16.msra.mxu0 %v9802_v34  ;;  %3392 = vmatpush1.bf16.msra.mxu1 %v9803_v35  ;;  %v9890_v34 = vld [vmem:[#allocation5 + $0x2e4] ss:$16 sps:$4 sm:$0xff]   ;;  %v9893_v35 = vld [vmem:[#allocation5 + $0x2ec] ss:$16 sps:$4 sm:$0xff]  }
  0xa1   :  { %3065 = vmatprep.subr.bf16.mxu0 %v9804_v36  ;;  %3393 = vmatprep.subr.bf16.mxu1 %v9806_v37  ;;  %v9888_v36 = vld [vmem:[#allocation5 + $0x2e0] ss:$16 sps:$4 sm:$0xff]   ;;  %v9891_v37 = vld [vmem:[#allocation5 + $0x2e8] ss:$16 sps:$4 sm:$0xff]   ;;  %v9974_v30 = vld [vmem:[#allocation5 + $0x4a4] ss:$16 sps:$4 sm:$0xff]  }
  0xa4   :  { %3066 = vmatpush1.bf16.msra.mxu0 %v9808_v38  ;;  %3394 = vmatpush1.bf16.msra.mxu1 %v9809_v39  ;;  %v9896_v38 = vld [vmem:[#allocation5 + $0x304] ss:$16 sps:$4 sm:$0xff]   ;;  %v9899_v39 = vld [vmem:[#allocation5 + $0x30c] ss:$16 sps:$4 sm:$0xff]  }
  0xa5   :  { %3067 = vmatprep.subr.bf16.mxu0 %v9810_v40  ;;  %3395 = vmatprep.subr.bf16.mxu1 %v9812_v41  ;;  %v9894_v40 = vld [vmem:[#allocation5 + $0x300] ss:$16 sps:$4 sm:$0xff]   ;;  %v9897_v41 = vld [vmem:[#allocation5 + $0x308] ss:$16 sps:$4 sm:$0xff]  }
  0xa8   :  { %3068 = vmatpush1.bf16.msra.mxu0 %v9814_v42  ;;  %3396 = vmatpush1.bf16.msra.mxu1 %v9815_v43  ;;  %v9902_v42 = vld [vmem:[#allocation5 + $0x324] ss:$16 sps:$4 sm:$0xff]   ;;  %v9905_v43 = vld [vmem:[#allocation5 + $0x32c] ss:$16 sps:$4 sm:$0xff]  }
  0xa9   :  { %3069 = vmatprep.subr.bf16.mxu0 %v9816_v44  ;;  %3397 = vmatprep.subr.bf16.mxu1 %v9818_v45  ;;  %v9900_v44 = vld [vmem:[#allocation5 + $0x320] ss:$16 sps:$4 sm:$0xff]   ;;  %v9903_v45 = vld [vmem:[#allocation5 + $0x328] ss:$16 sps:$4 sm:$0xff]  }
  0xac   :  { %3070 = vmatpush1.bf16.msra.mxu0 %v9820_v47  ;;  %3398 = vmatpush1.bf16.msra.mxu1 %v9821_v49  ;;  %v9911_v47 = vld [vmem:[#allocation5 + $0x34c] ss:$16 sps:$4 sm:$0xff]   ;;  %v9909_v49 = vld [vmem:[#allocation5 + $0x348] ss:$16 sps:$4 sm:$0xff]  }
  0xad   :  { %3071 = vmatprep.subr.bf16.mxu0 %v9822_v50  ;;  %3399 = vmatprep.subr.bf16.mxu1 %v9824_v51  ;;  %v9914_v50 = vld [vmem:[#allocation5 + $0x364] ss:$16 sps:$4 sm:$0xff]   ;;  %v9917_v51 = vld [vmem:[#allocation5 + $0x36c] ss:$16 sps:$4 sm:$0xff]  }
  0xb0   :  { %3072 = vmatpush1.bf16.msra.mxu0 %v9826_v52  ;;  %3400 = vmatpush1.bf16.msra.mxu1 %v9827_v53  ;;  %v9912_v52 = vld [vmem:[#allocation5 + $0x360] ss:$16 sps:$4 sm:$0xff]   ;;  %v9915_v53 = vld [vmem:[#allocation5 + $0x368] ss:$16 sps:$4 sm:$0xff]  }
  0xb1   :  { %3073 = vmatprep.subr.bf16.mxu0 %v9828_v54  ;;  %3401 = vmatprep.subr.bf16.mxu1 %v9830_v55  ;;  %v9920_v54 = vld [vmem:[#allocation5 + $0x384] ss:$16 sps:$4 sm:$0xff]   ;;  %v9923_v55 = vld [vmem:[#allocation5 + $0x38c] ss:$16 sps:$4 sm:$0xff]  }
  0xb4   :  { %3074 = vmatpush1.bf16.msra.mxu0 %v9832_v56  ;;  %3402 = vmatpush1.bf16.msra.mxu1 %v9833_v57  ;;  %v9918_v56 = vld [vmem:[#allocation5 + $0x380] ss:$16 sps:$4 sm:$0xff]   ;;  %v9921_v57 = vld [vmem:[#allocation5 + $0x388] ss:$16 sps:$4 sm:$0xff]  }
  0xb5   :  { %3075 = vmatprep.subr.bf16.mxu0 %v9834_v58  ;;  %3403 = vmatprep.subr.bf16.mxu1 %v9836_v59  ;;  %v9926_v58 = vld [vmem:[#allocation5 + $0x3a4] ss:$16 sps:$4 sm:$0xff]   ;;  %v9929_v59 = vld [vmem:[#allocation5 + $0x3ac] ss:$16 sps:$4 sm:$0xff]  }
  0xb8   :  { %3076 = vmatpush1.bf16.msra.mxu0 %v9838_v60  ;;  %3404 = vmatpush1.bf16.msra.mxu1 %v9839_v61  ;;  %v9924_v60 = vld [vmem:[#allocation5 + $0x3a0] ss:$16 sps:$4 sm:$0xff]   ;;  %v9927_v61 = vld [vmem:[#allocation5 + $0x3a8] ss:$16 sps:$4 sm:$0xff]  }
  0xb9   :  { %3077 = vmatprep.subr.bf16.mxu0 %v9840_v62  ;;  %3405 = vmatprep.subr.bf16.mxu1 %v9842_v63  ;;  %v9932_v62 = vld [vmem:[#allocation5 + $0x3c4] ss:$16 sps:$4 sm:$0xff]   ;;  %v9935_v63 = vld [vmem:[#allocation5 + $0x3cc] ss:$16 sps:$4 sm:$0xff]  }
  0xbc   :  { %3078 = vmatpush1.bf16.msra.mxu0 %v9844_v0  ;;  %3406 = vmatpush1.bf16.msra.mxu1 %v9845_v1  ;;  %v9930_v0 = vld [vmem:[#allocation5 + $0x3c0] ss:$16 sps:$4 sm:$0xff]   ;;  %v9933_v1 = vld [vmem:[#allocation5 + $0x3c8] ss:$16 sps:$4 sm:$0xff]  }
  0xbd   :  { %3088 = vmatprep.subr.bf16.mxu0 %v9848_v3  ;;  %3416 = vmatprep.subr.bf16.mxu1 %v9851_v4  ;;  %v9941_v3 = vld [vmem:[#allocation5 + $0x3ec] ss:$16 sps:$4 sm:$0xff]   ;;  %v9936_v4 = vld [vmem:[#allocation5 + $0x3e0] ss:$16 sps:$4 sm:$0xff]  }
  0xbf   :  { %3080 = vmatmul.mubr.bf16.vlgmr.msra.gmra.mrb[0].mxu0 %v152_v5  ;;  %3408 = vmatmul.mubr.bf16.vlgmr.msra.gmra.mrb[0].mxu1 %v152_v5  ;;  %v9939_v5 = vld [vmem:[#allocation5 + $0x3e8] ss:$16 sps:$4 sm:$0xff]  }
  0xc0   :  { %3089 = vmatpush1.bf16.msra.mxu0 %v9846_v6  ;;  %3417 = vmatpush1.bf16.msra.mxu1 %v9849_v7  ;;  %v9944_v6 = vld [vmem:[#allocation5 + $0x404] ss:$16 sps:$4 sm:$0xff]  }
  0xc1   :  { %3090 = vmatprep.subr.bf16.mxu0 %v9854_v8  ;;  %3418 = vmatprep.subr.bf16.mxu1 %v9857_v9  ;;  %v139_v7 = vld [vmem:[%s11846_s0 + $0x10] sm:$0xff]  ;;  %v9947_v8 = vld [vmem:[#allocation5 + $0x40c] ss:$16 sps:$4 sm:$0xff]  }
  0xc2   :  { %3120 = vmatprep.mubr.bf16.mxu0 %v155_v32  ;;  %3448 = vmatprep.mubr.bf16.mxu1 %v155_v32  ;;  %v9942_v9 = vld [vmem:[#allocation5 + $0x400] ss:$16 sps:$4 sm:$0xff]  }
  0xc3   :  { %v9972_v32 = vld [vmem:[#allocation5 + $0x4a0] ss:$16 sps:$4 sm:$0xff]  }
  0xc4   :  { %3091 = vmatpush1.bf16.msra.mxu0 %v9852_v10  ;;  %3419 = vmatpush1.bf16.msra.mxu1 %v9855_v11  ;;  %v9945_v10 = vld [vmem:[#allocation5 + $0x408] ss:$16 sps:$4 sm:$0xff]   ;;  %v154_v11 = vpack.c.bf16 %v139_v7, %v139_v7  ;;  %v10037_v7 = vld [vmem:[#allocation5 + $0x5ec] ss:$16 sps:$4 sm:$0xff]  }
  0xc5   :  { %3092 = vmatprep.subr.bf16.mxu0 %v9860_v12  ;;  %3420 = vmatprep.subr.bf16.mxu1 %v9863_v13  ;;  %v9950_v12 = vld [vmem:[#allocation5 + $0x424] ss:$16 sps:$4 sm:$0xff]   ;;  %v9953_v13 = vld [vmem:[#allocation5 + $0x42c] ss:$16 sps:$4 sm:$0xff]  }
  0xc8   :  { %3093 = vmatpush1.bf16.msra.mxu0 %v9858_v14  ;;  %3421 = vmatpush1.bf16.msra.mxu1 %v9861_v15  ;;  %v142_v14 = vld [vmem:[%s11846_s0 + $0x28] sm:$0xff] }
  0xc9   :  { %3094 = vmatprep.subr.bf16.mxu0 %v9866_v16  ;;  %3422 = vmatprep.subr.bf16.mxu1 %v9869_v17  ;;  %v157_v15 = vpack.c.bf16 %v142_v14, %v142_v14  ;;  %v9948_v16 = vld [vmem:[#allocation5 + $0x420] ss:$16 sps:$4 sm:$0xff]   ;;  %v9951_v17 = vld [vmem:[#allocation5 + $0x428] ss:$16 sps:$4 sm:$0xff]  }
  0xca   :  { %v10041_v14 = vld [vmem:[#allocation5 + $0x608] ss:$16 sps:$4 sm:$0xff]  }
  0xcc   :  { %3095 = vmatpush1.bf16.msra.mxu0 %v9864_v18  ;;  %3423 = vmatpush1.bf16.msra.mxu1 %v9867_v19  ;;  %v9956_v18 = vld [vmem:[#allocation5 + $0x444] ss:$16 sps:$4 sm:$0xff]   ;;  %v9959_v19 = vld [vmem:[#allocation5 + $0x44c] ss:$16 sps:$4 sm:$0xff]  }
  0xcd   :  { %3096 = vmatprep.subr.bf16.mxu0 %v9872_v20  ;;  %3424 = vmatprep.subr.bf16.mxu1 %v9875_v21  ;;  %v9954_v20 = vld [vmem:[#allocation5 + $0x440] ss:$16 sps:$4 sm:$0xff]   ;;  %v9957_v21 = vld [vmem:[#allocation5 + $0x448] ss:$16 sps:$4 sm:$0xff]  }
  0xd0   :  { %3097 = vmatpush1.bf16.msra.mxu0 %v9870_v22  ;;  %3425 = vmatpush1.bf16.msra.mxu1 %v9873_v23  ;;  %v9962_v22 = vld [vmem:[#allocation5 + $0x464] ss:$16 sps:$4 sm:$0xff]   ;;  %v9965_v23 = vld [vmem:[#allocation5 + $0x46c] ss:$16 sps:$4 sm:$0xff]  }
  0xd1   :  { %3098 = vmatprep.subr.bf16.mxu0 %v9878_v24  ;;  %3426 = vmatprep.subr.bf16.mxu1 %v9881_v25  ;;  %v9960_v24 = vld [vmem:[#allocation5 + $0x460] ss:$16 sps:$4 sm:$0xff]   ;;  %v9963_v25 = vld [vmem:[#allocation5 + $0x468] ss:$16 sps:$4 sm:$0xff]  }
  0xd4   :  { %3099 = vmatpush1.bf16.msra.mxu0 %v9876_v26  ;;  %3427 = vmatpush1.bf16.msra.mxu1 %v9879_v27  ;;  %v9968_v26 = vld [vmem:[#allocation5 + $0x484] ss:$16 sps:$4 sm:$0xff]   ;;  %v9971_v27 = vld [vmem:[#allocation5 + $0x48c] ss:$16 sps:$4 sm:$0xff]  }
  0xd5   :  { %3100 = vmatprep.subr.bf16.mxu0 %v9884_v28  ;;  %3428 = vmatprep.subr.bf16.mxu1 %v9887_v29  ;;  %v9966_v28 = vld [vmem:[#allocation5 + $0x480] ss:$16 sps:$4 sm:$0xff]   ;;  %v9969_v29 = vld [vmem:[#allocation5 + $0x488] ss:$16 sps:$4 sm:$0xff]  }
  0xd8   :  { %3101 = vmatpush1.bf16.msra.mxu0 %v9882_v31  ;;  %3429 = vmatpush1.bf16.msra.mxu1 %v9885_v33  ;;  %v9977_v31 = vld [vmem:[#allocation5 + $0x4ac] ss:$16 sps:$4 sm:$0xff]   ;;  %v9975_v33 = vld [vmem:[#allocation5 + $0x4a8] ss:$16 sps:$4 sm:$0xff]  }
  0xd9   :  { %3102 = vmatprep.subr.bf16.mxu0 %v9890_v34  ;;  %3430 = vmatprep.subr.bf16.mxu1 %v9893_v35  ;;  %v9980_v34 = vld [vmem:[#allocation5 + $0x4c4] ss:$16 sps:$4 sm:$0xff]   ;;  %v9983_v35 = vld [vmem:[#allocation5 + $0x4cc] ss:$16 sps:$4 sm:$0xff]  }
  0xdc   :  { %3103 = vmatpush1.bf16.msra.mxu0 %v9888_v36  ;;  %3431 = vmatpush1.bf16.msra.mxu1 %v9891_v37  ;;  %v9978_v36 = vld [vmem:[#allocation5 + $0x4c0] ss:$16 sps:$4 sm:$0xff]   ;;  %v9981_v37 = vld [vmem:[#allocation5 + $0x4c8] ss:$16 sps:$4 sm:$0xff]  }
  0xdd   :  { %3104 = vmatprep.subr.bf16.mxu0 %v9896_v38  ;;  %3432 = vmatprep.subr.bf16.mxu1 %v9899_v39  ;;  %v9986_v38 = vld [vmem:[#allocation5 + $0x4e4] ss:$16 sps:$4 sm:$0xff]   ;;  %v9989_v39 = vld [vmem:[#allocation5 + $0x4ec] ss:$16 sps:$4 sm:$0xff]  }
  0xe0   :  { %3105 = vmatpush1.bf16.msra.mxu0 %v9894_v40  ;;  %3433 = vmatpush1.bf16.msra.mxu1 %v9897_v41  ;;  %v9984_v40 = vld [vmem:[#allocation5 + $0x4e0] ss:$16 sps:$4 sm:$0xff]   ;;  %v9987_v41 = vld [vmem:[#allocation5 + $0x4e8] ss:$16 sps:$4 sm:$0xff]  }
  0xe1   :  { %3106 = vmatprep.subr.bf16.mxu0 %v9902_v42  ;;  %3434 = vmatprep.subr.bf16.mxu1 %v9905_v43  ;;  %v9992_v42 = vld [vmem:[#allocation5 + $0x504] ss:$16 sps:$4 sm:$0xff]   ;;  %v9995_v43 = vld [vmem:[#allocation5 + $0x50c] ss:$16 sps:$4 sm:$0xff]  }
  0xe4   :  { %3107 = vmatpush1.bf16.msra.mxu0 %v9900_v44  ;;  %3435 = vmatpush1.bf16.msra.mxu1 %v9903_v45  ;;  %v9990_v44 = vld [vmem:[#allocation5 + $0x500] ss:$16 sps:$4 sm:$0xff]   ;;  %v9993_v45 = vld [vmem:[#allocation5 + $0x508] ss:$16 sps:$4 sm:$0xff]  }
  0xe5   :  { %3108 = vmatprep.subr.bf16.mxu0 %v9908_v46  ;;  %3436 = vmatprep.subr.bf16.mxu1 %v9911_v47  ;;  %v9998_v46 = vld [vmem:[#allocation5 + $0x524] ss:$16 sps:$4 sm:$0xff]   ;;  %v10001_v47 = vld [vmem:[#allocation5 + $0x52c] ss:$16 sps:$4 sm:$0xff]  }
  0xe8   :  { %3109 = vmatpush1.bf16.msra.mxu0 %v9906_v48  ;;  %3437 = vmatpush1.bf16.msra.mxu1 %v9909_v49  ;;  %v9996_v48 = vld [vmem:[#allocation5 + $0x520] ss:$16 sps:$4 sm:$0xff]   ;;  %v9999_v49 = vld [vmem:[#allocation5 + $0x528] ss:$16 sps:$4 sm:$0xff]  }
  0xe9   :  { %3110 = vmatprep.subr.bf16.mxu0 %v9914_v50  ;;  %3438 = vmatprep.subr.bf16.mxu1 %v9917_v51  ;;  %v10004_v50 = vld [vmem:[#allocation5 + $0x544] ss:$16 sps:$4 sm:$0xff]   ;;  %v10007_v51 = vld [vmem:[#allocation5 + $0x54c] ss:$16 sps:$4 sm:$0xff]  }
  0xec   :  { %3111 = vmatpush1.bf16.msra.mxu0 %v9912_v52  ;;  %3439 = vmatpush1.bf16.msra.mxu1 %v9915_v53  ;;  %v10002_v52 = vld [vmem:[#allocation5 + $0x540] ss:$16 sps:$4 sm:$0xff]   ;;  %v10005_v53 = vld [vmem:[#allocation5 + $0x548] ss:$16 sps:$4 sm:$0xff]  }
  0xed   :  { %3112 = vmatprep.subr.bf16.mxu0 %v9920_v54  ;;  %3440 = vmatprep.subr.bf16.mxu1 %v9923_v55  ;;  %v10010_v54 = vld [vmem:[#allocation5 + $0x564] ss:$16 sps:$4 sm:$0xff]   ;;  %v10013_v55 = vld [vmem:[#allocation5 + $0x56c] ss:$16 sps:$4 sm:$0xff]  }
  0xf0   :  { %3113 = vmatpush1.bf16.msra.mxu0 %v9918_v56  ;;  %3441 = vmatpush1.bf16.msra.mxu1 %v9921_v57  ;;  %v10008_v56 = vld [vmem:[#allocation5 + $0x560] ss:$16 sps:$4 sm:$0xff]   ;;  %v10011_v57 = vld [vmem:[#allocation5 + $0x568] ss:$16 sps:$4 sm:$0xff]  }
  0xf1   :  { %3114 = vmatprep.subr.bf16.mxu0 %v9926_v58  ;;  %3442 = vmatprep.subr.bf16.mxu1 %v9929_v59  ;;  %v10016_v58 = vld [vmem:[#allocation5 + $0x584] ss:$16 sps:$4 sm:$0xff]   ;;  %v10019_v59 = vld [vmem:[#allocation5 + $0x58c] ss:$16 sps:$4 sm:$0xff]  }
  0xf4   :  { %3115 = vmatpush1.bf16.msra.mxu0 %v9924_v60  ;;  %3443 = vmatpush1.bf16.msra.mxu1 %v9927_v61  ;;  %v10014_v60 = vld [vmem:[#allocation5 + $0x580] ss:$16 sps:$4 sm:$0xff]   ;;  %v10017_v61 = vld [vmem:[#allocation5 + $0x588] ss:$16 sps:$4 sm:$0xff]  }
  0xf5   :  { %3116 = vmatprep.subr.bf16.mxu0 %v9932_v62  ;;  %3444 = vmatprep.subr.bf16.mxu1 %v9935_v63  ;;  %v10022_v62 = vld [vmem:[#allocation5 + $0x5a4] ss:$16 sps:$4 sm:$0xff]   ;;  %v10025_v63 = vld [vmem:[#allocation5 + $0x5ac] ss:$16 sps:$4 sm:$0xff]  }
  0xf8   :  { %3117 = vmatpush1.bf16.msra.mxu0 %v9930_v0  ;;  %3445 = vmatpush1.bf16.msra.mxu1 %v9933_v1  ;;  %v10020_v0 = vld [vmem:[#allocation5 + $0x5a0] ss:$16 sps:$4 sm:$0xff]   ;;  %v10023_v1 = vld [vmem:[#allocation5 + $0x5a8] ss:$16 sps:$4 sm:$0xff]  }
  0xf9   :  { %3118 = vmatprep.subr.bf16.mxu0 %v9938_v2  ;;  %3446 = vmatprep.subr.bf16.mxu1 %v9941_v3  ;;  %v10028_v2 = vld [vmem:[#allocation5 + $0x5c4] ss:$16 sps:$4 sm:$0xff]   ;;  %v10031_v3 = vld [vmem:[#allocation5 + $0x5cc] ss:$16 sps:$4 sm:$0xff]  }
  0xfc   :  { %3119 = vmatpush1.bf16.msra.mxu0 %v9936_v4  ;;  %3447 = vmatpush1.bf16.msra.mxu1 %v9939_v5  ;;  %v10026_v4 = vld [vmem:[#allocation5 + $0x5c0] ss:$16 sps:$4 sm:$0xff]   ;;  %v10029_v5 = vld [vmem:[#allocation5 + $0x5c8] ss:$16 sps:$4 sm:$0xff]  }
  0xfd   :  { %3129 = vmatprep.subr.bf16.mxu0 %v9944_v6  ;;  %3457 = vmatprep.subr.bf16.mxu1 %v9947_v8  ;;  %v10034_v6 = vld [vmem:[#allocation5 + $0x5e4] ss:$16 sps:$4 sm:$0xff]   ;;  %v10032_v8 = vld [vmem:[#allocation5 + $0x5e0] ss:$16 sps:$4 sm:$0xff]  }
  0xff   :  { %3121 = vmatmul.mubr.bf16.vlgmr.msra.gmra.mrb[0].mxu0 %v154_v11  ;;  %3449 = vmatmul.mubr.bf16.vlgmr.msra.gmra.mrb[0].mxu1 %v154_v11  ;;  %v141_v11 = vld [vmem:[%s11846_s0 + $0x20] sm:$0xff] }
 0x100   :  { %3130 = vmatpush1.bf16.msra.mxu0 %v9942_v9  ;;  %3458 = vmatpush1.bf16.msra.mxu1 %v9945_v10  ;;  %v10035_v9 = vld [vmem:[#allocation5 + $0x5e8] ss:$16 sps:$4 sm:$0xff]   ;;  %v10040_v10 = vld [vmem:[#allocation5 + $0x604] ss:$16 sps:$4 sm:$0xff]  }
 0x101   :  { %3131 = vmatprep.subr.bf16.mxu0 %v9950_v12  ;;  %3459 = vmatprep.subr.bf16.mxu1 %v9953_v13  ;;  %v10043_v12 = vld [vmem:[#allocation5 + $0x60c] ss:$16 sps:$4 sm:$0xff]   ;;  %v10038_v13 = vld [vmem:[#allocation5 + $0x600] ss:$16 sps:$4 sm:$0xff]  }
 0x102   :  { %3161 = vmatprep.mubr.bf16.mxu0 %v157_v15  ;;  %3489 = vmatprep.mubr.bf16.mxu1 %v157_v15  ;;  %v156_v15 = vpack.c.bf16 %v141_v11, %v141_v11  ;;  %v10133_v11 = vld [vmem:[#allocation5 + $0x7ec] ss:$16 sps:$4 sm:$0xff]  }
 0x104   :  { %3132 = vmatpush1.bf16.msra.mxu0 %v9948_v16  ;;  %3460 = vmatpush1.bf16.msra.mxu1 %v9951_v17  ;;  %v144_v16 = vld [vmem:[%s11846_s0 + $0x38] sm:$0xff]  ;;  %v10046_v17 = vld [vmem:[#allocation5 + $0x624] ss:$16 sps:$4 sm:$0xff]  }
 0x105   :  { %3133 = vmatprep.subr.bf16.mxu0 %v9956_v18  ;;  %3461 = vmatprep.subr.bf16.mxu1 %v9959_v19  ;;  %v10049_v18 = vld [vmem:[#allocation5 + $0x62c] ss:$16 sps:$4 sm:$0xff]   ;;  %v159_v19 = vpack.c.bf16 %v144_v16, %v144_v16 }
 0x106   :  { %v10139_v16 = vld [vmem:[#allocation5 + $0x80c] ss:$16 sps:$4 sm:$0xff]  }
 0x108   :  { %3134 = vmatpush1.bf16.msra.mxu0 %v9954_v20  ;;  %3462 = vmatpush1.bf16.msra.mxu1 %v9957_v21  ;;  %v10044_v20 = vld [vmem:[#allocation5 + $0x620] ss:$16 sps:$4 sm:$0xff]   ;;  %v10047_v21 = vld [vmem:[#allocation5 + $0x628] ss:$16 sps:$4 sm:$0xff]  }
 0x109   :  { %3135 = vmatprep.subr.bf16.mxu0 %v9962_v22  ;;  %3463 = vmatprep.subr.bf16.mxu1 %v9965_v23  ;;  %v10052_v22 = vld [vmem:[#allocation5 + $0x644] ss:$16 sps:$4 sm:$0xff]   ;;  %v10055_v23 = vld [vmem:[#allocation5 + $0x64c] ss:$16 sps:$4 sm:$0xff]  }
 0x10c   :  { %3136 = vmatpush1.bf16.msra.mxu0 %v9960_v24  ;;  %3464 = vmatpush1.bf16.msra.mxu1 %v9963_v25  ;;  %v10050_v24 = vld [vmem:[#allocation5 + $0x640] ss:$16 sps:$4 sm:$0xff]   ;;  %v10053_v25 = vld [vmem:[#allocation5 + $0x648] ss:$16 sps:$4 sm:$0xff]  }
 0x10d   :  { %3137 = vmatprep.subr.bf16.mxu0 %v9968_v26  ;;  %3465 = vmatprep.subr.bf16.mxu1 %v9971_v27  ;;  %v10058_v26 = vld [vmem:[#allocation5 + $0x664] ss:$16 sps:$4 sm:$0xff]   ;;  %v10061_v27 = vld [vmem:[#allocation5 + $0x66c] ss:$16 sps:$4 sm:$0xff]  }
 0x110   :  { %3138 = vmatpush1.bf16.msra.mxu0 %v9966_v28  ;;  %3466 = vmatpush1.bf16.msra.mxu1 %v9969_v29  ;;  %v10056_v28 = vld [vmem:[#allocation5 + $0x660] ss:$16 sps:$4 sm:$0xff]   ;;  %v10059_v29 = vld [vmem:[#allocation5 + $0x668] ss:$16 sps:$4 sm:$0xff]  }
 0x111   :  { %3139 = vmatprep.subr.bf16.mxu0 %v9974_v30  ;;  %3467 = vmatprep.subr.bf16.mxu1 %v9977_v31  ;;  %v10064_v30 = vld [vmem:[#allocation5 + $0x684] ss:$16 sps:$4 sm:$0xff]   ;;  %v10067_v31 = vld [vmem:[#allocation5 + $0x68c] ss:$16 sps:$4 sm:$0xff]  }
 0x114   :  { %3140 = vmatpush1.bf16.msra.mxu0 %v9972_v32  ;;  %3468 = vmatpush1.bf16.msra.mxu1 %v9975_v33  ;;  %v10062_v32 = vld [vmem:[#allocation5 + $0x680] ss:$16 sps:$4 sm:$0xff]   ;;  %v10065_v33 = vld [vmem:[#allocation5 + $0x688] ss:$16 sps:$4 sm:$0xff]  }
 0x115   :  { %3141 = vmatprep.subr.bf16.mxu0 %v9980_v34  ;;  %3469 = vmatprep.subr.bf16.mxu1 %v9983_v35  ;;  %v10070_v34 = vld [vmem:[#allocation5 + $0x6a4] ss:$16 sps:$4 sm:$0xff]   ;;  %v10073_v35 = vld [vmem:[#allocation5 + $0x6ac] ss:$16 sps:$4 sm:$0xff]  }
 0x118   :  { %3142 = vmatpush1.bf16.msra.mxu0 %v9978_v36  ;;  %3470 = vmatpush1.bf16.msra.mxu1 %v9981_v37  ;;  %v10068_v36 = vld [vmem:[#allocation5 + $0x6a0] ss:$16 sps:$4 sm:$0xff]   ;;  %v10071_v37 = vld [vmem:[#allocation5 + $0x6a8] ss:$16 sps:$4 sm:$0xff]  }
 0x119   :  { %3143 = vmatprep.subr.bf16.mxu0 %v9986_v38  ;;  %3471 = vmatprep.subr.bf16.mxu1 %v9989_v39  ;;  %v10076_v38 = vld [vmem:[#allocation5 + $0x6c4] ss:$16 sps:$4 sm:$0xff]   ;;  %v10079_v39 = vld [vmem:[#allocation5 + $0x6cc] ss:$16 sps:$4 sm:$0xff]  }
 0x11c   :  { %3144 = vmatpush1.bf16.msra.mxu0 %v9984_v40  ;;  %3472 = vmatpush1.bf16.msra.mxu1 %v9987_v41  ;;  %v10074_v40 = vld [vmem:[#allocation5 + $0x6c0] ss:$16 sps:$4 sm:$0xff]   ;;  %v10077_v41 = vld [vmem:[#allocation5 + $0x6c8] ss:$16 sps:$4 sm:$0xff]  }
 0x11d   :  { %3145 = vmatprep.subr.bf16.mxu0 %v9992_v42  ;;  %3473 = vmatprep.subr.bf16.mxu1 %v9995_v43  ;;  %v10082_v42 = vld [vmem:[#allocation5 + $0x6e4] ss:$16 sps:$4 sm:$0xff]   ;;  %v10085_v43 = vld [vmem:[#allocation5 + $0x6ec] ss:$16 sps:$4 sm:$0xff]  }
 0x120   :  { %3146 = vmatpush1.bf16.msra.mxu0 %v9990_v44  ;;  %3474 = vmatpush1.bf16.msra.mxu1 %v9993_v45  ;;  %v10080_v44 = vld [vmem:[#allocation5 + $0x6e0] ss:$16 sps:$4 sm:$0xff]   ;;  %v10083_v45 = vld [vmem:[#allocation5 + $0x6e8] ss:$16 sps:$4 sm:$0xff]  }
 0x121   :  { %3147 = vmatprep.subr.bf16.mxu0 %v9998_v46  ;;  %3475 = vmatprep.subr.bf16.mxu1 %v10001_v47  ;;  %v10088_v46 = vld [vmem:[#allocation5 + $0x704] ss:$16 sps:$4 sm:$0xff]   ;;  %v10091_v47 = vld [vmem:[#allocation5 + $0x70c] ss:$16 sps:$4 sm:$0xff]  }
 0x124   :  { %3148 = vmatpush1.bf16.msra.mxu0 %v9996_v48  ;;  %3476 = vmatpush1.bf16.msra.mxu1 %v9999_v49  ;;  %v10086_v48 = vld [vmem:[#allocation5 + $0x700] ss:$16 sps:$4 sm:$0xff]   ;;  %v10089_v49 = vld [vmem:[#allocation5 + $0x708] ss:$16 sps:$4 sm:$0xff]  }
 0x125   :  { %3149 = vmatprep.subr.bf16.mxu0 %v10004_v50  ;;  %3477 = vmatprep.subr.bf16.mxu1 %v10007_v51  ;;  %v10094_v50 = vld [vmem:[#allocation5 + $0x724] ss:$16 sps:$4 sm:$0xff]   ;;  %v10097_v51 = vld [vmem:[#allocation5 + $0x72c] ss:$16 sps:$4 sm:$0xff]  }
 0x128   :  { %3150 = vmatpush1.bf16.msra.mxu0 %v10002_v52  ;;  %3478 = vmatpush1.bf16.msra.mxu1 %v10005_v53  ;;  %v10092_v52 = vld [vmem:[#allocation5 + $0x720] ss:$16 sps:$4 sm:$0xff]   ;;  %v10095_v53 = vld [vmem:[#allocation5 + $0x728] ss:$16 sps:$4 sm:$0xff]  }
 0x129   :  { %3151 = vmatprep.subr.bf16.mxu0 %v10010_v54  ;;  %3479 = vmatprep.subr.bf16.mxu1 %v10013_v55  ;;  %v10100_v54 = vld [vmem:[#allocation5 + $0x744] ss:$16 sps:$4 sm:$0xff]   ;;  %v10103_v55 = vld [vmem:[#allocation5 + $0x74c] ss:$16 sps:$4 sm:$0xff]  }
 0x12c   :  { %3152 = vmatpush1.bf16.msra.mxu0 %v10008_v56  ;;  %3480 = vmatpush1.bf16.msra.mxu1 %v10011_v57  ;;  %v10098_v56 = vld [vmem:[#allocation5 + $0x740] ss:$16 sps:$4 sm:$0xff]   ;;  %v10101_v57 = vld [vmem:[#allocation5 + $0x748] ss:$16 sps:$4 sm:$0xff]  }
 0x12d   :  { %3153 = vmatprep.subr.bf16.mxu0 %v10016_v58  ;;  %3481 = vmatprep.subr.bf16.mxu1 %v10019_v59  ;;  %v10106_v58 = vld [vmem:[#allocation5 + $0x764] ss:$16 sps:$4 sm:$0xff]   ;;  %v10109_v59 = vld [vmem:[#allocation5 + $0x76c] ss:$16 sps:$4 sm:$0xff]  }
 0x130   :  { %3154 = vmatpush1.bf16.msra.mxu0 %v10014_v60  ;;  %3482 = vmatpush1.bf16.msra.mxu1 %v10017_v61  ;;  %v10104_v60 = vld [vmem:[#allocation5 + $0x760] ss:$16 sps:$4 sm:$0xff]   ;;  %v10107_v61 = vld [vmem:[#allocation5 + $0x768] ss:$16 sps:$4 sm:$0xff]  }
 0x131   :  { %3155 = vmatprep.subr.bf16.mxu0 %v10022_v62  ;;  %3483 = vmatprep.subr.bf16.mxu1 %v10025_v63  ;;  %v10112_v62 = vld [vmem:[#allocation5 + $0x784] ss:$16 sps:$4 sm:$0xff]   ;;  %v10115_v63 = vld [vmem:[#allocation5 + $0x78c] ss:$16 sps:$4 sm:$0xff]  }
 0x134   :  { %3156 = vmatpush1.bf16.msra.mxu0 %v10020_v0  ;;  %3484 = vmatpush1.bf16.msra.mxu1 %v10023_v1  ;;  %v10110_v0 = vld [vmem:[#allocation5 + $0x780] ss:$16 sps:$4 sm:$0xff]   ;;  %v10113_v1 = vld [vmem:[#allocation5 + $0x788] ss:$16 sps:$4 sm:$0xff]  }
 0x135   :  { %3157 = vmatprep.subr.bf16.mxu0 %v10028_v2  ;;  %3485 = vmatprep.subr.bf16.mxu1 %v10031_v3  ;;  %v10118_v2 = vld [vmem:[#allocation5 + $0x7a4] ss:$16 sps:$4 sm:$0xff]   ;;  %v10121_v3 = vld [vmem:[#allocation5 + $0x7ac] ss:$16 sps:$4 sm:$0xff]  }
 0x138   :  { %3158 = vmatpush1.bf16.msra.mxu0 %v10026_v4  ;;  %3486 = vmatpush1.bf16.msra.mxu1 %v10029_v5  ;;  %v10116_v4 = vld [vmem:[#allocation5 + $0x7a0] ss:$16 sps:$4 sm:$0xff]   ;;  %v10119_v5 = vld [vmem:[#allocation5 + $0x7a8] ss:$16 sps:$4 sm:$0xff]  }
 0x139   :  { %3159 = vmatprep.subr.bf16.mxu0 %v10034_v6  ;;  %3487 = vmatprep.subr.bf16.mxu1 %v10037_v7  ;;  %v10124_v6 = vld [vmem:[#allocation5 + $0x7c4] ss:$16 sps:$4 sm:$0xff]   ;;  %v10127_v7 = vld [vmem:[#allocation5 + $0x7cc] ss:$16 sps:$4 sm:$0xff]  }
 0x13c   :  { %3160 = vmatpush1.bf16.msra.mxu0 %v10032_v8  ;;  %3488 = vmatpush1.bf16.msra.mxu1 %v10035_v9  ;;  %v10122_v8 = vld [vmem:[#allocation5 + $0x7c0] ss:$16 sps:$4 sm:$0xff]   ;;  %v10125_v9 = vld [vmem:[#allocation5 + $0x7c8] ss:$16 sps:$4 sm:$0xff]  }
 0x13d   :  { %3170 = vmatprep.subr.bf16.mxu0 %v10040_v10  ;;  %3498 = vmatprep.subr.bf16.mxu1 %v10043_v12  ;;  %v10130_v10 = vld [vmem:[#allocation5 + $0x7e4] ss:$16 sps:$4 sm:$0xff]   ;;  %v10128_v12 = vld [vmem:[#allocation5 + $0x7e0] ss:$16 sps:$4 sm:$0xff]  }
 0x13f   :  { %3162 = vmatmul.mubr.bf16.vlgmr.msra.gmra.mrb[0].mxu0 %v156_v15  ;;  %3490 = vmatmul.mubr.bf16.vlgmr.msra.gmra.mrb[0].mxu1 %v156_v15  ;;  %v10136_v15 = vld [vmem:[#allocation5 + $0x804] ss:$16 sps:$4 sm:$0xff]  }
 0x140   :  { %3171 = vmatpush1.bf16.msra.mxu0 %v10038_v13  ;;  %3499 = vmatpush1.bf16.msra.mxu1 %v10041_v14  ;;  %v10131_v13 = vld [vmem:[#allocation5 + $0x7e8] ss:$16 sps:$4 sm:$0xff]  }
 0x141   :  { %3172 = vmatprep.subr.bf16.mxu0 %v10046_v17  ;;  %3500 = vmatprep.subr.bf16.mxu1 %v10049_v18  ;;  %v143_v14 = vld [vmem:[%s11846_s0 + $0x30] sm:$0xff]  ;;  %v146_v18 = vld [vmem:[%s11846_s0 + $0x48] sm:$0xff] }
 0x142   :  { %3202 = vmatprep.mubr.bf16.mxu0 %v159_v19  ;;  %3530 = vmatprep.mubr.bf16.mxu1 %v159_v19  ;;  %v158_v17 = vpack.c.bf16 %v143_v14, %v143_v14  ;;  %v10134_v19 = vld [vmem:[#allocation5 + $0x800] ss:$16 sps:$4 sm:$0xff]   ;;  %v10226_v14 = vld [vmem:[#allocation5 + $0x9e4] ss:$16 sps:$4 sm:$0xff]  }
 0x144   :  { %3173 = vmatpush1.bf16.msra.mxu0 %v10044_v20  ;;  %3501 = vmatpush1.bf16.msra.mxu1 %v10047_v21  ;;  %v10137_v20 = vld [vmem:[#allocation5 + $0x808] ss:$16 sps:$4 sm:$0xff]   ;;  %v10142_v21 = vld [vmem:[#allocation5 + $0x824] ss:$16 sps:$4 sm:$0xff]  }
 0x145   :  { %3174 = vmatprep.subr.bf16.mxu0 %v10052_v22  ;;  %3502 = vmatprep.subr.bf16.mxu1 %v10055_v23  ;;  %v10145_v22 = vld [vmem:[#allocation5 + $0x82c] ss:$16 sps:$4 sm:$0xff]   ;;  %v161_v23 = vpack.c.bf16 %v146_v18, %v146_v18  ;;  %v145_v18 = vld [vmem:[%s11846_s0 + $0x40] sm:$0xff] }
 0x148   :  { %3175 = vmatpush1.bf16.msra.mxu0 %v10050_v24  ;;  %3503 = vmatpush1.bf16.msra.mxu1 %v10053_v25  ;;  %v10140_v24 = vld [vmem:[#allocation5 + $0x820] ss:$16 sps:$4 sm:$0xff]   ;;  %v10143_v25 = vld [vmem:[#allocation5 + $0x828] ss:$16 sps:$4 sm:$0xff]  }
 0x149   :  { %3176 = vmatprep.subr.bf16.mxu0 %v10058_v26  ;;  %3504 = vmatprep.subr.bf16.mxu1 %v10061_v27  ;;  %v10148_v26 = vld [vmem:[#allocation5 + $0x844] ss:$16 sps:$4 sm:$0xff]   ;;  %v10151_v27 = vld [vmem:[#allocation5 + $0x84c] ss:$16 sps:$4 sm:$0xff]  }
 0x14c   :  { %3177 = vmatpush1.bf16.msra.mxu0 %v10056_v28  ;;  %3505 = vmatpush1.bf16.msra.mxu1 %v10059_v29  ;;  %v10146_v28 = vld [vmem:[#allocation5 + $0x840] ss:$16 sps:$4 sm:$0xff]   ;;  %v10149_v29 = vld [vmem:[#allocation5 + $0x848] ss:$16 sps:$4 sm:$0xff]  }
 0x14d   :  { %3178 = vmatprep.subr.bf16.mxu0 %v10064_v30  ;;  %3506 = vmatprep.subr.bf16.mxu1 %v10067_v31  ;;  %v10154_v30 = vld [vmem:[#allocation5 + $0x864] ss:$16 sps:$4 sm:$0xff]   ;;  %v10157_v31 = vld [vmem:[#allocation5 + $0x86c] ss:$16 sps:$4 sm:$0xff]  }
 0x150   :  { %3179 = vmatpush1.bf16.msra.mxu0 %v10062_v32  ;;  %3507 = vmatpush1.bf16.msra.mxu1 %v10065_v33  ;;  %v10152_v32 = vld [vmem:[#allocation5 + $0x860] ss:$16 sps:$4 sm:$0xff]   ;;  %v10155_v33 = vld [vmem:[#allocation5 + $0x868] ss:$16 sps:$4 sm:$0xff]  }
 0x151   :  { %3180 = vmatprep.subr.bf16.mxu0 %v10070_v34  ;;  %3508 = vmatprep.subr.bf16.mxu1 %v10073_v35  ;;  %v10160_v34 = vld [vmem:[#allocation5 + $0x884] ss:$16 sps:$4 sm:$0xff]   ;;  %v10163_v35 = vld [vmem:[#allocation5 + $0x88c] ss:$16 sps:$4 sm:$0xff]  }
 0x154   :  { %3181 = vmatpush1.bf16.msra.mxu0 %v10068_v36  ;;  %3509 = vmatpush1.bf16.msra.mxu1 %v10071_v37  ;;  %v10158_v36 = vld [vmem:[#allocation5 + $0x880] ss:$16 sps:$4 sm:$0xff]   ;;  %v10161_v37 = vld [vmem:[#allocation5 + $0x888] ss:$16 sps:$4 sm:$0xff]  }
 0x155   :  { %3182 = vmatprep.subr.bf16.mxu0 %v10076_v38  ;;  %3510 = vmatprep.subr.bf16.mxu1 %v10079_v39  ;;  %v10166_v38 = vld [vmem:[#allocation5 + $0x8a4] ss:$16 sps:$4 sm:$0xff]   ;;  %v10169_v39 = vld [vmem:[#allocation5 + $0x8ac] ss:$16 sps:$4 sm:$0xff]  }
 0x158   :  { %3183 = vmatpush1.bf16.msra.mxu0 %v10074_v40  ;;  %3511 = vmatpush1.bf16.msra.mxu1 %v10077_v41  ;;  %v10164_v40 = vld [vmem:[#allocation5 + $0x8a0] ss:$16 sps:$4 sm:$0xff]   ;;  %v10167_v41 = vld [vmem:[#allocation5 + $0x8a8] ss:$16 sps:$4 sm:$0xff]  }
 0x159   :  { %3184 = vmatprep.subr.bf16.mxu0 %v10082_v42  ;;  %3512 = vmatprep.subr.bf16.mxu1 %v10085_v43  ;;  %v10172_v42 = vld [vmem:[#allocation5 + $0x8c4] ss:$16 sps:$4 sm:$0xff]   ;;  %v10175_v43 = vld [vmem:[#allocation5 + $0x8cc] ss:$16 sps:$4 sm:$0xff]  }
 0x15c   :  { %3185 = vmatpush1.bf16.msra.mxu0 %v10080_v44  ;;  %3513 = vmatpush1.bf16.msra.mxu1 %v10083_v45  ;;  %v10170_v44 = vld [vmem:[#allocation5 + $0x8c0] ss:$16 sps:$4 sm:$0xff]   ;;  %v10173_v45 = vld [vmem:[#allocation5 + $0x8c8] ss:$16 sps:$4 sm:$0xff]  }
 0x15d   :  { %3186 = vmatprep.subr.bf16.mxu0 %v10088_v46  ;;  %3514 = vmatprep.subr.bf16.mxu1 %v10091_v47  ;;  %v10178_v46 = vld [vmem:[#allocation5 + $0x8e4] ss:$16 sps:$4 sm:$0xff]   ;;  %v10181_v47 = vld [vmem:[#allocation5 + $0x8ec] ss:$16 sps:$4 sm:$0xff]  }
 0x160   :  { %3187 = vmatpush1.bf16.msra.mxu0 %v10086_v48  ;;  %3515 = vmatpush1.bf16.msra.mxu1 %v10089_v49  ;;  %v10176_v48 = vld [vmem:[#allocation5 + $0x8e0] ss:$16 sps:$4 sm:$0xff]   ;;  %v10179_v49 = vld [vmem:[#allocation5 + $0x8e8] ss:$16 sps:$4 sm:$0xff]  }
 0x161   :  { %3188 = vmatprep.subr.bf16.mxu0 %v10094_v50  ;;  %3516 = vmatprep.subr.bf16.mxu1 %v10097_v51  ;;  %v10184_v50 = vld [vmem:[#allocation5 + $0x904] ss:$16 sps:$4 sm:$0xff]   ;;  %v10187_v51 = vld [vmem:[#allocation5 + $0x90c] ss:$16 sps:$4 sm:$0xff]  }
 0x164   :  { %3189 = vmatpush1.bf16.msra.mxu0 %v10092_v52  ;;  %3517 = vmatpush1.bf16.msra.mxu1 %v10095_v53  ;;  %v10182_v52 = vld [vmem:[#allocation5 + $0x900] ss:$16 sps:$4 sm:$0xff]   ;;  %v10185_v53 = vld [vmem:[#allocation5 + $0x908] ss:$16 sps:$4 sm:$0xff]  }
 0x165   :  { %3190 = vmatprep.subr.bf16.mxu0 %v10100_v54  ;;  %3518 = vmatprep.subr.bf16.mxu1 %v10103_v55  ;;  %v10190_v54 = vld [vmem:[#allocation5 + $0x924] ss:$16 sps:$4 sm:$0xff]   ;;  %v10193_v55 = vld [vmem:[#allocation5 + $0x92c] ss:$16 sps:$4 sm:$0xff]  }
 0x168   :  { %3191 = vmatpush1.bf16.msra.mxu0 %v10098_v56  ;;  %3519 = vmatpush1.bf16.msra.mxu1 %v10101_v57  ;;  %v10188_v56 = vld [vmem:[#allocation5 + $0x920] ss:$16 sps:$4 sm:$0xff]   ;;  %v10191_v57 = vld [vmem:[#allocation5 + $0x928] ss:$16 sps:$4 sm:$0xff]  }
 0x169   :  { %3192 = vmatprep.subr.bf16.mxu0 %v10106_v58  ;;  %3520 = vmatprep.subr.bf16.mxu1 %v10109_v59  ;;  %v10196_v58 = vld [vmem:[#allocation5 + $0x944] ss:$16 sps:$4 sm:$0xff]   ;;  %v10199_v59 = vld [vmem:[#allocation5 + $0x94c] ss:$16 sps:$4 sm:$0xff]  }
 0x16c   :  { %3193 = vmatpush1.bf16.msra.mxu0 %v10104_v60  ;;  %3521 = vmatpush1.bf16.msra.mxu1 %v10107_v61  ;;  %v10194_v60 = vld [vmem:[#allocation5 + $0x940] ss:$16 sps:$4 sm:$0xff]   ;;  %v10197_v61 = vld [vmem:[#allocation5 + $0x948] ss:$16 sps:$4 sm:$0xff]  }
 0x16d   :  { %3194 = vmatprep.subr.bf16.mxu0 %v10112_v62  ;;  %3522 = vmatprep.subr.bf16.mxu1 %v10115_v63  ;;  %v10202_v62 = vld [vmem:[#allocation5 + $0x964] ss:$16 sps:$4 sm:$0xff]   ;;  %v10205_v63 = vld [vmem:[#allocation5 + $0x96c] ss:$16 sps:$4 sm:$0xff]  }
 0x170   :  { %3195 = vmatpush1.bf16.msra.mxu0 %v10110_v0  ;;  %3523 = vmatpush1.bf16.msra.mxu1 %v10113_v1  ;;  %v10200_v0 = vld [vmem:[#allocation5 + $0x960] ss:$16 sps:$4 sm:$0xff]   ;;  %v10203_v1 = vld [vmem:[#allocation5 + $0x968] ss:$16 sps:$4 sm:$0xff]  }
 0x171   :  { %3196 = vmatprep.subr.bf16.mxu0 %v10118_v2  ;;  %3524 = vmatprep.subr.bf16.mxu1 %v10121_v3  ;;  %v10208_v2 = vld [vmem:[#allocation5 + $0x984] ss:$16 sps:$4 sm:$0xff]   ;;  %v10211_v3 = vld [vmem:[#allocation5 + $0x98c] ss:$16 sps:$4 sm:$0xff]  }
 0x174   :  { %3197 = vmatpush1.bf16.msra.mxu0 %v10116_v4  ;;  %3525 = vmatpush1.bf16.msra.mxu1 %v10119_v5  ;;  %v10206_v4 = vld [vmem:[#allocation5 + $0x980] ss:$16 sps:$4 sm:$0xff]   ;;  %v10209_v5 = vld [vmem:[#allocation5 + $0x988] ss:$16 sps:$4 sm:$0xff]  }
 0x175   :  { %3198 = vmatprep.subr.bf16.mxu0 %v10124_v6  ;;  %3526 = vmatprep.subr.bf16.mxu1 %v10127_v7  ;;  %v10214_v6 = vld [vmem:[#allocation5 + $0x9a4] ss:$16 sps:$4 sm:$0xff]   ;;  %v10217_v7 = vld [vmem:[#allocation5 + $0x9ac] ss:$16 sps:$4 sm:$0xff]  }
 0x178   :  { %3199 = vmatpush1.bf16.msra.mxu0 %v10122_v8  ;;  %3527 = vmatpush1.bf16.msra.mxu1 %v10125_v9  ;;  %v10212_v8 = vld [vmem:[#allocation5 + $0x9a0] ss:$16 sps:$4 sm:$0xff]   ;;  %v10215_v9 = vld [vmem:[#allocation5 + $0x9a8] ss:$16 sps:$4 sm:$0xff]  }
 0x179   :  { %3200 = vmatprep.subr.bf16.mxu0 %v10130_v10  ;;  %3528 = vmatprep.subr.bf16.mxu1 %v10133_v11  ;;  %v10220_v10 = vld [vmem:[#allocation5 + $0x9c4] ss:$16 sps:$4 sm:$0xff]   ;;  %v10223_v11 = vld [vmem:[#allocation5 + $0x9cc] ss:$16 sps:$4 sm:$0xff]  }
 0x17c   :  { %3201 = vmatpush1.bf16.msra.mxu0 %v10128_v12  ;;  %3529 = vmatpush1.bf16.msra.mxu1 %v10131_v13  ;;  %v10218_v12 = vld [vmem:[#allocation5 + $0x9c0] ss:$16 sps:$4 sm:$0xff]   ;;  %v10221_v13 = vld [vmem:[#allocation5 + $0x9c8] ss:$16 sps:$4 sm:$0xff]  }
 0x17d   :  { %3211 = vmatprep.subr.bf16.mxu0 %v10136_v15  ;;  %3539 = vmatprep.subr.bf16.mxu1 %v10139_v16  ;;  %v10229_v15 = vld [vmem:[#allocation5 + $0x9ec] ss:$16 sps:$4 sm:$0xff]   ;;  %v10224_v16 = vld [vmem:[#allocation5 + $0x9e0] ss:$16 sps:$4 sm:$0xff]  }
 0x17f   :  { %3203 = vmatmul.mubr.bf16.vlgmr.msra.gmra.mrb[0].mxu0 %v158_v17  ;;  %3531 = vmatmul.mubr.bf16.vlgmr.msra.gmra.mrb[0].mxu1 %v158_v17  ;;  %v10227_v17 = vld [vmem:[#allocation5 + $0x9e8] ss:$16 sps:$4 sm:$0xff]  }
 0x180   :  { %3212 = vmatpush1.bf16.msra.mxu0 %v10134_v19  ;;  %3540 = vmatpush1.bf16.msra.mxu1 %v10137_v20  ;;  %v10232_v19 = vld [vmem:[#allocation5 + $0xa04] ss:$16 sps:$4 sm:$0xff]   ;;  %v10235_v20 = vld [vmem:[#allocation5 + $0xa0c] ss:$16 sps:$4 sm:$0xff]  }
 0x181   :  { %3213 = vmatprep.subr.bf16.mxu0 %v10142_v21  ;;  %3541 = vmatprep.subr.bf16.mxu1 %v10145_v22  ;;  %v10230_v21 = vld [vmem:[#allocation5 + $0xa00] ss:$16 sps:$4 sm:$0xff]   ;;  %v160_v22 = vpack.c.bf16 %v145_v18, %v145_v18  ;;  %v10322_v18 = vld [vmem:[#allocation5 + $0xbe4] ss:$16 sps:$4 sm:$0xff]  }
 0x182   :  { %3243 = vmatprep.mubr.bf16.mxu0 %v161_v23  ;;  %3571 = vmatprep.mubr.bf16.mxu1 %v161_v23  ;;  %v148_v23 = vld [vmem:[%s11846_s0 + $0x58] sm:$0xff] }
 0x184   :  { %3214 = vmatpush1.bf16.msra.mxu0 %v10140_v24  ;;  %3542 = vmatpush1.bf16.msra.mxu1 %v10143_v25  ;;  %v10233_v24 = vld [vmem:[#allocation5 + $0xa08] ss:$16 sps:$4 sm:$0xff]   ;;  %v10238_v25 = vld [vmem:[#allocation5 + $0xa24] ss:$16 sps:$4 sm:$0xff]  }
 0x185   :  { %3215 = vmatprep.subr.bf16.mxu0 %v10148_v26  ;;  %3543 = vmatprep.subr.bf16.mxu1 %v10151_v27  ;;  %v10241_v26 = vld [vmem:[#allocation5 + $0xa2c] ss:$16 sps:$4 sm:$0xff]   ;;  %v10236_v27 = vld [vmem:[#allocation5 + $0xa20] ss:$16 sps:$4 sm:$0xff]  }
 0x188   :  { %3216 = vmatpush1.bf16.msra.mxu0 %v10146_v28  ;;  %3544 = vmatpush1.bf16.msra.mxu1 %v10149_v29  ;;  %v10239_v28 = vld [vmem:[#allocation5 + $0xa28] ss:$16 sps:$4 sm:$0xff]   ;;  %v163_v29 = vpack.c.bf16 %v148_v23, %v148_v23  ;;  %v10331_v23 = vld [vmem:[#allocation5 + $0xc0c] ss:$16 sps:$4 sm:$0xff]  }
 0x189   :  { %3217 = vmatprep.subr.bf16.mxu0 %v10154_v30  ;;  %3545 = vmatprep.subr.bf16.mxu1 %v10157_v31  ;;  %v10244_v30 = vld [vmem:[#allocation5 + $0xa44] ss:$16 sps:$4 sm:$0xff]   ;;  %v10247_v31 = vld [vmem:[#allocation5 + $0xa4c] ss:$16 sps:$4 sm:$0xff]  }
 0x18c   :  { %3218 = vmatpush1.bf16.msra.mxu0 %v10152_v32  ;;  %3546 = vmatpush1.bf16.msra.mxu1 %v10155_v33  ;;  %v10242_v32 = vld [vmem:[#allocation5 + $0xa40] ss:$16 sps:$4 sm:$0xff]   ;;  %v10245_v33 = vld [vmem:[#allocation5 + $0xa48] ss:$16 sps:$4 sm:$0xff]  }
 0x18d   :  { %3219 = vmatprep.subr.bf16.mxu0 %v10160_v34  ;;  %3547 = vmatprep.subr.bf16.mxu1 %v10163_v35  ;;  %v10250_v34 = vld [vmem:[#allocation5 + $0xa64] ss:$16 sps:$4 sm:$0xff]   ;;  %v10253_v35 = vld [vmem:[#allocation5 + $0xa6c] ss:$16 sps:$4 sm:$0xff]  }
 0x190   :  { %3220 = vmatpush1.bf16.msra.mxu0 %v10158_v36  ;;  %3548 = vmatpush1.bf16.msra.mxu1 %v10161_v37  ;;  %v10248_v36 = vld [vmem:[#allocation5 + $0xa60] ss:$16 sps:$4 sm:$0xff]   ;;  %v10251_v37 = vld [vmem:[#allocation5 + $0xa68] ss:$16 sps:$4 sm:$0xff]  }
 0x191   :  { %3221 = vmatprep.subr.bf16.mxu0 %v10166_v38  ;;  %3549 = vmatprep.subr.bf16.mxu1 %v10169_v39  ;;  %v10256_v38 = vld [vmem:[#allocation5 + $0xa84] ss:$16 sps:$4 sm:$0xff]   ;;  %v10259_v39 = vld [vmem:[#allocation5 + $0xa8c] ss:$16 sps:$4 sm:$0xff]  }
 0x194   :  { %3222 = vmatpush1.bf16.msra.mxu0 %v10164_v40  ;;  %3550 = vmatpush1.bf16.msra.mxu1 %v10167_v41  ;;  %v10254_v40 = vld [vmem:[#allocation5 + $0xa80] ss:$16 sps:$4 sm:$0xff]   ;;  %v10257_v41 = vld [vmem:[#allocation5 + $0xa88] ss:$16 sps:$4 sm:$0xff]  }
 0x195   :  { %3223 = vmatprep.subr.bf16.mxu0 %v10172_v42  ;;  %3551 = vmatprep.subr.bf16.mxu1 %v10175_v43  ;;  %v10262_v42 = vld [vmem:[#allocation5 + $0xaa4] ss:$16 sps:$4 sm:$0xff]   ;;  %v10265_v43 = vld [vmem:[#allocation5 + $0xaac] ss:$16 sps:$4 sm:$0xff]  }
 0x198   :  { %3224 = vmatpush1.bf16.msra.mxu0 %v10170_v44  ;;  %3552 = vmatpush1.bf16.msra.mxu1 %v10173_v45  ;;  %v10260_v44 = vld [vmem:[#allocation5 + $0xaa0] ss:$16 sps:$4 sm:$0xff]   ;;  %v10263_v45 = vld [vmem:[#allocation5 + $0xaa8] ss:$16 sps:$4 sm:$0xff]  }
 0x199   :  { %3225 = vmatprep.subr.bf16.mxu0 %v10178_v46  ;;  %3553 = vmatprep.subr.bf16.mxu1 %v10181_v47  ;;  %v10268_v46 = vld [vmem:[#allocation5 + $0xac4] ss:$16 sps:$4 sm:$0xff]   ;;  %v10271_v47 = vld [vmem:[#allocation5 + $0xacc] ss:$16 sps:$4 sm:$0xff]  }
 0x19c   :  { %3226 = vmatpush1.bf16.msra.mxu0 %v10176_v48  ;;  %3554 = vmatpush1.bf16.msra.mxu1 %v10179_v49  ;;  %v10266_v48 = vld [vmem:[#allocation5 + $0xac0] ss:$16 sps:$4 sm:$0xff]   ;;  %v10269_v49 = vld [vmem:[#allocation5 + $0xac8] ss:$16 sps:$4 sm:$0xff]  }
 0x19d   :  { %3227 = vmatprep.subr.bf16.mxu0 %v10184_v50  ;;  %3555 = vmatprep.subr.bf16.mxu1 %v10187_v51  ;;  %v10274_v50 = vld [vmem:[#allocation5 + $0xae4] ss:$16 sps:$4 sm:$0xff]   ;;  %v10277_v51 = vld [vmem:[#allocation5 + $0xaec] ss:$16 sps:$4 sm:$0xff]  }
 0x1a0   :  { %3228 = vmatpush1.bf16.msra.mxu0 %v10182_v52  ;;  %3556 = vmatpush1.bf16.msra.mxu1 %v10185_v53  ;;  %v10272_v52 = vld [vmem:[#allocation5 + $0xae0] ss:$16 sps:$4 sm:$0xff]   ;;  %v10275_v53 = vld [vmem:[#allocation5 + $0xae8] ss:$16 sps:$4 sm:$0xff]  }
 0x1a1   :  { %3229 = vmatprep.subr.bf16.mxu0 %v10190_v54  ;;  %3557 = vmatprep.subr.bf16.mxu1 %v10193_v55  ;;  %v10280_v54 = vld [vmem:[#allocation5 + $0xb04] ss:$16 sps:$4 sm:$0xff]   ;;  %v10283_v55 = vld [vmem:[#allocation5 + $0xb0c] ss:$16 sps:$4 sm:$0xff]  }
 0x1a4   :  { %3230 = vmatpush1.bf16.msra.mxu0 %v10188_v56  ;;  %3558 = vmatpush1.bf16.msra.mxu1 %v10191_v57  ;;  %v10278_v56 = vld [vmem:[#allocation5 + $0xb00] ss:$16 sps:$4 sm:$0xff]   ;;  %v10281_v57 = vld [vmem:[#allocation5 + $0xb08] ss:$16 sps:$4 sm:$0xff]  }
 0x1a5   :  { %3231 = vmatprep.subr.bf16.mxu0 %v10196_v58  ;;  %3559 = vmatprep.subr.bf16.mxu1 %v10199_v59  ;;  %v10286_v58 = vld [vmem:[#allocation5 + $0xb24] ss:$16 sps:$4 sm:$0xff]   ;;  %v10289_v59 = vld [vmem:[#allocation5 + $0xb2c] ss:$16 sps:$4 sm:$0xff]  }
 0x1a8   :  { %3232 = vmatpush1.bf16.msra.mxu0 %v10194_v60  ;;  %3560 = vmatpush1.bf16.msra.mxu1 %v10197_v61  ;;  %v10284_v60 = vld [vmem:[#allocation5 + $0xb20] ss:$16 sps:$4 sm:$0xff]   ;;  %v10287_v61 = vld [vmem:[#allocation5 + $0xb28] ss:$16 sps:$4 sm:$0xff]  }
 0x1a9   :  { %3233 = vmatprep.subr.bf16.mxu0 %v10202_v62  ;;  %3561 = vmatprep.subr.bf16.mxu1 %v10205_v63  ;;  %v10292_v62 = vld [vmem:[#allocation5 + $0xb44] ss:$16 sps:$4 sm:$0xff]   ;;  %v10295_v63 = vld [vmem:[#allocation5 + $0xb4c] ss:$16 sps:$4 sm:$0xff]  }
 0x1ac   :  { %3234 = vmatpush1.bf16.msra.mxu0 %v10200_v0  ;;  %3562 = vmatpush1.bf16.msra.mxu1 %v10203_v1  ;;  %v10290_v0 = vld [vmem:[#allocation5 + $0xb40] ss:$16 sps:$4 sm:$0xff]   ;;  %v10293_v1 = vld [vmem:[#allocation5 + $0xb48] ss:$16 sps:$4 sm:$0xff]  }
 0x1ad   :  { %3235 = vmatprep.subr.bf16.mxu0 %v10208_v2  ;;  %3563 = vmatprep.subr.bf16.mxu1 %v10211_v3  ;;  %v10298_v2 = vld [vmem:[#allocation5 + $0xb64] ss:$16 sps:$4 sm:$0xff]   ;;  %v10301_v3 = vld [vmem:[#allocation5 + $0xb6c] ss:$16 sps:$4 sm:$0xff]  }
 0x1b0   :  { %3236 = vmatpush1.bf16.msra.mxu0 %v10206_v4  ;;  %3564 = vmatpush1.bf16.msra.mxu1 %v10209_v5  ;;  %v10296_v4 = vld [vmem:[#allocation5 + $0xb60] ss:$16 sps:$4 sm:$0xff]   ;;  %v10299_v5 = vld [vmem:[#allocation5 + $0xb68] ss:$16 sps:$4 sm:$0xff]  }
 0x1b1   :  { %3237 = vmatprep.subr.bf16.mxu0 %v10214_v6  ;;  %3565 = vmatprep.subr.bf16.mxu1 %v10217_v7  ;;  %v10304_v6 = vld [vmem:[#allocation5 + $0xb84] ss:$16 sps:$4 sm:$0xff]   ;;  %v10307_v7 = vld [vmem:[#allocation5 + $0xb8c] ss:$16 sps:$4 sm:$0xff]  }
 0x1b4   :  { %3238 = vmatpush1.bf16.msra.mxu0 %v10212_v8  ;;  %3566 = vmatpush1.bf16.msra.mxu1 %v10215_v9  ;;  %v10302_v8 = vld [vmem:[#allocation5 + $0xb80] ss:$16 sps:$4 sm:$0xff]   ;;  %v10305_v9 = vld [vmem:[#allocation5 + $0xb88] ss:$16 sps:$4 sm:$0xff]  }
 0x1b5   :  { %3239 = vmatprep.subr.bf16.mxu0 %v10220_v10  ;;  %3567 = vmatprep.subr.bf16.mxu1 %v10223_v11  ;;  %v10310_v10 = vld [vmem:[#allocation5 + $0xba4] ss:$16 sps:$4 sm:$0xff]   ;;  %v10313_v11 = vld [vmem:[#allocation5 + $0xbac] ss:$16 sps:$4 sm:$0xff]  }
 0x1b8   :  { %3240 = vmatpush1.bf16.msra.mxu0 %v10218_v12  ;;  %3568 = vmatpush1.bf16.msra.mxu1 %v10221_v13  ;;  %v10308_v12 = vld [vmem:[#allocation5 + $0xba0] ss:$16 sps:$4 sm:$0xff]   ;;  %v10311_v13 = vld [vmem:[#allocation5 + $0xba8] ss:$16 sps:$4 sm:$0xff]  }
 0x1b9   :  { %3241 = vmatprep.subr.bf16.mxu0 %v10226_v14  ;;  %3569 = vmatprep.subr.bf16.mxu1 %v10229_v15  ;;  %v10316_v14 = vld [vmem:[#allocation5 + $0xbc4] ss:$16 sps:$4 sm:$0xff]   ;;  %v10319_v15 = vld [vmem:[#allocation5 + $0xbcc] ss:$16 sps:$4 sm:$0xff]  }
 0x1bc   :  { %3242 = vmatpush1.bf16.msra.mxu0 %v10224_v16  ;;  %3570 = vmatpush1.bf16.msra.mxu1 %v10227_v17  ;;  %v10314_v16 = vld [vmem:[#allocation5 + $0xbc0] ss:$16 sps:$4 sm:$0xff]   ;;  %v10317_v17 = vld [vmem:[#allocation5 + $0xbc8] ss:$16 sps:$4 sm:$0xff]  }
 0x1bd   :  { %3252 = vmatprep.subr.bf16.mxu0 %v10232_v19  ;;  %3580 = vmatprep.subr.bf16.mxu1 %v10235_v20  ;;  %v10325_v19 = vld [vmem:[#allocation5 + $0xbec] ss:$16 sps:$4 sm:$0xff]   ;;  %v10320_v20 = vld [vmem:[#allocation5 + $0xbe0] ss:$16 sps:$4 sm:$0xff]  }
 0x1bf   :  { %3244 = vmatmul.mubr.bf16.vlgmr.msra.gmra.mrb[0].mxu0 %v160_v22  ;;  %3572 = vmatmul.mubr.bf16.vlgmr.msra.gmra.mrb[0].mxu1 %v160_v22  ;;  %v10328_v22 = vld [vmem:[#allocation5 + $0xc04] ss:$16 sps:$4 sm:$0xff]  }
 0x1c0   :  { %3253 = vmatpush1.bf16.msra.mxu0 %v10230_v21  ;;  %3581 = vmatpush1.bf16.msra.mxu1 %v10233_v24  ;;  %v10323_v21 = vld [vmem:[#allocation5 + $0xbe8] ss:$16 sps:$4 sm:$0xff]  }
 0x1c1   :  { %3254 = vmatprep.subr.bf16.mxu0 %v10238_v25  ;;  %3582 = vmatprep.subr.bf16.mxu1 %v10241_v26  ;;  %v147_v24 = vld [vmem:[%s11846_s0 + $0x50] sm:$0xff]  ;;  %v150_v25 = vld [vmem:[%s11846_s0 + $0x68] sm:$0xff] }
 0x1c2   :  { %3284 = vmatprep.mubr.bf16.mxu0 %v163_v29  ;;  %3612 = vmatprep.mubr.bf16.mxu1 %v163_v29  ;;  %v10326_v26 = vld [vmem:[#allocation5 + $0xc00] ss:$16 sps:$4 sm:$0xff]   ;;  %v10334_v29 = vld [vmem:[#allocation5 + $0xc24] ss:$16 sps:$4 sm:$0xff]  }
 0x1c4   :  { %3255 = vmatpush1.bf16.msra.mxu0 %v10236_v27  ;;  %3583 = vmatpush1.bf16.msra.mxu1 %v10239_v28  ;;  %v10329_v27 = vld [vmem:[#allocation5 + $0xc08] ss:$16 sps:$4 sm:$0xff]   ;;  %v162_v28 = vpack.c.bf16 %v147_v24, %v147_v24  ;;  %v10416_v24 = vld [vmem:[#allocation5 + $0xde0] ss:$16 sps:$4 sm:$0xff]  }
 0x1c5   :  { %3256 = vmatprep.subr.bf16.mxu0 %v10244_v30  ;;  %3584 = vmatprep.subr.bf16.mxu1 %v10247_v31  ;;  %v10337_v30 = vld [vmem:[#allocation5 + $0xc2c] ss:$16 sps:$4 sm:$0xff]   ;;  %v10332_v31 = vld [vmem:[#allocation5 + $0xc20] ss:$16 sps:$4 sm:$0xff]  }
 0x1c8   :  { %3257 = vmatpush1.bf16.msra.mxu0 %v10242_v32  ;;  %3585 = vmatpush1.bf16.msra.mxu1 %v10245_v33  ;;  %v10335_v32 = vld [vmem:[#allocation5 + $0xc28] ss:$16 sps:$4 sm:$0xff]   ;;  %v165_v33 = vpack.c.bf16 %v150_v25, %v150_v25 }
 0x1c9   :  { %3258 = vmatprep.subr.bf16.mxu0 %v10250_v34  ;;  %3586 = vmatprep.subr.bf16.mxu1 %v10253_v35  ;;  %v10340_v34 = vld [vmem:[#allocation5 + $0xc44] ss:$16 sps:$4 sm:$0xff]   ;;  %v10343_v35 = vld [vmem:[#allocation5 + $0xc4c] ss:$16 sps:$4 sm:$0xff]   ;;  %v10419_v25 = vld [vmem:[#allocation5 + $0xde8] ss:$16 sps:$4 sm:$0xff]  }
 0x1cc   :  { %3259 = vmatpush1.bf16.msra.mxu0 %v10248_v36  ;;  %3587 = vmatpush1.bf16.msra.mxu1 %v10251_v37  ;;  %v10338_v36 = vld [vmem:[#allocation5 + $0xc40] ss:$16 sps:$4 sm:$0xff]   ;;  %v10341_v37 = vld [vmem:[#allocation5 + $0xc48] ss:$16 sps:$4 sm:$0xff]  }
 0x1cd   :  { %3260 = vmatprep.subr.bf16.mxu0 %v10256_v38  ;;  %3588 = vmatprep.subr.bf16.mxu1 %v10259_v39  ;;  %v10346_v38 = vld [vmem:[#allocation5 + $0xc64] ss:$16 sps:$4 sm:$0xff]   ;;  %v10349_v39 = vld [vmem:[#allocation5 + $0xc6c] ss:$16 sps:$4 sm:$0xff]  }
 0x1d0   :  { %3261 = vmatpush1.bf16.msra.mxu0 %v10254_v40  ;;  %3589 = vmatpush1.bf16.msra.mxu1 %v10257_v41  ;;  %v10344_v40 = vld [vmem:[#allocation5 + $0xc60] ss:$16 sps:$4 sm:$0xff]   ;;  %v10347_v41 = vld [vmem:[#allocation5 + $0xc68] ss:$16 sps:$4 sm:$0xff]  }
 0x1d1   :  { %3262 = vmatprep.subr.bf16.mxu0 %v10262_v42  ;;  %3590 = vmatprep.subr.bf16.mxu1 %v10265_v43  ;;  %v10352_v42 = vld [vmem:[#allocation5 + $0xc84] ss:$16 sps:$4 sm:$0xff]   ;;  %v10355_v43 = vld [vmem:[#allocation5 + $0xc8c] ss:$16 sps:$4 sm:$0xff]  }
 0x1d4   :  { %3263 = vmatpush1.bf16.msra.mxu0 %v10260_v44  ;;  %3591 = vmatpush1.bf16.msra.mxu1 %v10263_v45  ;;  %v10350_v44 = vld [vmem:[#allocation5 + $0xc80] ss:$16 sps:$4 sm:$0xff]   ;;  %v10353_v45 = vld [vmem:[#allocation5 + $0xc88] ss:$16 sps:$4 sm:$0xff]  }
 0x1d5   :  { %3264 = vmatprep.subr.bf16.mxu0 %v10268_v46  ;;  %3592 = vmatprep.subr.bf16.mxu1 %v10271_v47  ;;  %v10358_v46 = vld [vmem:[#allocation5 + $0xca4] ss:$16 sps:$4 sm:$0xff]   ;;  %v10361_v47 = vld [vmem:[#allocation5 + $0xcac] ss:$16 sps:$4 sm:$0xff]  }
 0x1d8   :  { %3265 = vmatpush1.bf16.msra.mxu0 %v10266_v48  ;;  %3593 = vmatpush1.bf16.msra.mxu1 %v10269_v49  ;;  %v10356_v48 = vld [vmem:[#allocation5 + $0xca0] ss:$16 sps:$4 sm:$0xff]   ;;  %v10359_v49 = vld [vmem:[#allocation5 + $0xca8] ss:$16 sps:$4 sm:$0xff]  }
 0x1d9   :  { %3266 = vmatprep.subr.bf16.mxu0 %v10274_v50  ;;  %3594 = vmatprep.subr.bf16.mxu1 %v10277_v51  ;;  %v10364_v50 = vld [vmem:[#allocation5 + $0xcc4] ss:$16 sps:$4 sm:$0xff]   ;;  %v10367_v51 = vld [vmem:[#allocation5 + $0xccc] ss:$16 sps:$4 sm:$0xff]  }
 0x1dc   :  { %3267 = vmatpush1.bf16.msra.mxu0 %v10272_v52  ;;  %3595 = vmatpush1.bf16.msra.mxu1 %v10275_v53  ;;  %v10362_v52 = vld [vmem:[#allocation5 + $0xcc0] ss:$16 sps:$4 sm:$0xff]   ;;  %v10365_v53 = vld [vmem:[#allocation5 + $0xcc8] ss:$16 sps:$4 sm:$0xff]  }
 0x1dd   :  { %3268 = vmatprep.subr.bf16.mxu0 %v10280_v54  ;;  %3596 = vmatprep.subr.bf16.mxu1 %v10283_v55  ;;  %v10370_v54 = vld [vmem:[#allocation5 + $0xce4] ss:$16 sps:$4 sm:$0xff]   ;;  %v10373_v55 = vld [vmem:[#allocation5 + $0xcec] ss:$16 sps:$4 sm:$0xff]  }
 0x1e0   :  { %3269 = vmatpush1.bf16.msra.mxu0 %v10278_v56  ;;  %3597 = vmatpush1.bf16.msra.mxu1 %v10281_v57  ;;  %v10368_v56 = vld [vmem:[#allocation5 + $0xce0] ss:$16 sps:$4 sm:$0xff]   ;;  %v10371_v57 = vld [vmem:[#allocation5 + $0xce8] ss:$16 sps:$4 sm:$0xff]  }
 0x1e1   :  { %3270 = vmatprep.subr.bf16.mxu0 %v10286_v58  ;;  %3598 = vmatprep.subr.bf16.mxu1 %v10289_v59  ;;  %v10376_v58 = vld [vmem:[#allocation5 + $0xd04] ss:$16 sps:$4 sm:$0xff]   ;;  %v10379_v59 = vld [vmem:[#allocation5 + $0xd0c] ss:$16 sps:$4 sm:$0xff]  }
 0x1e4   :  { %3271 = vmatpush1.bf16.msra.mxu0 %v10284_v60  ;;  %3599 = vmatpush1.bf16.msra.mxu1 %v10287_v61  ;;  %v10374_v60 = vld [vmem:[#allocation5 + $0xd00] ss:$16 sps:$4 sm:$0xff]   ;;  %v10377_v61 = vld [vmem:[#allocation5 + $0xd08] ss:$16 sps:$4 sm:$0xff]  }
 0x1e5   :  { %3272 = vmatprep.subr.bf16.mxu0 %v10292_v62  ;;  %3600 = vmatprep.subr.bf16.mxu1 %v10295_v63  ;;  %v10382_v62 = vld [vmem:[#allocation5 + $0xd24] ss:$16 sps:$4 sm:$0xff]   ;;  %v10385_v63 = vld [vmem:[#allocation5 + $0xd2c] ss:$16 sps:$4 sm:$0xff]  }
 0x1e8   :  { %3273 = vmatpush1.bf16.msra.mxu0 %v10290_v0  ;;  %3601 = vmatpush1.bf16.msra.mxu1 %v10293_v1  ;;  %v10380_v0 = vld [vmem:[#allocation5 + $0xd20] ss:$16 sps:$4 sm:$0xff]   ;;  %v10383_v1 = vld [vmem:[#allocation5 + $0xd28] ss:$16 sps:$4 sm:$0xff]  }
 0x1e9   :  { %3274 = vmatprep.subr.bf16.mxu0 %v10298_v2  ;;  %3602 = vmatprep.subr.bf16.mxu1 %v10301_v3  ;;  %v10388_v2 = vld [vmem:[#allocation5 + $0xd44] ss:$16 sps:$4 sm:$0xff]   ;;  %v10391_v3 = vld [vmem:[#allocation5 + $0xd4c] ss:$16 sps:$4 sm:$0xff]  }
 0x1ec   :  { %3275 = vmatpush1.bf16.msra.mxu0 %v10296_v4  ;;  %3603 = vmatpush1.bf16.msra.mxu1 %v10299_v5  ;;  %v10386_v4 = vld [vmem:[#allocation5 + $0xd40] ss:$16 sps:$4 sm:$0xff]   ;;  %v10389_v5 = vld [vmem:[#allocation5 + $0xd48] ss:$16 sps:$4 sm:$0xff]  }
 0x1ed   :  { %3276 = vmatprep.subr.bf16.mxu0 %v10304_v6  ;;  %3604 = vmatprep.subr.bf16.mxu1 %v10307_v7  ;;  %v10394_v6 = vld [vmem:[#allocation5 + $0xd64] ss:$16 sps:$4 sm:$0xff]   ;;  %v10397_v7 = vld [vmem:[#allocation5 + $0xd6c] ss:$16 sps:$4 sm:$0xff]  }
 0x1f0   :  { %3277 = vmatpush1.bf16.msra.mxu0 %v10302_v8  ;;  %3605 = vmatpush1.bf16.msra.mxu1 %v10305_v9  ;;  %v10392_v8 = vld [vmem:[#allocation5 + $0xd60] ss:$16 sps:$4 sm:$0xff]   ;;  %v10395_v9 = vld [vmem:[#allocation5 + $0xd68] ss:$16 sps:$4 sm:$0xff]  }
 0x1f1   :  { %3278 = vmatprep.subr.bf16.mxu0 %v10310_v10  ;;  %3606 = vmatprep.subr.bf16.mxu1 %v10313_v11  ;;  %v10400_v10 = vld [vmem:[#allocation5 + $0xd84] ss:$16 sps:$4 sm:$0xff]   ;;  %v10403_v11 = vld [vmem:[#allocation5 + $0xd8c] ss:$16 sps:$4 sm:$0xff]  }
 0x1f4   :  { %3279 = vmatpush1.bf16.msra.mxu0 %v10308_v12  ;;  %3607 = vmatpush1.bf16.msra.mxu1 %v10311_v13  ;;  %v10398_v12 = vld [vmem:[#allocation5 + $0xd80] ss:$16 sps:$4 sm:$0xff]   ;;  %v10401_v13 = vld [vmem:[#allocation5 + $0xd88] ss:$16 sps:$4 sm:$0xff]  }
 0x1f5   :  { %3280 = vmatprep.subr.bf16.mxu0 %v10316_v14  ;;  %3608 = vmatprep.subr.bf16.mxu1 %v10319_v15  ;;  %v10406_v14 = vld [vmem:[#allocation5 + $0xda4] ss:$16 sps:$4 sm:$0xff]   ;;  %v10409_v15 = vld [vmem:[#allocation5 + $0xdac] ss:$16 sps:$4 sm:$0xff]  }
 0x1f8   :  { %3281 = vmatpush1.bf16.msra.mxu0 %v10314_v16  ;;  %3609 = vmatpush1.bf16.msra.mxu1 %v10317_v17  ;;  %v10404_v16 = vld [vmem:[#allocation5 + $0xda0] ss:$16 sps:$4 sm:$0xff]   ;;  %v10407_v17 = vld [vmem:[#allocation5 + $0xda8] ss:$16 sps:$4 sm:$0xff]  }
 0x1f9   :  { %3282 = vmatprep.subr.bf16.mxu0 %v10322_v18  ;;  %3610 = vmatprep.subr.bf16.mxu1 %v10325_v19  ;;  %v10412_v18 = vld [vmem:[#allocation5 + $0xdc4] ss:$16 sps:$4 sm:$0xff]   ;;  %v10415_v19 = vld [vmem:[#allocation5 + $0xdcc] ss:$16 sps:$4 sm:$0xff]  }
 0x1fc   :  { %3283 = vmatpush1.bf16.msra.mxu0 %v10320_v20  ;;  %3611 = vmatpush1.bf16.msra.mxu1 %v10323_v21  ;;  %v10410_v20 = vld [vmem:[#allocation5 + $0xdc0] ss:$16 sps:$4 sm:$0xff]   ;;  %v10413_v21 = vld [vmem:[#allocation5 + $0xdc8] ss:$16 sps:$4 sm:$0xff]  }
 0x1fd   :  { %3293 = vmatprep.subr.bf16.mxu0 %v10328_v22  ;;  %3621 = vmatprep.subr.bf16.mxu1 %v10331_v23  ;;  %v10418_v22 = vld [vmem:[#allocation5 + $0xde4] ss:$16 sps:$4 sm:$0xff]   ;;  %v10421_v23 = vld [vmem:[#allocation5 + $0xdec] ss:$16 sps:$4 sm:$0xff]  }
 0x1ff   :  { %3285 = vmatmul.mubr.bf16.vlgmr.msra.gmra.mrb[0].mxu0 %v162_v28  ;;  %3613 = vmatmul.mubr.bf16.vlgmr.msra.gmra.mrb[0].mxu1 %v162_v28  ;;  %v10422_v28 = vld [vmem:[#allocation5 + $0xe00] ss:$16 sps:$4 sm:$0xff]  }
 0x200   :  { %3294 = vmatpush1.bf16.msra.mxu0 %v10326_v26  ;;  %3622 = vmatpush1.bf16.msra.mxu1 %v10329_v27  ;;  %v149_v26 = vld [vmem:[%s11846_s0 + $0x60] sm:$0xff] }
 0x201   :  { %3295 = vmatprep.subr.bf16.mxu0 %v10334_v29  ;;  %3623 = vmatprep.subr.bf16.mxu1 %v10337_v30  ;;  %v10424_v27 = vld [vmem:[#allocation5 + $0xe04] ss:$16 sps:$4 sm:$0xff]   ;;  %v164_v29 = vpack.c.bf16 %v149_v26, %v149_v26  ;;  %v10497_v26 = vld [vmem:[#allocation7 + $0xa8] sm:$0xff]  }
 0x202   :  { %3653 = vmatprep.mubr.bf16.mxu1 %v165_v33  ;;  %3325 = vmatprep.mubr.bf16.mxu0 %v165_v33  ;;  %v10427_v30 = vld [vmem:[#allocation5 + $0xe24] ss:$16 sps:$4 sm:$0xff]   ;;  %v11505_v33 = vmov 0  }
 0x204   :  { %3296 = vmatpush1.bf16.msra.mxu0 %v10332_v31  ;;  %3624 = vmatpush1.bf16.msra.mxu1 %v10335_v32  ;;  %v10425_v31 = vld [vmem:[#allocation5 + $0xe20] ss:$16 sps:$4 sm:$0xff]   ;;  %v10430_v32 = vld [vmem:[#allocation5 + $0xe44] ss:$16 sps:$4 sm:$0xff]  }
 0x205   :  { %3297 = vmatprep.subr.bf16.mxu0 %v10340_v34  ;;  %3625 = vmatprep.subr.bf16.mxu1 %v10343_v35  ;;  %v10428_v34 = vld [vmem:[#allocation5 + $0xe40] ss:$16 sps:$4 sm:$0xff]   ;;  %v10433_v35 = vld [vmem:[#allocation5 + $0xe64] ss:$16 sps:$4 sm:$0xff]  }
 0x208   :  { %3298 = vmatpush1.bf16.msra.mxu0 %v10338_v36  ;;  %3626 = vmatpush1.bf16.msra.mxu1 %v10341_v37  ;;  %v10431_v36 = vld [vmem:[#allocation5 + $0xe60] ss:$16 sps:$4 sm:$0xff]   ;;  %v10436_v37 = vld [vmem:[#allocation5 + $0xe84] ss:$16 sps:$4 sm:$0xff]  }
 0x209   :  { %3299 = vmatprep.subr.bf16.mxu0 %v10346_v38  ;;  %3627 = vmatprep.subr.bf16.mxu1 %v10349_v39  ;;  %v10434_v38 = vld [vmem:[#allocation5 + $0xe80] ss:$16 sps:$4 sm:$0xff]   ;;  %v10439_v39 = vld [vmem:[#allocation5 + $0xea4] ss:$16 sps:$4 sm:$0xff]  }
 0x20c   :  { %3300 = vmatpush1.bf16.msra.mxu0 %v10344_v40  ;;  %3628 = vmatpush1.bf16.msra.mxu1 %v10347_v41  ;;  %v10437_v40 = vld [vmem:[#allocation5 + $0xea0] ss:$16 sps:$4 sm:$0xff]   ;;  %v10442_v41 = vld [vmem:[#allocation5 + $0xec4] ss:$16 sps:$4 sm:$0xff]  }
 0x20d   :  { %3301 = vmatprep.subr.bf16.mxu0 %v10352_v42  ;;  %3629 = vmatprep.subr.bf16.mxu1 %v10355_v43  ;;  %v10440_v42 = vld [vmem:[#allocation5 + $0xec0] ss:$16 sps:$4 sm:$0xff]   ;;  %v10445_v43 = vld [vmem:[#allocation5 + $0xee4] ss:$16 sps:$4 sm:$0xff]  }
 0x210   :  { %3302 = vmatpush1.bf16.msra.mxu0 %v10350_v44  ;;  %3630 = vmatpush1.bf16.msra.mxu1 %v10353_v45  ;;  %v10443_v44 = vld [vmem:[#allocation5 + $0xee0] ss:$16 sps:$4 sm:$0xff]  }
 0x211   :  { %3303 = vmatprep.subr.bf16.mxu0 %v10358_v46  ;;  %3631 = vmatprep.subr.bf16.mxu1 %v10361_v47  ;;  %v151_v45 = vld [vmem:[%s11846_s0 + $0x70] sm:$0xff]  ;;  %v10448_v46 = vld [vmem:[#allocation5 + $0xe0c] ss:$16 sps:$4 sm:$0xff]  }
 0x212   :  { %v10446_v47 = vld [vmem:[#allocation5 + $0xe08] ss:$16 sps:$4 sm:$0xff]  }
 0x214   :  { %3304 = vmatpush1.bf16.msra.mxu0 %v10356_v48  ;;  %3632 = vmatpush1.bf16.msra.mxu1 %v10359_v49  ;;  %v166_v48 = vpack.c.bf16 %v151_v45, %v151_v45  ;;  %v10451_v49 = vld [vmem:[#allocation5 + $0xe2c] ss:$16 sps:$4 sm:$0xff]  }
 0x215   :  { %3305 = vmatprep.subr.bf16.mxu0 %v10364_v50  ;;  %3633 = vmatprep.subr.bf16.mxu1 %v10367_v51  ;;  %v10449_v50 = vld [vmem:[#allocation5 + $0xe28] ss:$16 sps:$4 sm:$0xff]   ;;  %v10454_v51 = vld [vmem:[#allocation5 + $0xe4c] ss:$16 sps:$4 sm:$0xff]  }
 0x218   :  { %3306 = vmatpush1.bf16.msra.mxu0 %v10362_v52  ;;  %3634 = vmatpush1.bf16.msra.mxu1 %v10365_v53  ;;  %v10452_v52 = vld [vmem:[#allocation5 + $0xe48] ss:$16 sps:$4 sm:$0xff]   ;;  %v10457_v53 = vld [vmem:[#allocation5 + $0xe6c] ss:$16 sps:$4 sm:$0xff]  }
 0x219   :  { %3307 = vmatprep.subr.bf16.mxu0 %v10370_v54  ;;  %3635 = vmatprep.subr.bf16.mxu1 %v10373_v55  ;;  %v10455_v54 = vld [vmem:[#allocation5 + $0xe68] ss:$16 sps:$4 sm:$0xff]   ;;  %v10460_v55 = vld [vmem:[#allocation5 + $0xe8c] ss:$16 sps:$4 sm:$0xff]  }
 0x21c   :  { %3308 = vmatpush1.bf16.msra.mxu0 %v10368_v56  ;;  %3636 = vmatpush1.bf16.msra.mxu1 %v10371_v57  ;;  %v10458_v56 = vld [vmem:[#allocation5 + $0xe88] ss:$16 sps:$4 sm:$0xff]   ;;  %v10463_v57 = vld [vmem:[#allocation5 + $0xeac] ss:$16 sps:$4 sm:$0xff]  }
 0x21d   :  { %3309 = vmatprep.subr.bf16.mxu0 %v10376_v58  ;;  %3637 = vmatprep.subr.bf16.mxu1 %v10379_v59  ;;  %v10461_v58 = vld [vmem:[#allocation5 + $0xea8] ss:$16 sps:$4 sm:$0xff]   ;;  %v10466_v59 = vld [vmem:[#allocation5 + $0xecc] ss:$16 sps:$4 sm:$0xff]  }
 0x220   :  { %3310 = vmatpush1.bf16.msra.mxu0 %v10374_v60  ;;  %3638 = vmatpush1.bf16.msra.mxu1 %v10377_v61  ;;  %v10464_v60 = vld [vmem:[#allocation5 + $0xec8] ss:$16 sps:$4 sm:$0xff]   ;;  %v10469_v61 = vld [vmem:[#allocation5 + $0xeec] ss:$16 sps:$4 sm:$0xff]  }
 0x221   :  { %3311 = vmatprep.subr.bf16.mxu0 %v10382_v62  ;;  %3639 = vmatprep.subr.bf16.mxu1 %v10385_v63  ;;  %v10467_v62 = vld [vmem:[#allocation5 + $0xee8] ss:$16 sps:$4 sm:$0xff]   ;;  %v10470_v63 = vld [vmem:[#allocation7 + $0x40] sm:$0xff]  }
 0x224   :  { %3312 = vmatpush1.bf16.msra.mxu0 %v10380_v0  ;;  %3640 = vmatpush1.bf16.msra.mxu1 %v10383_v1  ;;  %v10471_v0 = vld [vmem:[#allocation7] sm:$0xff]   ;;  %v10472_v1 = vld [vmem:[#allocation7 + $0x48] sm:$0xff]  }
 0x225   :  { %3313 = vmatprep.subr.bf16.mxu0 %v10388_v2  ;;  %3641 = vmatprep.subr.bf16.mxu1 %v10391_v3  ;;  %v10473_v2 = vld [vmem:[#allocation7 + $0x8] sm:$0xff]   ;;  %v10474_v3 = vld [vmem:[#allocation7 + $0x50] sm:$0xff]  }
 0x228   :  { %3314 = vmatpush1.bf16.msra.mxu0 %v10386_v4  ;;  %3642 = vmatpush1.bf16.msra.mxu1 %v10389_v5  ;;  %v10475_v4 = vld [vmem:[#allocation7 + $0x10] sm:$0xff]   ;;  %v10476_v5 = vld [vmem:[#allocation7 + $0x58] sm:$0xff]  }
 0x229   :  { %3315 = vmatprep.subr.bf16.mxu0 %v10394_v6  ;;  %3643 = vmatprep.subr.bf16.mxu1 %v10397_v7  ;;  %v10477_v6 = vld [vmem:[#allocation7 + $0x18] sm:$0xff]   ;;  %v10478_v7 = vld [vmem:[#allocation7 + $0x60] sm:$0xff]  }
 0x22c   :  { %3316 = vmatpush1.bf16.msra.mxu0 %v10392_v8  ;;  %3644 = vmatpush1.bf16.msra.mxu1 %v10395_v9  ;;  %v10479_v8 = vld [vmem:[#allocation7 + $0x20] sm:$0xff]   ;;  %v10480_v9 = vld [vmem:[#allocation7 + $0x68] sm:$0xff]  }
 0x22d   :  { %3317 = vmatprep.subr.bf16.mxu0 %v10400_v10  ;;  %3645 = vmatprep.subr.bf16.mxu1 %v10403_v11  ;;  %v10481_v10 = vld [vmem:[#allocation7 + $0x28] sm:$0xff]   ;;  %v10482_v11 = vld [vmem:[#allocation7 + $0x70] sm:$0xff]  }
 0x230   :  { %3318 = vmatpush1.bf16.msra.mxu0 %v10398_v12  ;;  %3646 = vmatpush1.bf16.msra.mxu1 %v10401_v13  ;;  %v10483_v12 = vld [vmem:[#allocation7 + $0x30] sm:$0xff]   ;;  %v10484_v13 = vld [vmem:[#allocation7 + $0x78] sm:$0xff]  }
 0x231   :  { %3319 = vmatprep.subr.bf16.mxu0 %v10406_v14  ;;  %3647 = vmatprep.subr.bf16.mxu1 %v10409_v15  ;;  %v10485_v14 = vld [vmem:[#allocation7 + $0x38] sm:$0xff]   ;;  %v10486_v15 = vld [vmem:[#allocation7 + $0xc0] sm:$0xff]  }
 0x234   :  { %3320 = vmatpush1.bf16.msra.mxu0 %v10404_v16  ;;  %3648 = vmatpush1.bf16.msra.mxu1 %v10407_v17  ;;  %v10487_v16 = vld [vmem:[#allocation7 + $0x80] sm:$0xff]   ;;  %v10488_v17 = vld [vmem:[#allocation7 + $0xc8] sm:$0xff]  }
 0x235   :  { %3321 = vmatprep.subr.bf16.mxu0 %v10412_v18  ;;  %3649 = vmatprep.subr.bf16.mxu1 %v10415_v19  ;;  %v10489_v18 = vld [vmem:[#allocation7 + $0x88] sm:$0xff]   ;;  %v10490_v19 = vld [vmem:[#allocation7 + $0xd0] sm:$0xff]  }
 0x238   :  { %3322 = vmatpush1.bf16.msra.mxu0 %v10410_v20  ;;  %3650 = vmatpush1.bf16.msra.mxu1 %v10413_v21  ;;  %v10491_v20 = vld [vmem:[#allocation7 + $0x90] sm:$0xff]   ;;  %v10492_v21 = vld [vmem:[#allocation7 + $0xd8] sm:$0xff]  }
 0x239   :  { %3323 = vmatprep.subr.bf16.mxu0 %v10418_v22  ;;  %3651 = vmatprep.subr.bf16.mxu1 %v10421_v23  ;;  %v10493_v22 = vld [vmem:[#allocation7 + $0x98] sm:$0xff]   ;;  %v10494_v23 = vld [vmem:[#allocation7 + $0xe0] sm:$0xff]  }
 0x23c   :  { %3324 = vmatpush1.bf16.msra.mxu0 %v10416_v24  ;;  %3652 = vmatpush1.bf16.msra.mxu1 %v10419_v25  ;;  %v10495_v24 = vld [vmem:[#allocation7 + $0xa0] sm:$0xff]   ;;  %v10496_v25 = vld [vmem:[#allocation7 + $0xe8] sm:$0xff]  }
 0x23d   :  { %3334 = vmatprep.subr.bf16.mxu0 %v10424_v27  ;;  %9525 = vmatprep.subr.bf16.mxu1 %v10486_v15  ;;  %v10498_v27 = vld [vmem:[#allocation7 + $0xf0] sm:$0xff]  }
 0x23f   :  { %3654 = vmatmul.mubr.bf16.vlgmr.msra.gmra.mrb[0].mxu1 %v164_v29  ;;  %3326 = vmatmul.mubr.bf16.vlgmr.msra.gmra.mrb[0].mxu0 %v164_v29  ;;  %v10500_v29 = vld [vmem:[#allocation7 + $0xf8] sm:$0xff]  }
 0x240   :  { %3335 = vmatpush1.bf16.msra.mxu0 %v10422_v28  ;;  %3366 = vmatprep.mubr.bf16.mxu0 %v11505_v33  ;;  %v10499_v28 = vld [vmem:[#allocation7 + $0xb0] sm:$0xff]  }
 0x241   :  { %3336 = vmatprep.subr.bf16.mxu0 %v10427_v30  ;;  %9526 = vmatpush3.bf16.msra.mxu1 %v10487_v16  ;;  %v10501_v30 = vld [vmem:[#allocation7 + $0xb8] sm:$0xff]  }
 0x242   :  { %9527 = vmatprep.subr.bf16.mxu1 %v10488_v17 }
 0x244   :  { %3337 = vmatpush1.bf16.msra.mxu0 %v10425_v31 }
 0x245   :  { %3338 = vmatprep.subr.bf16.mxu0 %v10430_v32  ;;  %9528 = vmatpush3.bf16.msra.mxu1 %v10489_v18 }
 0x246   :  { %9529 = vmatprep.subr.bf16.mxu1 %v10490_v19 }
 0x248   :  { %3339 = vmatpush1.bf16.msra.mxu0 %v10428_v34 }
 0x249   :  { %3340 = vmatprep.subr.bf16.mxu0 %v10433_v35  ;;  %9530 = vmatpush3.bf16.msra.mxu1 %v10491_v20 }
 0x24a   :  { %9531 = vmatprep.subr.bf16.mxu1 %v10492_v21 }
 0x24c   :  { %3341 = vmatpush1.bf16.msra.mxu0 %v10431_v36 }
 0x24d   :  { %3342 = vmatprep.subr.bf16.mxu0 %v10436_v37  ;;  %9532 = vmatpush3.bf16.msra.mxu1 %v10493_v22 }
 0x24e   :  { %9533 = vmatprep.subr.bf16.mxu1 %v10494_v23 }
 0x250   :  { %3343 = vmatpush1.bf16.msra.mxu0 %v10434_v38 }
 0x251   :  { %3344 = vmatprep.subr.bf16.mxu0 %v10439_v39  ;;  %9534 = vmatpush3.bf16.msra.mxu1 %v10495_v24 }
 0x252   :  { %9535 = vmatprep.subr.bf16.mxu1 %v10496_v25  ;;  %v11715_v25 = vld [vmem:[#allocation2] sm:$0xf] }
 0x254   :  { %3345 = vmatpush1.bf16.msra.mxu0 %v10437_v40 }
 0x255   :  { %3346 = vmatprep.subr.bf16.mxu0 %v10442_v41  ;;  %9536 = vmatpush3.bf16.msra.mxu1 %v10497_v26 }
 0x256   :  { %9537 = vmatprep.subr.bf16.mxu1 %v10498_v27 }
 0x258   :  { %3347 = vmatpush1.bf16.msra.mxu0 %v10440_v42 }
 0x259   :  { %3348 = vmatprep.subr.bf16.mxu0 %v10445_v43  ;;  %9538 = vmatpush3.bf16.msra.mxu1 %v10499_v28 }
 0x25a   :  { %9539 = vmatprep.subr.bf16.mxu1 %v10500_v29 }
 0x25c   :  { %3349 = vmatpush1.bf16.msra.mxu0 %v10443_v44 }
 0x25d   :  { %3662 = vmatprep.subr.bf16.mxu0 %v10448_v46  ;;  %9540 = vmatpush3.bf16.msra.mxu1 %v10501_v30  ;;  %v130_v30 = vld [vmem:[#allocation2 + $0x4] sm:$0xf] }
 0x25f   :  { %3367 = vmatmul.mubr.bf16.vlgmr.msra.gmra.mrb[0].mxu0 %v166_v48 }
 0x260   :  { %3663 = vmatpush1.bf16.msra.mxu0 %v10446_v47  ;;  %3694 = vmatprep.mubr.bf16.mxu0 %v11505_v33 }
 0x261   :  { %3664 = vmatprep.subr.bf16.mxu0 %v10451_v49 }
 0x264   :  { %3665 = vmatpush1.bf16.msra.mxu0 %v10449_v50 }
 0x265   :  { %3666 = vmatprep.subr.bf16.mxu0 %v10454_v51 }
 0x268   :  { %3667 = vmatpush1.bf16.msra.mxu0 %v10452_v52 }
 0x269   :  { %3668 = vmatprep.subr.bf16.mxu0 %v10457_v53 }
 0x26c   :  { %3669 = vmatpush1.bf16.msra.mxu0 %v10455_v54 }
 0x26d   :  { %3670 = vmatprep.subr.bf16.mxu0 %v10460_v55 }
 0x270   :  { %3671 = vmatpush1.bf16.msra.mxu0 %v10458_v56 }
 0x271   :  { %3672 = vmatprep.subr.bf16.mxu0 %v10463_v57 }
 0x274   :  { %3673 = vmatpush1.bf16.msra.mxu0 %v10461_v58 }
 0x275   :  { %3674 = vmatprep.subr.bf16.mxu0 %v10466_v59 }
 0x278   :  { %3675 = vmatpush1.bf16.msra.mxu0 %v10464_v60 }
 0x279   :  { %3676 = vmatprep.subr.bf16.mxu0 %v10469_v61 }
 0x27c   :  { %3677 = vmatpush1.bf16.msra.mxu0 %v10467_v62 }
 0x27d   :  { %9503 = vmatprep.subr.bf16.mxu0 %v10470_v63 }
 0x27f   :  { %3695 = vmatmul.mubr.bf16.vlgmr.msra.gmra.mrb[4].mxu0 %v166_v48 }
 0x280   :  { %9504 = vmatpush3.bf16.msra.mxu0 %v10471_v0 }
 0x281   :  { %9505 = vmatprep.subr.bf16.mxu0 %v10472_v1 }
 0x284   :  { %9506 = vmatpush3.bf16.msra.mxu0 %v10473_v2 }
 0x285   :  { %9507 = vmatprep.subr.bf16.mxu0 %v10474_v3 }
 0x288   :  { %9508 = vmatpush3.bf16.msra.mxu0 %v10475_v4 }
 0x289   :  { %9509 = vmatprep.subr.bf16.mxu0 %v10476_v5 }
 0x28c   :  { %9510 = vmatpush3.bf16.msra.mxu0 %v10477_v6 }
 0x28d   :  { %9511 = vmatprep.subr.bf16.mxu0 %v10478_v7  ;;  %v3781_v7 = vlaneseq }
 0x28f   :  { %v11710_v18 = vshrl.u32 %v3781_v7, 7 }
 0x290   :  { %9512 = vmatpush3.bf16.msra.mxu0 %v10479_v8 }
 0x291   :  { %9513 = vmatprep.subr.bf16.mxu0 %v10480_v9  ;;  %v11713_v23 = vsub.s32 0, %v11710_v18  ;;  %v11718_v27 = vsub.s32 1, %v11710_v18 }
 0x294   :  { %9514 = vmatpush3.bf16.msra.mxu0 %v10481_v10 }
 0x295   :  { %9515 = vmatprep.subr.bf16.mxu0 %v10482_v11 }
 0x298   :  { %9516 = vmatpush3.bf16.msra.mxu0 %v10483_v12 }
 0x299   :  { %9517 = vmatprep.subr.bf16.mxu0 %v10484_v13 }
 0x29c   :  { %9518 = vmatpush3.bf16.msra.mxu0 %v10485_v14 }
 0x312   :  { %v3655_v31 = vpop.f32.mrb[0].mxu1 }
 0x313   :  { %v3657_v32 = vpop.f32.mrb[1].mxu1 }
 0x314   :  { %v3659_v34 = vpop.f32.mrb[2].mxu1 }
 0x315   :  { %v3660_v35 = vpop.f32.mrb[3].mxu1 }
 0x332   :  { %v3368_v36 = vpop.f32.mrb[0].mxu0 }
 0x333   :  { %v3703_v37 = vrot.slane %v3368_v36, 4  ;;  %v3370_v38 = vpop.f32.mrb[1].mxu0 }
 0x334   :  { %v3709_v39 = vrot.slane %v3370_v38, 4  ;;  %v3372_v40 = vpop.f32.mrb[2].mxu0 }
 0x335   :  { %v3704_v41 = vadd.f32 %v3703_v37, %v3368_v36  ;;  %v3373_v42 = vpop.f32.mrb[3].mxu0  ;;  %v3809_v40 = vrot.slane %v130_v30, %v11713_v23 }
 0x336   :  { %v3710_v43 = vadd.f32 %v3709_v39, %v3370_v38 }
 0x337   :  { %v3705_v44 = vrot.slane %v3704_v41, 2 }
 0x338   :  { %v3711_v45 = vrot.slane %v3710_v43, 2 }
 0x339   :  { %v3706_v46 = vadd.f32 %v3705_v44, %v3704_v41 }
 0x33a   :  { %v3712_v47 = vadd.f32 %v3711_v45, %v3710_v43  ;;  %v3813_v43 = vrot.slane %v130_v30, %v11718_v27 }
 0x33b   :  { %v3707_v48 = vrot.slane %v3706_v46, 1 }
 0x33c   :  { %v3713_v49 = vrot.slane %v3712_v47, 1 }
 0x33d   :  { %v3708_v50 = vadd.f32 %v3707_v48, %v3706_v46 }
 0x33e   :  { %v3714_v51 = vadd.f32 %v3713_v49, %v3712_v47 }
 0x33f   :  { %v3728_v52 = vmul.f32 0.125, %v3708_v50 }
 0x340   :  { %v3729_v53 = vmul.f32 0.125, %v3714_v51 }
 0x341   :  { %v3732_v54 = vsub.f32 %v3368_v36, %v3728_v52  ;;  %v3788_v36 = vrot.slane %v11715_v25, %v11718_v27 }
 0x342   :  { %v3733_v55 = vsub.f32 %v3370_v38, %v3729_v53 }
 0x343   :  { %v3736_v56 = vmul.f32 %v3732_v54, %v3732_v54 }
 0x344   :  { %v3737_v57 = vmul.f32 %v3733_v55, %v3733_v55 }
 0x345   :  { %v3740_v58 = vrot.slane %v3736_v56, 4 }
 0x346   :  { %v3746_v59 = vrot.slane %v3737_v57, 4 }
 0x347   :  { %v3741_v60 = vadd.f32 %v3740_v58, %v3736_v56 }
 0x348   :  { %v3747_v61 = vadd.f32 %v3746_v59, %v3737_v57 }
 0x349   :  { %v3742_v62 = vrot.slane %v3741_v60, 2 }
 0x34a   :  { %v3748_v63 = vrot.slane %v3747_v61, 2 }
 0x34b   :  { %v3743_v0 = vadd.f32 %v3742_v62, %v3741_v60 }
 0x34c   :  { %v3749_v1 = vadd.f32 %v3748_v63, %v3747_v61 }
 0x34d   :  { %v3744_v2 = vrot.slane %v3743_v0, 1 }
 0x34e   :  { %v3750_v3 = vrot.slane %v3749_v1, 1 }
 0x34f   :  { %v3745_v4 = vadd.f32 %v3744_v2, %v3743_v0 }
 0x350   :  { %v3751_v5 = vadd.f32 %v3750_v3, %v3749_v1 }
 0x351   :  { %v3764_v6 = vmul.f32 0.125, %v3745_v4 }
 0x352   :  { %v3765_v8 = vmul.f32 0.125, %v3751_v5  ;;  %v3696_v9 = vpop.f32.mrb[4].mxu0 }
 0x353   :  { %v3768_v10 = vadd.f32 1e-05, %v3764_v6  ;;  %v9637_v11 = vadd.f32 %v3696_v9, %v3655_v31  ;;  %v3698_v12 = vpop.f32.mrb[5].mxu0  ;;  %v3784_v31 = vrot.slane %v11715_v25, %v11713_v23  ;;  %v11727_v9 = vsub.s32 2, %v11710_v18 }
 0x354   :  { %v3769_v13 = vadd.f32 1e-05, %v3765_v8  ;;  %v9638_v14 = vadd.f32 %v3698_v12, %v3657_v32  ;;  %v3700_v15 = vpop.f32.mrb[6].mxu0 }
 0x355   :  { %11266 = vrsqrt.f32 %v3768_v10  ;;  %v3715_v16 = vrot.slane %v9637_v11, 4  ;;  %v3701_v17 = vpop.f32.mrb[7].mxu0  ;;  %v11730_v10 = vsub.s32 3, %v11710_v18 }
 0x356   :  { %11268 = vrsqrt.f32 %v3769_v13  ;;  %v3721_v19 = vrot.slane %v9638_v14, 4 }
 0x357   :  { %v3716_v20 = vadd.f32 %v9637_v11, %v3715_v16  ;;  %v3796_v13 = vrot.slane %v11715_v25, %v11730_v10  ;;  %v3817_v16 = vrot.slane %v130_v30, %v11727_v9 }
 0x358   :  { %v3722_v21 = vadd.f32 %v9638_v14, %v3721_v19  ;;  %v3821_v19 = vrot.slane %v130_v30, %v11730_v10  ;;  %v10505_v30 = vld [vmem:[#allocation8 + $0x18] sm:$0xff]  }
 0x359   :  { %v3717_v22 = vrot.slane %v3716_v20, 2 }
 0x35a   :  { %v3723_v24 = vrot.slane %v3722_v21, 2 }
 0x35b   :  { %v3718_v26 = vadd.f32 %v3717_v22, %v3716_v20 }
 0x35c   :  { %v3724_v28 = vadd.f32 %v3723_v24, %v3722_v21 }
 0x35d   :  { %v3719_v29 = vrot.slane %v3718_v26, 1 }
 0x35e   :  { %v3725_v32 = vrot.slane %v3724_v28, 1 }
 0x35f   :  { %v11267_v34 = vpop.eup %11266  ;;  %v3720_v35 = vadd.f32 %v3719_v29, %v3718_v26 }
 0x360   :  { %v11269_v37 = vpop.eup %11268  ;;  %v3776_v38 = vmul.f32 %v11267_v34, %v3732_v54  ;;  %v3726_v39 = vadd.f32 %v3725_v32, %v3724_v28  ;;  %v10502_v32 = vld [vmem:[#allocation8] sm:$0xff]   ;;  %v11506_v34 = vmov 0.0  }
 0x361   :  { %v3777_v41 = vmul.f32 %v11269_v37, %v3733_v55  ;;  %v3730_v42 = vmul.f32 0.125, %v3720_v35  ;;  %9605 = vmatprep.subr.bf16.mxu0 %v11506_v34  ;;  %9625 = vmatprep.subr.bf16.mxu1 %v11506_v34  ;;  %v10504_v35 = vld [vmem:[#allocation8 + $0x10] sm:$0xff]   ;;  %v10507_v37 = vld [vmem:[#allocation8 + $0x28] sm:$0xff]  }
 0x362   :  { %v3801_v44 = vmul.f32 %v3784_v31, %v3776_v38  ;;  %v3731_v45 = vmul.f32 0.125, %v3726_v39  ;;  %v10508_v38 = vld [vmem:[#allocation8 + $0x30] sm:$0xff]   ;;  %v10509_v39 = vld [vmem:[#allocation8 + $0x38] sm:$0xff]  }
 0x363   :  { %v3734_v46 = vsub.f32 %v9637_v11, %v3730_v42  ;;  %v3802_v47 = vmul.f32 %v3788_v36, %v3777_v41  ;;  %v3792_v11 = vrot.slane %v11715_v25, %v11727_v9  ;;  %v10503_v25 = vld [vmem:[#allocation8 + $0x8] sm:$0xff]   ;;  %v10506_v36 = vld [vmem:[#allocation8 + $0x20] sm:$0xff]  }
 0x364   :  { %v3735_v48 = vsub.f32 %v9638_v14, %v3731_v45  ;;  %v3826_v49 = vadd.f32 %v3809_v40, %v3801_v44  ;;  %v8943_v45 = vld [vmem:[#allocation2 + $0x8] ss:$0 sm:$0xff] }
 0x365   :  { %v3738_v50 = vmul.f32 %v3734_v46, %v3734_v46  ;;  %v3827_v51 = vadd.f32 %v3813_v43, %v3802_v47 }
 0x366   :  { %v3739_v52 = vmul.f32 %v3735_v48, %v3735_v48  ;;  %v3830_v53 = vmax.f32 %v3826_v49, 0.0 }
 0x367   :  { %v3752_v56 = vrot.slane %v3738_v50, 4  ;;  %v3831_v57 = vmax.f32 %v3827_v51, 0.0 }
 0x368   :  { %v3758_v54 = vrot.slane %v3739_v52, 4  ;;  %v3834_v55 = vpack.c.bf16 %v3830_v53, %v3830_v53 }
 0x369   :  { %v3753_v58 = vadd.f32 %v3752_v56, %v3738_v50  ;;  %v3835_v59 = vpack.c.bf16 %v3831_v57, %v3831_v57  ;;  %v10510_v57 = vld [vmem:[#allocation10] sm:$0xff]  }
 0x36a   :  { %v3759_v60 = vadd.f32 %v3758_v54, %v3739_v52  ;;  %v10511_v54 = vld [vmem:[#allocation10 + $0x8] sm:$0xff]  }
 0x36b   :  { %v3754_v61 = vrot.slane %v3753_v58, 2  ;;  %4132 = vmatprep.mubr.bf16.mxu0 %v3835_v59 }
 0x36c   :  { %v3760_v62 = vrot.slane %v3759_v60, 2  ;;  %4133 = vmatmul.mubr.bf16.vlgmr.msra.gmra.mrb[8].mxu0 %v3834_v55 }
 0x36d   :  { %v3755_v63 = vadd.f32 %v3754_v61, %v3753_v58  ;;  %9606 = vmatpush3.bf16.msra.mxu0 %v10502_v32  ;;  %9621 = vmatprep.mubr.msk.bf16.mxu0 %vm11507_vm0, %v11506_v34  ;;  %v8976_v58 = vld [vmem:[#allocation2 + $0x9] ss:$0 sm:$0xff]  ;;  %v10522_v32 = vld [vmem:[#allocation11 + $0x24] ss:$16 sps:$4 sm:$0xff]  }
 0x36e   :  { %v3761_v0 = vadd.f32 %v3760_v62, %v3759_v60  ;;  %9607 = vmatprep.subr.bf16.mxu0 %v11506_v34  ;;  %v10512_v62 = vld [vmem:[#allocation10 + $0x10] sm:$0xff]  }
 0x36f   :  { %v3756_v1 = vrot.slane %v3755_v63, 1 }
 0x370   :  { %v3762_v2 = vrot.slane %v3761_v0, 1 }
 0x371   :  { %v3757_v3 = vadd.f32 %v3756_v1, %v3755_v63  ;;  %9608 = vmatpush3.bf16.msra.mxu0 %v10503_v25  ;;  %v10528_v25 = vld [vmem:[#allocation11 + $0x44] ss:$16 sps:$4 sm:$0xff]  }
 0x372   :  { %v3763_v4 = vadd.f32 %v3762_v2, %v3761_v0  ;;  %9609 = vmatprep.subr.bf16.mxu0 %v11506_v34  ;;  %v10513_v2 = vld [vmem:[#allocation10 + $0x18] sm:$0xff]  }
 0x373   :  { %v3766_v5 = vmul.f32 0.125, %v3757_v3  ;;  %v10516_v3 = vld [vmem:[#allocation11 + $0x4] ss:$16 sps:$4 sm:$0xff]  }
 0x374   :  { %v3767_v6 = vmul.f32 0.125, %v3763_v4  ;;  %v10517_v4 = vld [vmem:[#allocation11 + $0x8] ss:$16 sps:$4 sm:$0xff]  }
 0x375   :  { %v3770_v7 = vadd.f32 1e-05, %v3766_v5  ;;  %9610 = vmatpush3.bf16.msra.mxu0 %v10504_v35  ;;  %v10519_v5 = vld [vmem:[#allocation11 + $0xc] ss:$16 sps:$4 sm:$0xff]   ;;  %v10526_v35 = vld [vmem:[#allocation11 + $0x40] ss:$16 sps:$4 sm:$0xff]  }
 0x376   :  { %v3771_v8 = vadd.f32 1e-05, %v3767_v6  ;;  %9611 = vmatprep.subr.bf16.mxu0 %v11506_v34  ;;  %v10525_v6 = vld [vmem:[#allocation11 + $0x2c] ss:$16 sps:$4 sm:$0xff]  }
 0x377   :  { %11270 = vrsqrt.f32 %v3770_v7  ;;  %v10523_v7 = vld [vmem:[#allocation11 + $0x28] ss:$16 sps:$4 sm:$0xff]  }
 0x378   :  { %11272 = vrsqrt.f32 %v3771_v8 }
 0x379   :  { %9612 = vmatpush3.bf16.msra.mxu0 %v10505_v30  ;;  %v10534_v30 = vld [vmem:[#allocation11 + $0x64] ss:$16 sps:$4 sm:$0xff]  }
 0x37a   :  { %9613 = vmatprep.subr.bf16.mxu0 %v11506_v34 }
 0x37d   :  { %9614 = vmatpush3.bf16.msra.mxu0 %v10506_v36  ;;  %v10532_v36 = vld [vmem:[#allocation11 + $0x60] ss:$16 sps:$4 sm:$0xff]  }
 0x37e   :  { %9615 = vmatprep.subr.bf16.mxu0 %v11506_v34 }
 0x381   :  { %v11271_v12 = vpop.eup %11270  ;;  %9616 = vmatpush3.bf16.msra.mxu0 %v10507_v37  ;;  %v10540_v37 = vld [vmem:[#allocation11 + $0x84] ss:$16 sps:$4 sm:$0xff]  }
 0x382   :  { %v11273_v14 = vpop.eup %11272  ;;  %v3778_v15 = vmul.f32 %v11271_v12, %v3734_v46  ;;  %9617 = vmatprep.subr.bf16.mxu0 %v11506_v34  ;;  %v10529_v12 = vld [vmem:[#allocation11 + $0x48] ss:$16 sps:$4 sm:$0xff]  }
 0x383   :  { %v3779_v17 = vmul.f32 %v11273_v14, %v3735_v48  ;;  %v10535_v14 = vld [vmem:[#allocation11 + $0x68] ss:$16 sps:$4 sm:$0xff]  }
 0x384   :  { %v3803_v20 = vmul.f32 %v3792_v11, %v3778_v15  ;;  %v10531_v11 = vld [vmem:[#allocation11 + $0x4c] ss:$16 sps:$4 sm:$0xff]  }
 0x385   :  { %v3804_v21 = vmul.f32 %v3796_v13, %v3779_v17  ;;  %9618 = vmatpush3.bf16.msra.mxu0 %v10508_v38  ;;  %v10537_v13 = vld [vmem:[#allocation11 + $0x6c] ss:$16 sps:$4 sm:$0xff]   ;;  %v10538_v38 = vld [vmem:[#allocation11 + $0x80] ss:$16 sps:$4 sm:$0xff]  }
 0x386   :  { %v3828_v22 = vadd.f32 %v3817_v16, %v3803_v20  ;;  %9619 = vmatprep.subr.bf16.mxu0 %v11506_v34  ;;  %v10543_v15 = vld [vmem:[#allocation11 + $0x8c] ss:$16 sps:$4 sm:$0xff]   ;;  %v10541_v16 = vld [vmem:[#allocation11 + $0x88] ss:$16 sps:$4 sm:$0xff]  }
 0x387   :  { %v3829_v24 = vadd.f32 %v3821_v19, %v3804_v21  ;;  %v10549_v17 = vld [vmem:[#allocation11 + $0xac] ss:$16 sps:$4 sm:$0xff]   ;;  %v10547_v19 = vld [vmem:[#allocation11 + $0xa8] ss:$16 sps:$4 sm:$0xff]  }
 0x388   :  { %v3832_v26 = vmax.f32 %v3828_v22, 0.0  ;;  %v10555_v20 = vld [vmem:[#allocation11 + $0xcc] ss:$16 sps:$4 sm:$0xff]   ;;  %v10553_v21 = vld [vmem:[#allocation11 + $0xc8] ss:$16 sps:$4 sm:$0xff]  }
 0x389   :  { %v3833_v28 = vmax.f32 %v3829_v24, 0.0  ;;  %9620 = vmatpush3.bf16.msra.mxu0 %v10509_v39  ;;  %v4296_v22 = vld [vmem:[%s11847_s1] sm:$0xff]  ;;  %s11508_s1 = smov [#allocation14]  }
 0x38a   :  { %v3836_v31 = vpack.c.bf16 %v3832_v26, %v3832_v26  ;;  %4642 = vmatprep.subr.bf16.mxu0 %v10519_v5  ;;  %v10546_v39 = vld [vmem:[#allocation11 + $0xa4] ss:$16 sps:$4 sm:$0xff]   ;;  %v10583_v5 = vld [vmem:[#allocation13 + $0x170] ss:$60 sps:$4 sm:$0xff]   ;;  %s8447_s25 = sshll.u32 %s11508_s1, 4  ;;  %s8448_s25 = int_to_ptr.vmem [resolvable:$true] %s8447_s25 }
 0x38b   :  { %v3837_v29 = vpack.c.bf16 %v3833_v28, %v3833_v28  ;;  %s11460_s26 = scalar_lea.vmem %s8448_s25, 1920  ;;  %p11465_p1 = scmp.lt.s32.totalorder %s8448_s25, %s8448_s25 }
 0x38c   :  { %p11461_p0 = scmp.ne.s32.totalorder %s8448_s25, %s11460_s26  ;;  %p11466_p2 = scmp.lt.s32.totalorder %s11460_s26, %s11460_s26 }
 0x38d   :  { %4172 = vmatprep.mubr.bf16.mxu1 %v3837_v29  ;;  %v10514_v29 = vld [vmem:[#allocation11] ss:$16 sps:$4 sm:$0xff]  }
 0x38e   :  { %4173 = vmatmul.mubr.bf16.vlgmr.msra.gmra.mrb[4].mxu1 %v3836_v31  ;;  %p11467_p3 = por %p11466_p2, %p11465_p1 }
 0x38f   :  { %9633 = vmatprep.mubr.msk.bf16.mxu1 %vm11507_vm0, %v11506_v34  ;;  %9626 = vmatpush3.bf16.msra.mxu1 %v10510_v57  ;;  %v10562_v57 = vld [vmem:[#allocation13] ss:$60 sps:$4 sm:$0xff]  }
 0x390   :  { %9627 = vmatprep.subr.bf16.mxu1 %v11506_v34  ;;  %p11468_p4 = pnand %p11467_p3, %p11461_p0 }
 0x393   :  { %9628 = vmatpush3.bf16.msra.mxu1 %v10511_v54  ;;  %v10565_v54 = vld [vmem:[#allocation13 + $0x8] ss:$60 sps:$4 sm:$0xff]  }
 0x394   :  { %9629 = vmatprep.subr.bf16.mxu1 %v11506_v34 }
 0x397   :  { %9630 = vmatpush3.bf16.msra.mxu1 %v10512_v62  ;;  %v10576_v62 = vld [vmem:[#allocation13 + $0xf4] ss:$60 sps:$4 sm:$0xff]  }
 0x398   :  { %9631 = vmatprep.subr.bf16.mxu1 %v11506_v34  ;;  %v10520_v34 = vld [vmem:[#allocation11 + $0x20] ss:$16 sps:$4 sm:$0xff]  }
 0x39b   :  { %9632 = vmatpush3.bf16.msra.mxu1 %v10513_v2  ;;  %v10582_v2 = vld [vmem:[#allocation13 + $0x16c] ss:$60 sps:$4 sm:$0xff]  }
 0x39c   :  { %4601 = vmatprep.subr.bf16.mxu1 %v10516_v3  ;;  %v10585_v3 = vld [vmem:[#allocation13 + $0x174] ss:$60 sps:$4 sm:$0xff]  }
 0x43f   :  { %v9519_v40 = vpop.f32.mrb[8].mxu0 }
 0x440   :  { %v9520_v41 = vpop.f32.mrb[9].mxu0 }
 0x441   :  { %v9521_v42 = vadd.f32 %v9520_v41, %v9519_v40  ;;  %v9522_v43 = vpop.f32.mrb[10].mxu0  ;;  %v10544_v40 = vld [vmem:[#allocation11 + $0xa0] ss:$16 sps:$4 sm:$0xff]   ;;  %v10552_v41 = vld [vmem:[#allocation11 + $0xc4] ss:$16 sps:$4 sm:$0xff]  }
 0x442   :  { %v9523_v44 = vpop.f32.mrb[11].mxu0  ;;  %v10561_v43 = vld [vmem:[#allocation11 + $0xec] ss:$16 sps:$4 sm:$0xff]  }
 0x443   :  { %v4135_v48 = vadd.f32 %v9521_v42, %v8943_v45  ;;  %v10558_v42 = vld [vmem:[#allocation11 + $0xe4] ss:$16 sps:$4 sm:$0xff]   ;;  %v10556_v44 = vld [vmem:[#allocation11 + $0xe0] ss:$16 sps:$4 sm:$0xff]   ;;  %v10559_v45 = vld [vmem:[#allocation11 + $0xe8] ss:$16 sps:$4 sm:$0xff]  }
 0x461   :  { %v9541_v46 = vpop.f32.mrb[4].mxu1 }
 0x462   :  { %v9542_v47 = vpop.f32.mrb[5].mxu1 }
 0x463   :  { %v9543_v49 = vadd.f32 %v9542_v47, %v9541_v46  ;;  %v9544_v50 = vpop.f32.mrb[6].mxu1  ;;  %v10564_v46 = vld [vmem:[#allocation13 + $0x4] ss:$60 sps:$4 sm:$0xff]   ;;  %v10567_v47 = vld [vmem:[#allocation13 + $0xc] ss:$60 sps:$4 sm:$0xff]  }
 0x464   :  { %v9545_v51 = vpop.f32.mrb[7].mxu1 }
 0x465   :  { %v4175_v52 = vadd.f32 %v9543_v49, %v4135_v48  ;;  %v8985_v48 = vld [vmem:[#allocation2 + $0xa] ss:$0 sm:$0xff] }
 0x467   :  { %v4180_v53 = vmax.f32 %v4175_v52, 0.0 }
 0x469   :  { %v4181_v56 = vpack.c.bf16 %v4180_v53, %v4180_v53 }
 0x46b   :  { %9622 = vmatmul.mubr.bf16.vlgmr.msra.gmra.mrb[12].mxu0 %v4181_v56 }
 0x46c   :  { %4674 = vmatprep.mubr.bf16.mxu0 %v11505_v33  ;;  %4643 = vmatpush1.bf16.msra.mxu0 %v10517_v4  ;;  %v10580_v4 = vld [vmem:[#allocation13 + $0x168] ss:$60 sps:$4 sm:$0xff]  }
 0x46d   :  { %4644 = vmatprep.subr.bf16.mxu0 %v10525_v6  ;;  %v10588_v6 = vld [vmem:[#allocation13 + $0x1e4] ss:$60 sps:$4 sm:$0xff]  }
 0x470   :  { %4645 = vmatpush1.bf16.msra.mxu0 %v10523_v7  ;;  %v10591_v7 = vld [vmem:[#allocation13 + $0x1ec] ss:$60 sps:$4 sm:$0xff]  }
 0x471   :  { %4646 = vmatprep.subr.bf16.mxu0 %v10531_v11  ;;  %v10589_v11 = vld [vmem:[#allocation13 + $0x1e8] ss:$60 sps:$4 sm:$0xff]  }
 0x474   :  { %4647 = vmatpush1.bf16.msra.mxu0 %v10529_v12  ;;  %v10594_v12 = vld [vmem:[#allocation13 + $0x25c] ss:$60 sps:$4 sm:$0xff]  }
 0x475   :  { %4648 = vmatprep.subr.bf16.mxu0 %v10537_v13  ;;  %v10597_v13 = vld [vmem:[#allocation13 + $0x264] ss:$60 sps:$4 sm:$0xff]  }
 0x478   :  { %4649 = vmatpush1.bf16.msra.mxu0 %v10535_v14  ;;  %v10592_v14 = vld [vmem:[#allocation13 + $0x258] ss:$60 sps:$4 sm:$0xff]  }
 0x479   :  { %4650 = vmatprep.subr.bf16.mxu0 %v10543_v15  ;;  %v10595_v15 = vld [vmem:[#allocation13 + $0x260] ss:$60 sps:$4 sm:$0xff]  }
 0x47c   :  { %4651 = vmatpush1.bf16.msra.mxu0 %v10541_v16  ;;  %v10600_v16 = vld [vmem:[#allocation13 + $0x2d4] ss:$60 sps:$4 sm:$0xff]  }
 0x47d   :  { %4652 = vmatprep.subr.bf16.mxu0 %v10549_v17  ;;  %v10603_v17 = vld [vmem:[#allocation13 + $0x2dc] ss:$60 sps:$4 sm:$0xff]  }
 0x480   :  { %4653 = vmatpush1.bf16.msra.mxu0 %v10547_v19  ;;  %v10598_v19 = vld [vmem:[#allocation13 + $0x2d0] ss:$60 sps:$4 sm:$0xff]  }
 0x481   :  { %4654 = vmatprep.subr.bf16.mxu0 %v10555_v20  ;;  %v10601_v20 = vld [vmem:[#allocation13 + $0x2d8] ss:$60 sps:$4 sm:$0xff]  }
 0x484   :  { %4655 = vmatpush1.bf16.msra.mxu0 %v10553_v21  ;;  %v10606_v21 = vld [vmem:[#allocation13 + $0x34c] ss:$60 sps:$4 sm:$0xff]  }
 0x485   :  { %4656 = vmatprep.subr.bf16.mxu0 %v10561_v43  ;;  %v10636_v43 = vld [vmem:[#allocation13 + $0x5a4] ss:$60 sps:$4 sm:$0xff]  }
 0x488   :  { %4657 = vmatpush1.bf16.msra.mxu0 %v10559_v45  ;;  %v10634_v45 = vld [vmem:[#allocation13 + $0x5a0] ss:$60 sps:$4 sm:$0xff]  }
 0x489   :  { %7794 = vmatprep.subr.bf16.mxu0 %v10567_v47  ;;  %v10642_v47 = vld [vmem:[#allocation13 + $0x61c] ss:$60 sps:$4 sm:$0xff]  }
 0x53e   :  { %v4286_v59 = vpop.f32.mrb[12].mxu0 }
 0x53f   :  { %v4287_v60 = vadd.f32 %v8976_v58, %v4286_v59  ;;  %v9623_v55 = vpop.f32.mrb[13].mxu0  ;;  %v10570_v59 = vld [vmem:[#allocation13 + $0x7c] ss:$60 sps:$4 sm:$0xff]  }
 0x540   :  { %v4289_v61 = vpop.f32.mrb[14].mxu0  ;;  %v10568_v55 = vld [vmem:[#allocation13 + $0x78] ss:$60 sps:$4 sm:$0xff]  }
 0x541   :  { %4292 = vst [vmem:[%s11856_s10] sm:$0xff] %v4287_v60  ;;  %v9624_v63 = vpop.f32.mrb[15].mxu0  ;;  %v4293_v0 = vmul.f32 0.5, %v4287_v60  ;;  %v10571_v61 = vld [vmem:[#allocation13 + $0x80] ss:$60 sps:$4 sm:$0xff]  }
 0x542   :  { %v10579_v63 = vld [vmem:[#allocation13 + $0xfc] ss:$60 sps:$4 sm:$0xff]  }
 0x543   :  { %v4294_v1 = vmul.f32 1.442695, %v4293_v0  ;;  %v10574_v0 = vld [vmem:[#allocation13 + $0xf0] ss:$60 sps:$4 sm:$0xff]  }
 0x545   :  { %11274 = vpow2.f32 %v4294_v1  ;;  %v10577_v1 = vld [vmem:[#allocation13 + $0xf8] ss:$60 sps:$4 sm:$0xff]  }
 0x54f   :  { %v11275_v8 = vpop.eup %11274 }
 0x550   :  { %4298 = vrot.lane.b32.xlu0 %v11275_v8, %s11497_s14  ;;  %v10586_v8 = vld [vmem:[#allocation13 + $0x1e0] ss:$60 sps:$4 sm:$0xff]  }
 0x5c2   :  { %v4299_v24 = vpop.permute.xlu0 %4298 }
 0x5c3   :  { %v4301_v26 = vmul.f32 %v4299_v24, %v4296_v22  ;;  %v10609_v22 = vld [vmem:[#allocation13 + $0x354] ss:$60 sps:$4 sm:$0xff]   ;;  %v10604_v24 = vld [vmem:[#allocation13 + $0x348] ss:$60 sps:$4 sm:$0xff]  }
 0x5c5   :  { %v4302_v28 = vadd.f32 %v4301_v26, %v4287_v60  ;;  %v10573_v60 = vld [vmem:[#allocation13 + $0x84] ss:$60 sps:$4 sm:$0xff]   ;;  %v10607_v26 = vld [vmem:[#allocation13 + $0x350] ss:$60 sps:$4 sm:$0xff]  }
 0x5c7   :  { %v4303_v31 = vpack.c.bf16 %v4302_v28, %v4302_v28  ;;  %v10612_v28 = vld [vmem:[#allocation13 + $0x3c4] ss:$60 sps:$4 sm:$0xff]  }
 0x5c9   :  { %9634 = vmatmul.mubr.msk.bf16.vlgmr.msra.gmra.mrb[8].mxu1 %vm4342_vm1, %v4303_v31  ;;  %v10610_v31 = vld [vmem:[#allocation13 + $0x3c0] ss:$60 sps:$4 sm:$0xff]  }
 0x5ca   :  { %4602 = vmatpush1.bf16.msra.mxu1 %v10514_v29  ;;  %4633 = vmatprep.mubr.bf16.mxu1 %v11505_v33  ;;  %v10550_v33 = vld [vmem:[#allocation11 + $0xc0] ss:$16 sps:$4 sm:$0xff]   ;;  %v10615_v29 = vld [vmem:[#allocation13 + $0x3cc] ss:$60 sps:$4 sm:$0xff]  }
 0x5cb   :  { %4603 = vmatprep.subr.bf16.mxu1 %v10522_v32  ;;  %v10613_v32 = vld [vmem:[#allocation13 + $0x3c8] ss:$60 sps:$4 sm:$0xff]  }
 0x5ce   :  { %4604 = vmatpush1.bf16.msra.mxu1 %v10520_v34  ;;  %v10618_v34 = vld [vmem:[#allocation13 + $0x43c] ss:$60 sps:$4 sm:$0xff]  }
 0x5cf   :  { %4605 = vmatprep.subr.bf16.mxu1 %v10528_v25  ;;  %v10621_v25 = vld [vmem:[#allocation13 + $0x444] ss:$60 sps:$4 sm:$0xff]  }
 0x5d2   :  { %4606 = vmatpush1.bf16.msra.mxu1 %v10526_v35  ;;  %v10616_v35 = vld [vmem:[#allocation13 + $0x438] ss:$60 sps:$4 sm:$0xff]  }
 0x5d3   :  { %4607 = vmatprep.subr.bf16.mxu1 %v10534_v30  ;;  %v10619_v30 = vld [vmem:[#allocation13 + $0x440] ss:$60 sps:$4 sm:$0xff]  }
 0x5d6   :  { %4608 = vmatpush1.bf16.msra.mxu1 %v10532_v36  ;;  %v10624_v36 = vld [vmem:[#allocation13 + $0x4b4] ss:$60 sps:$4 sm:$0xff]  }
 0x5d7   :  { %4609 = vmatprep.subr.bf16.mxu1 %v10540_v37  ;;  %v10627_v37 = vld [vmem:[#allocation13 + $0x4bc] ss:$60 sps:$4 sm:$0xff]  }
 0x5da   :  { %4610 = vmatpush1.bf16.msra.mxu1 %v10538_v38  ;;  %v10622_v38 = vld [vmem:[#allocation13 + $0x4b0] ss:$60 sps:$4 sm:$0xff]  }
 0x5db   :  { %4611 = vmatprep.subr.bf16.mxu1 %v10546_v39  ;;  %v10625_v39 = vld [vmem:[#allocation13 + $0x4b8] ss:$60 sps:$4 sm:$0xff]  }
 0x5de   :  { %4612 = vmatpush1.bf16.msra.mxu1 %v10544_v40  ;;  %v10630_v40 = vld [vmem:[#allocation13 + $0x52c] ss:$60 sps:$4 sm:$0xff]  }
 0x5df   :  { %4613 = vmatprep.subr.bf16.mxu1 %v10552_v41  ;;  %v10633_v41 = vld [vmem:[#allocation13 + $0x534] ss:$60 sps:$4 sm:$0xff]  }
 0x5e2   :  { %4614 = vmatpush1.bf16.msra.mxu1 %v10550_v33  ;;  %v10628_v33 = vld [vmem:[#allocation13 + $0x528] ss:$60 sps:$4 sm:$0xff]  }
 0x5e3   :  { %4615 = vmatprep.subr.bf16.mxu1 %v10558_v42  ;;  %v10631_v42 = vld [vmem:[#allocation13 + $0x530] ss:$60 sps:$4 sm:$0xff]  }
 0x5e6   :  { %4616 = vmatpush1.bf16.msra.mxu1 %v10556_v44  ;;  %v10639_v44 = vld [vmem:[#allocation13 + $0x5ac] ss:$60 sps:$4 sm:$0xff]  }
 0x5e7   :  { %7712 = vmatprep.subr.bf16.mxu1 %v10564_v46  ;;  %v10637_v46 = vld [vmem:[#allocation13 + $0x5a8] ss:$60 sps:$4 sm:$0xff]  }
 0x69c   :  { %v4380_v49 = vpop.f32.mrb[8].mxu1 }
 0x69d   :  { %v4381_v50 = vadd.f32 %v8985_v48, %v4380_v49  ;;  %v9635_v51 = vpop.f32.mrb[9].mxu1  ;;  %v10645_v48 = vld [vmem:[#allocation13 + $0x624] ss:$60 sps:$4 sm:$0xff]   ;;  %v10640_v49 = vld [vmem:[#allocation13 + $0x618] ss:$60 sps:$4 sm:$0xff]  }
 0x69e   :  { %v4383_v52 = vpop.f32.mrb[10].mxu1  ;;  %v10648_v51 = vld [vmem:[#allocation13 + $0x694] ss:$60 sps:$4 sm:$0xff]  }
 0x69f   :  { %v4386_v53 = vmax.f32 %v4381_v50, 0.0  ;;  %v9636_v56 = vpop.f32.mrb[11].mxu1  ;;  %v10643_v50 = vld [vmem:[#allocation13 + $0x620] ss:$60 sps:$4 sm:$0xff]  }
 0x6a0   :  { %v10651_v52 = vld [vmem:[#allocation13 + $0x69c] ss:$60 sps:$4 sm:$0xff]  }
 0x6a1   :  { %v4387_v58 = vpack.c.bf16 %v4386_v53, %v4386_v53  ;;  %v10646_v53 = vld [vmem:[#allocation13 + $0x690] ss:$60 sps:$4 sm:$0xff]   ;;  %v10649_v56 = vld [vmem:[#allocation13 + $0x698] ss:$60 sps:$4 sm:$0xff]  }
 0x6a3   :  { %4634 = vmatmul.mubr.bf16.vlgmr.msra.gmra.mrb[12].mxu1 %v4387_v58  ;;  %4675 = vmatmul.mubr.bf16.vlgmr.msra.gmra.mrb[16].mxu0 %v4387_v58  ;;  %v10652_v58 = vld [vmem:[#allocation13 + $0x708] ss:$60 sps:$4 sm:$0xff]  }
 0x6a4   :  { %7713 = vmatpush1.bf16.msra.mxu1 %v10562_v57  ;;  %7795 = vmatpush1.bf16.msra.mxu0 %v10565_v54  ;;  %v10654_v57 = vld [vmem:[#allocation13 + $0x70c] ss:$60 sps:$4 sm:$0xff]   ;;  %v10657_v54 = vld [vmem:[#allocation13 + $0x714] ss:$60 sps:$4 sm:$0xff]  }
 0x6a5   :  { %7714 = vmatprep.subr.bf16.mxu1 %v10570_v59  ;;  %7796 = vmatprep.subr.bf16.mxu0 %v10573_v60  ;;  %v10655_v59 = vld [vmem:[#allocation13 + $0x710] ss:$60 sps:$4 sm:$0xff]   ;;  %v10660_v60 = vld [vmem:[#allocation13 + $0x784] ss:$60 sps:$4 sm:$0xff]  }
 0x6a8   :  { %7715 = vmatpush1.bf16.msra.mxu1 %v10568_v55  ;;  %7797 = vmatpush1.bf16.msra.mxu0 %v10571_v61  ;;  %v10663_v55 = vld [vmem:[#allocation13 + $0x78c] ss:$60 sps:$4 sm:$0xff]  }
 0x6a9   :  { %7716 = vmatprep.subr.bf16.mxu1 %v10576_v62  ;;  %7798 = vmatprep.subr.bf16.mxu0 %v10579_v63  ;;  %v11747_v61 = vld [vmem:[#allocation2 + $0xb] sm:$0xf] }
 0x6aa   :  { %v4424_v62 = vrot.slane %v11747_v61, %v11713_v23  ;;  %v4428_v63 = vrot.slane %v11747_v61, %v11718_v27 }
 0x6ac   :  { %7717 = vmatpush1.bf16.msra.mxu1 %v10574_v0  ;;  %7799 = vmatpush1.bf16.msra.mxu0 %v10577_v1  ;;  %v4436_v0 = vrot.slane %v11747_v61, %v11730_v10 }
 0x6ad   :  { %7718 = vmatprep.subr.bf16.mxu1 %v10582_v2  ;;  %7800 = vmatprep.subr.bf16.mxu0 %v10585_v3 }
 0x6b0   :  { %7719 = vmatpush1.bf16.msra.mxu1 %v10580_v4  ;;  %7801 = vmatpush1.bf16.msra.mxu0 %v10583_v5 }
 0x6b1   :  { %7720 = vmatprep.subr.bf16.mxu1 %v10588_v6  ;;  %7802 = vmatprep.subr.bf16.mxu0 %v10591_v7 }
 0x6b4   :  { %7721 = vmatpush1.bf16.msra.mxu1 %v10586_v8  ;;  %7803 = vmatpush1.bf16.msra.mxu0 %v10589_v11 }
 0x6b5   :  { %7722 = vmatprep.subr.bf16.mxu1 %v10594_v12  ;;  %7804 = vmatprep.subr.bf16.mxu0 %v10597_v13 }
 0x6b8   :  { %7723 = vmatpush1.bf16.msra.mxu1 %v10592_v14  ;;  %7805 = vmatpush1.bf16.msra.mxu0 %v10595_v15 }
 0x6b9   :  { %7724 = vmatprep.subr.bf16.mxu1 %v10600_v16  ;;  %7806 = vmatprep.subr.bf16.mxu0 %v10603_v17 }
 0x6bc   :  { %7725 = vmatpush1.bf16.msra.mxu1 %v10598_v19  ;;  %7807 = vmatpush1.bf16.msra.mxu0 %v10601_v20  ;;  %v10658_v19 = vld [vmem:[#allocation13 + $0x780] ss:$60 sps:$4 sm:$0xff]   ;;  %v10661_v20 = vld [vmem:[#allocation13 + $0x788] ss:$60 sps:$4 sm:$0xff]  }
 0x6bd   :  { %7726 = vmatprep.subr.bf16.mxu1 %v10606_v21  ;;  %7808 = vmatprep.subr.bf16.mxu0 %v10609_v22  ;;  %v10666_v22 = vld [vmem:[#allocation13 + $0x7fc] ss:$60 sps:$4 sm:$0xff]  }
 0x6c0   :  { %7727 = vmatpush1.bf16.msra.mxu1 %v10604_v24  ;;  %7809 = vmatpush1.bf16.msra.mxu0 %v10607_v26  ;;  %v10669_v24 = vld [vmem:[#allocation13 + $0x804] ss:$60 sps:$4 sm:$0xff]  }
 0x6c1   :  { %7728 = vmatprep.subr.bf16.mxu1 %v10612_v28  ;;  %7810 = vmatprep.subr.bf16.mxu0 %v10615_v29  ;;  %v10664_v28 = vld [vmem:[#allocation13 + $0x7f8] ss:$60 sps:$4 sm:$0xff]   ;;  %v10667_v29 = vld [vmem:[#allocation13 + $0x800] ss:$60 sps:$4 sm:$0xff]  }
 0x6c4   :  { %7729 = vmatpush1.bf16.msra.mxu1 %v10610_v31  ;;  %7811 = vmatpush1.bf16.msra.mxu0 %v10613_v32  ;;  %v10672_v31 = vld [vmem:[#allocation13 + $0x874] ss:$60 sps:$4 sm:$0xff]   ;;  %v10675_v32 = vld [vmem:[#allocation13 + $0x87c] ss:$60 sps:$4 sm:$0xff]  }
 0x6c5   :  { %7730 = vmatprep.subr.bf16.mxu1 %v10618_v34  ;;  %7812 = vmatprep.subr.bf16.mxu0 %v10621_v25  ;;  %v10670_v34 = vld [vmem:[#allocation13 + $0x870] ss:$60 sps:$4 sm:$0xff]   ;;  %v10673_v25 = vld [vmem:[#allocation13 + $0x878] ss:$60 sps:$4 sm:$0xff]  }
 0x6c8   :  { %7731 = vmatpush1.bf16.msra.mxu1 %v10616_v35  ;;  %7813 = vmatpush1.bf16.msra.mxu0 %v10619_v30  ;;  %v10678_v35 = vld [vmem:[#allocation13 + $0x8ec] ss:$60 sps:$4 sm:$0xff]   ;;  %v10681_v30 = vld [vmem:[#allocation13 + $0x8f4] ss:$60 sps:$4 sm:$0xff]  }
 0x6c9   :  { %7732 = vmatprep.subr.bf16.mxu1 %v10624_v36  ;;  %7814 = vmatprep.subr.bf16.mxu0 %v10627_v37  ;;  %v10676_v36 = vld [vmem:[#allocation13 + $0x8e8] ss:$60 sps:$4 sm:$0xff]   ;;  %v10679_v37 = vld [vmem:[#allocation13 + $0x8f0] ss:$60 sps:$4 sm:$0xff]  }
 0x6cc   :  { %7733 = vmatpush1.bf16.msra.mxu1 %v10622_v38  ;;  %7815 = vmatpush1.bf16.msra.mxu0 %v10625_v39  ;;  %v10684_v38 = vld [vmem:[#allocation13 + $0x964] ss:$60 sps:$4 sm:$0xff]   ;;  %v10687_v39 = vld [vmem:[#allocation13 + $0x96c] ss:$60 sps:$4 sm:$0xff]  }
 0x6cd   :  { %7734 = vmatprep.subr.bf16.mxu1 %v10630_v40  ;;  %7816 = vmatprep.subr.bf16.mxu0 %v10633_v41  ;;  %v10682_v40 = vld [vmem:[#allocation13 + $0x960] ss:$60 sps:$4 sm:$0xff]   ;;  %v10685_v41 = vld [vmem:[#allocation13 + $0x968] ss:$60 sps:$4 sm:$0xff]  }
 0x6d0   :  { %7735 = vmatpush1.bf16.msra.mxu1 %v10628_v33  ;;  %7817 = vmatpush1.bf16.msra.mxu0 %v10631_v42  ;;  %v10690_v33 = vld [vmem:[#allocation13 + $0x9dc] ss:$60 sps:$4 sm:$0xff]   ;;  %v10693_v42 = vld [vmem:[#allocation13 + $0x9e4] ss:$60 sps:$4 sm:$0xff]  }
 0x6d1   :  { %7736 = vmatprep.subr.bf16.mxu1 %v10636_v43  ;;  %7818 = vmatprep.subr.bf16.mxu0 %v10639_v44  ;;  %v10688_v43 = vld [vmem:[#allocation13 + $0x9d8] ss:$60 sps:$4 sm:$0xff]   ;;  %v10691_v44 = vld [vmem:[#allocation13 + $0x9e0] ss:$60 sps:$4 sm:$0xff]  }
 0x6d4   :  { %7737 = vmatpush1.bf16.msra.mxu1 %v10634_v45  ;;  %7819 = vmatpush1.bf16.msra.mxu0 %v10637_v46  ;;  %v10696_v45 = vld [vmem:[#allocation13 + $0xa54] ss:$60 sps:$4 sm:$0xff]   ;;  %v10699_v46 = vld [vmem:[#allocation13 + $0xa5c] ss:$60 sps:$4 sm:$0xff]  }
 0x6d5   :  { %7738 = vmatprep.subr.bf16.mxu1 %v10642_v47  ;;  %7820 = vmatprep.subr.bf16.mxu0 %v10645_v48  ;;  %v10694_v47 = vld [vmem:[#allocation13 + $0xa50] ss:$60 sps:$4 sm:$0xff]   ;;  %v10697_v48 = vld [vmem:[#allocation13 + $0xa58] ss:$60 sps:$4 sm:$0xff]  }
 0x6d8   :  { %7739 = vmatpush1.bf16.msra.mxu1 %v10640_v49  ;;  %7821 = vmatpush1.bf16.msra.mxu0 %v10643_v50  ;;  %v10702_v49 = vld [vmem:[#allocation13 + $0xacc] ss:$60 sps:$4 sm:$0xff]   ;;  %v10705_v50 = vld [vmem:[#allocation13 + $0xad4] ss:$60 sps:$4 sm:$0xff]  }
 0x6d9   :  { %7740 = vmatprep.subr.bf16.mxu1 %v10648_v51  ;;  %7822 = vmatprep.subr.bf16.mxu0 %v10651_v52  ;;  %v10700_v51 = vld [vmem:[#allocation13 + $0xac8] ss:$60 sps:$4 sm:$0xff]   ;;  %v10703_v52 = vld [vmem:[#allocation13 + $0xad0] ss:$60 sps:$4 sm:$0xff]  }
 0x6dc   :  { %7741 = vmatpush1.bf16.msra.mxu1 %v10646_v53  ;;  %7823 = vmatpush1.bf16.msra.mxu0 %v10649_v56  ;;  %v10708_v53 = vld [vmem:[#allocation13 + $0xb44] ss:$60 sps:$4 sm:$0xff]   ;;  %v10711_v56 = vld [vmem:[#allocation13 + $0xb4c] ss:$60 sps:$4 sm:$0xff]  }
 0x6dd   :  { %7742 = vmatprep.subr.bf16.mxu1 %v10654_v57  ;;  %7824 = vmatprep.subr.bf16.mxu0 %v10657_v54  ;;  %v10706_v57 = vld [vmem:[#allocation13 + $0xb40] ss:$60 sps:$4 sm:$0xff]   ;;  %v10709_v54 = vld [vmem:[#allocation13 + $0xb48] ss:$60 sps:$4 sm:$0xff]  }
 0x6e0   :  { %7743 = vmatpush1.bf16.msra.mxu1 %v10652_v58  ;;  %7825 = vmatpush1.bf16.msra.mxu0 %v10655_v59  ;;  %v10714_v58 = vld [vmem:[#allocation13 + $0xbbc] ss:$60 sps:$4 sm:$0xff]   ;;  %v10717_v59 = vld [vmem:[#allocation13 + $0xbc4] ss:$60 sps:$4 sm:$0xff]  }
 0x6e1   :  { %7753 = vmatprep.subr.bf16.mxu1 %v10660_v60  ;;  %7835 = vmatprep.subr.bf16.mxu0 %v10663_v55  ;;  %v10712_v60 = vld [vmem:[#allocation13 + $0xbb8] ss:$60 sps:$4 sm:$0xff]   ;;  %v10715_v55 = vld [vmem:[#allocation13 + $0xbc0] ss:$60 sps:$4 sm:$0xff]  }
 0x776   :  { %v4635_v1 = vpop.f32.mrb[12].mxu1  ;;  %v11755_v2 = vpop.f32.mrb[16].mxu0 }
 0x777   :  { %v4636_v3 = vadd.f32 %v4635_v1, %v4424_v62  ;;  %v4637_v4 = vpop.f32.mrb[13].mxu1  ;;  %v4678_v5 = vpop.f32.mrb[17].mxu0  ;;  %v10720_v62 = vld [vmem:[#allocation13 + $0xc34] ss:$60 sps:$4 sm:$0xff]  }
 0x778   :  { %v4638_v6 = vadd.f32 %v4637_v4, %v4428_v63  ;;  %v4679_v7 = vadd.f32 %v4678_v5, %v4436_v0  ;;  %v4639_v8 = vpop.f32.mrb[14].mxu1  ;;  %v4680_v11 = vpop.f32.mrb[18].mxu0  ;;  %v10723_v63 = vld [vmem:[#allocation13 + $0xc3c] ss:$60 sps:$4 sm:$0xff]   ;;  %v10718_v0 = vld [vmem:[#allocation13 + $0xc30] ss:$60 sps:$4 sm:$0xff]  }
 0x779   :  { %v4683_v12 = vmax.f32 %v4636_v3, 0.0  ;;  %v4640_v13 = vpop.f32.mrb[15].mxu1  ;;  %v4681_v14 = vpop.f32.mrb[19].mxu0  ;;  %v10721_v1 = vld [vmem:[#allocation13 + $0xc38] ss:$60 sps:$4 sm:$0xff]  }
 0x77a   :  { %v4684_v15 = vmax.f32 %v4638_v6, 0.0  ;;  %v4686_v16 = vmax.f32 %v4679_v7, 0.0  ;;  %v10726_v3 = vld [vmem:[#allocation13 + $0xcac] ss:$60 sps:$4 sm:$0xff]   ;;  %v10729_v4 = vld [vmem:[#allocation13 + $0xcb4] ss:$60 sps:$4 sm:$0xff]  }
 0x77b   :  { %v11759_v21 = vpack.c.bf16 %v4683_v12, %v4683_v12  ;;  %v10724_v5 = vld [vmem:[#allocation13 + $0xca8] ss:$60 sps:$4 sm:$0xff]   ;;  %v10727_v6 = vld [vmem:[#allocation13 + $0xcb0] ss:$60 sps:$4 sm:$0xff]   ;;  %v10730_v11 = vld [vmem:[#allocation13 + $0xd20] ss:$60 sps:$4 sm:$0xff]  }
 0x77c   :  { %v11757_v17 = vpack.c.bf16 %v4684_v15, %v4684_v15  ;;  %v11763_v26 = vpack.c.bf16 %v4686_v16, %v4686_v16  ;;  %v10732_v7 = vld [vmem:[#allocation13 + $0xd24] ss:$60 sps:$4 sm:$0xff]   ;;  %v10735_v8 = vld [vmem:[#allocation13 + $0xd2c] ss:$60 sps:$4 sm:$0xff]   ;;  %v10738_v13 = vld [vmem:[#allocation13 + $0xd9c] ss:$60 sps:$4 sm:$0xff]  }
 0x77d   :  { %v10733_v12 = vld [vmem:[#allocation13 + $0xd28] ss:$60 sps:$4 sm:$0xff]   ;;  %v10736_v15 = vld [vmem:[#allocation13 + $0xd98] ss:$60 sps:$4 sm:$0xff]   ;;  %v10739_v16 = vld [vmem:[#allocation13 + $0xda0] ss:$60 sps:$4 sm:$0xff]  }
 0x77e   :  { %7744 = vmatprep.mubr.bf16.mxu1 %v11757_v17  ;;  %7826 = vmatprep.mubr.bf16.mxu0 %v11757_v17  ;;  %v10741_v14 = vld [vmem:[#allocation13 + $0xda4] ss:$60 sps:$4 sm:$0xff]  }
 0x77f   :  { %7745 = vmatmul.mubr.bf16.vlgmr.msra.gmra.mrb[16].mxu1 %v11759_v21  ;;  %7827 = vmatmul.mubr.bf16.vlgmr.msra.gmra.mrb[20].mxu0 %v11759_v21 }
 0x780   :  { %7754 = vmatpush1.bf16.msra.mxu1 %v10658_v19  ;;  %7836 = vmatpush1.bf16.msra.mxu0 %v10661_v20  ;;  %v4432_v19 = vrot.slane %v11747_v61, %v11727_v9  ;;  %v10744_v20 = vld [vmem:[#allocation13 + $0xe14] ss:$60 sps:$4 sm:$0xff]  }
 0x781   :  { %7785 = vmatprep.mubr.bf16.mxu1 %v11763_v26  ;;  %7867 = vmatprep.mubr.bf16.mxu0 %v11763_v26  ;;  %v10756_v61 = vld [vmem:[#allocation13 + $0x14] ss:$60 sps:$4 sm:$0xff]  }
 0x782   :  { %7755 = vmatprep.subr.bf16.mxu1 %v10666_v22  ;;  %7837 = vmatprep.subr.bf16.mxu0 %v10669_v24  ;;  %v10747_v22 = vld [vmem:[#allocation13 + $0xe1c] ss:$60 sps:$4 sm:$0xff]   ;;  %v10742_v24 = vld [vmem:[#allocation13 + $0xe10] ss:$60 sps:$4 sm:$0xff]  }
 0x784   :  { %7756 = vmatpush1.bf16.msra.mxu1 %v10664_v28  ;;  %7838 = vmatpush1.bf16.msra.mxu0 %v10667_v29  ;;  %v10745_v28 = vld [vmem:[#allocation13 + $0xe18] ss:$60 sps:$4 sm:$0xff]   ;;  %v4677_v29 = vadd.f32 %v11755_v2, %v4432_v19 }
 0x785   :  { %7757 = vmatprep.subr.bf16.mxu1 %v10672_v31  ;;  %7839 = vmatprep.subr.bf16.mxu0 %v10675_v32  ;;  %v10750_v31 = vld [vmem:[#allocation13 + $0xe8c] ss:$60 sps:$4 sm:$0xff]   ;;  %v10753_v32 = vld [vmem:[#allocation13 + $0xe94] ss:$60 sps:$4 sm:$0xff]   ;;  %v10822_v19 = vld [vmem:[#allocation13 + $0x53c] ss:$60 sps:$4 sm:$0xff]  }
 0x786   :  { %v10757_v2 = vld [vmem:[#allocation13 + $0x18] ss:$60 sps:$4 sm:$0xff]  }
 0x788   :  { %7758 = vmatpush1.bf16.msra.mxu1 %v10670_v34  ;;  %7840 = vmatpush1.bf16.msra.mxu0 %v10673_v25  ;;  %v10748_v34 = vld [vmem:[#allocation13 + $0xe88] ss:$60 sps:$4 sm:$0xff]   ;;  %v10751_v25 = vld [vmem:[#allocation13 + $0xe90] ss:$60 sps:$4 sm:$0xff]  }
 0x789   :  { %7759 = vmatprep.subr.bf16.mxu1 %v10678_v35  ;;  %7841 = vmatprep.subr.bf16.mxu0 %v10681_v30  ;;  %v4685_v35 = vmax.f32 %v4677_v29, 0.0  ;;  %v10759_v30 = vld [vmem:[#allocation13 + $0x1c] ss:$60 sps:$4 sm:$0xff]  }
 0x78a   :  { %v10831_v29 = vld [vmem:[#allocation13 + $0x5bc] ss:$60 sps:$4 sm:$0xff]  }
 0x78c   :  { %7760 = vmatpush1.bf16.msra.mxu1 %v10676_v36  ;;  %7842 = vmatpush1.bf16.msra.mxu0 %v10679_v37  ;;  %v10754_v36 = vld [vmem:[#allocation13 + $0x10] ss:$60 sps:$4 sm:$0xff]   ;;  %v11772_v37 = vpack.c.bf16 %v4685_v35, %v4685_v35  ;;  %v10832_v35 = vld [vmem:[#allocation13 + $0x628] ss:$60 sps:$4 sm:$0xff]  }
 0x78d   :  { %7761 = vmatprep.subr.bf16.mxu1 %v10684_v38  ;;  %7843 = vmatprep.subr.bf16.mxu0 %v10687_v39  ;;  %v10762_v38 = vld [vmem:[#allocation13 + $0x8c] ss:$60 sps:$4 sm:$0xff]   ;;  %v10765_v39 = vld [vmem:[#allocation13 + $0x94] ss:$60 sps:$4 sm:$0xff]  }
 0x790   :  { %7762 = vmatpush1.bf16.msra.mxu1 %v10682_v40  ;;  %7844 = vmatpush1.bf16.msra.mxu0 %v10685_v41  ;;  %v10760_v40 = vld [vmem:[#allocation13 + $0x88] ss:$60 sps:$4 sm:$0xff]   ;;  %v10763_v41 = vld [vmem:[#allocation13 + $0x90] ss:$60 sps:$4 sm:$0xff]  }
 0x791   :  { %7763 = vmatprep.subr.bf16.mxu1 %v10690_v33  ;;  %7845 = vmatprep.subr.bf16.mxu0 %v10693_v42  ;;  %v10768_v33 = vld [vmem:[#allocation13 + $0x104] ss:$60 sps:$4 sm:$0xff]   ;;  %v10771_v42 = vld [vmem:[#allocation13 + $0x10c] ss:$60 sps:$4 sm:$0xff]  }
 0x794   :  { %7764 = vmatpush1.bf16.msra.mxu1 %v10688_v43  ;;  %7846 = vmatpush1.bf16.msra.mxu0 %v10691_v44  ;;  %v10766_v43 = vld [vmem:[#allocation13 + $0x100] ss:$60 sps:$4 sm:$0xff]   ;;  %v10769_v44 = vld [vmem:[#allocation13 + $0x108] ss:$60 sps:$4 sm:$0xff]  }
 0x795   :  { %7765 = vmatprep.subr.bf16.mxu1 %v10696_v45  ;;  %7847 = vmatprep.subr.bf16.mxu0 %v10699_v46  ;;  %v10774_v45 = vld [vmem:[#allocation13 + $0x17c] ss:$60 sps:$4 sm:$0xff]   ;;  %v10777_v46 = vld [vmem:[#allocation13 + $0x184] ss:$60 sps:$4 sm:$0xff]  }
 0x798   :  { %7766 = vmatpush1.bf16.msra.mxu1 %v10694_v47  ;;  %7848 = vmatpush1.bf16.msra.mxu0 %v10697_v48  ;;  %v10772_v47 = vld [vmem:[#allocation13 + $0x178] ss:$60 sps:$4 sm:$0xff]   ;;  %v10775_v48 = vld [vmem:[#allocation13 + $0x180] ss:$60 sps:$4 sm:$0xff]  }
 0x799   :  { %7767 = vmatprep.subr.bf16.mxu1 %v10702_v49  ;;  %7849 = vmatprep.subr.bf16.mxu0 %v10705_v50  ;;  %v10780_v49 = vld [vmem:[#allocation13 + $0x1f4] ss:$60 sps:$4 sm:$0xff]   ;;  %v10783_v50 = vld [vmem:[#allocation13 + $0x1fc] ss:$60 sps:$4 sm:$0xff]  }
 0x79c   :  { %7768 = vmatpush1.bf16.msra.mxu1 %v10700_v51  ;;  %7850 = vmatpush1.bf16.msra.mxu0 %v10703_v52  ;;  %v10778_v51 = vld [vmem:[#allocation13 + $0x1f0] ss:$60 sps:$4 sm:$0xff]   ;;  %v10781_v52 = vld [vmem:[#allocation13 + $0x1f8] ss:$60 sps:$4 sm:$0xff]  }
 0x79d   :  { %7769 = vmatprep.subr.bf16.mxu1 %v10708_v53  ;;  %7851 = vmatprep.subr.bf16.mxu0 %v10711_v56  ;;  %v10786_v53 = vld [vmem:[#allocation13 + $0x26c] ss:$60 sps:$4 sm:$0xff]   ;;  %v10789_v56 = vld [vmem:[#allocation13 + $0x274] ss:$60 sps:$4 sm:$0xff]  }
 0x7a0   :  { %7770 = vmatpush1.bf16.msra.mxu1 %v10706_v57  ;;  %7852 = vmatpush1.bf16.msra.mxu0 %v10709_v54  ;;  %v10784_v57 = vld [vmem:[#allocation13 + $0x268] ss:$60 sps:$4 sm:$0xff]   ;;  %v10787_v54 = vld [vmem:[#allocation13 + $0x270] ss:$60 sps:$4 sm:$0xff]  }
 0x7a1   :  { %7771 = vmatprep.subr.bf16.mxu1 %v10714_v58  ;;  %7853 = vmatprep.subr.bf16.mxu0 %v10717_v59  ;;  %v10792_v58 = vld [vmem:[#allocation13 + $0x2e4] ss:$60 sps:$4 sm:$0xff]   ;;  %v10795_v59 = vld [vmem:[#allocation13 + $0x2ec] ss:$60 sps:$4 sm:$0xff]  }
 0x7a4   :  { %7772 = vmatpush1.bf16.msra.mxu1 %v10712_v60  ;;  %7854 = vmatpush1.bf16.msra.mxu0 %v10715_v55  ;;  %v10790_v60 = vld [vmem:[#allocation13 + $0x2e0] ss:$60 sps:$4 sm:$0xff]   ;;  %v10793_v55 = vld [vmem:[#allocation13 + $0x2e8] ss:$60 sps:$4 sm:$0xff]  }
 0x7a5   :  { %7773 = vmatprep.subr.bf16.mxu1 %v10720_v62  ;;  %7855 = vmatprep.subr.bf16.mxu0 %v10723_v63  ;;  %v10798_v62 = vld [vmem:[#allocation13 + $0x35c] ss:$60 sps:$4 sm:$0xff]   ;;  %v10801_v63 = vld [vmem:[#allocation13 + $0x364] ss:$60 sps:$4 sm:$0xff]  }
 0x7a8   :  { %7774 = vmatpush1.bf16.msra.mxu1 %v10718_v0  ;;  %7856 = vmatpush1.bf16.msra.mxu0 %v10721_v1  ;;  %v10796_v0 = vld [vmem:[#allocation13 + $0x358] ss:$60 sps:$4 sm:$0xff]   ;;  %v10799_v1 = vld [vmem:[#allocation13 + $0x360] ss:$60 sps:$4 sm:$0xff]  }
 0x7a9   :  { %7775 = vmatprep.subr.bf16.mxu1 %v10726_v3  ;;  %7857 = vmatprep.subr.bf16.mxu0 %v10729_v4  ;;  %v10804_v3 = vld [vmem:[#allocation13 + $0x3d4] ss:$60 sps:$4 sm:$0xff]   ;;  %v10807_v4 = vld [vmem:[#allocation13 + $0x3dc] ss:$60 sps:$4 sm:$0xff]  }
 0x7ac   :  { %7776 = vmatpush1.bf16.msra.mxu1 %v10724_v5  ;;  %7858 = vmatpush1.bf16.msra.mxu0 %v10727_v6  ;;  %v10802_v5 = vld [vmem:[#allocation13 + $0x3d0] ss:$60 sps:$4 sm:$0xff]   ;;  %v10805_v6 = vld [vmem:[#allocation13 + $0x3d8] ss:$60 sps:$4 sm:$0xff]  }
 0x7ad   :  { %7777 = vmatprep.subr.bf16.mxu1 %v10732_v7  ;;  %7859 = vmatprep.subr.bf16.mxu0 %v10735_v8  ;;  %v10810_v7 = vld [vmem:[#allocation13 + $0x44c] ss:$60 sps:$4 sm:$0xff]   ;;  %v10813_v8 = vld [vmem:[#allocation13 + $0x454] ss:$60 sps:$4 sm:$0xff]  }
 0x7b0   :  { %7778 = vmatpush1.bf16.msra.mxu1 %v10730_v11  ;;  %7860 = vmatpush1.bf16.msra.mxu0 %v10733_v12  ;;  %v10808_v11 = vld [vmem:[#allocation13 + $0x448] ss:$60 sps:$4 sm:$0xff]   ;;  %v10811_v12 = vld [vmem:[#allocation13 + $0x450] ss:$60 sps:$4 sm:$0xff]  }
 0x7b1   :  { %7779 = vmatprep.subr.bf16.mxu1 %v10738_v13  ;;  %7861 = vmatprep.subr.bf16.mxu0 %v10741_v14  ;;  %v10816_v13 = vld [vmem:[#allocation13 + $0x4c4] ss:$60 sps:$4 sm:$0xff]   ;;  %v10819_v14 = vld [vmem:[#allocation13 + $0x4cc] ss:$60 sps:$4 sm:$0xff]  }
 0x7b4   :  { %7780 = vmatpush1.bf16.msra.mxu1 %v10736_v15  ;;  %7862 = vmatpush1.bf16.msra.mxu0 %v10739_v16  ;;  %v10814_v15 = vld [vmem:[#allocation13 + $0x4c0] ss:$60 sps:$4 sm:$0xff]   ;;  %v10817_v16 = vld [vmem:[#allocation13 + $0x4c8] ss:$60 sps:$4 sm:$0xff]  }
 0x7b5   :  { %7781 = vmatprep.subr.bf16.mxu1 %v10744_v20  ;;  %7863 = vmatprep.subr.bf16.mxu0 %v10747_v22  ;;  %v10825_v20 = vld [vmem:[#allocation13 + $0x544] ss:$60 sps:$4 sm:$0xff]   ;;  %v10820_v22 = vld [vmem:[#allocation13 + $0x538] ss:$60 sps:$4 sm:$0xff]  }
 0x7b8   :  { %7782 = vmatpush1.bf16.msra.mxu1 %v10742_v24  ;;  %7864 = vmatpush1.bf16.msra.mxu0 %v10745_v28  ;;  %v10823_v24 = vld [vmem:[#allocation13 + $0x540] ss:$60 sps:$4 sm:$0xff]   ;;  %v10828_v28 = vld [vmem:[#allocation13 + $0x5b4] ss:$60 sps:$4 sm:$0xff]  }
 0x7b9   :  { %7783 = vmatprep.subr.bf16.mxu1 %v10750_v31  ;;  %7865 = vmatprep.subr.bf16.mxu0 %v10753_v32  ;;  %v10826_v31 = vld [vmem:[#allocation13 + $0x5b0] ss:$60 sps:$4 sm:$0xff]   ;;  %v10829_v32 = vld [vmem:[#allocation13 + $0x5b8] ss:$60 sps:$4 sm:$0xff]  }
 0x7bc   :  { %7784 = vmatpush1.bf16.msra.mxu1 %v10748_v34  ;;  %7866 = vmatpush1.bf16.msra.mxu0 %v10751_v25  ;;  %v10834_v34 = vld [vmem:[#allocation13 + $0x62c] ss:$60 sps:$4 sm:$0xff]   ;;  %v10837_v25 = vld [vmem:[#allocation13 + $0x634] ss:$60 sps:$4 sm:$0xff]  }
 0x7bd   :  { %7876 = vmatprep.subr.bf16.mxu1 %v10756_v61  ;;  %7958 = vmatprep.subr.bf16.mxu0 %v10759_v30  ;;  %v10835_v61 = vld [vmem:[#allocation13 + $0x630] ss:$60 sps:$4 sm:$0xff]   ;;  %v10840_v30 = vld [vmem:[#allocation13 + $0x6a4] ss:$60 sps:$4 sm:$0xff]  }
 0x7bf   :  { %7786 = vmatmul.mubr.bf16.vlgmr.msra.gmra.mrb[16].mxu1 %v11772_v37  ;;  %7868 = vmatmul.mubr.bf16.vlgmr.msra.gmra.mrb[20].mxu0 %v11772_v37 }
 0x7c0   :  { %7877 = vmatpush1.bf16.msra.mxu1 %v10754_v36  ;;  %7908 = vmatprep.mubr.bf16.mxu1 %v11757_v17  ;;  %v10843_v36 = vld [vmem:[#allocation13 + $0x6ac] ss:$60 sps:$4 sm:$0xff]  }
 0x7c1   :  { %7959 = vmatpush1.bf16.msra.mxu0 %v10757_v2  ;;  %7990 = vmatprep.mubr.bf16.mxu0 %v11757_v17  ;;  %v10838_v2 = vld [vmem:[#allocation13 + $0x6a0] ss:$60 sps:$4 sm:$0xff]  }
 0x7c2   :  { %7878 = vmatprep.subr.bf16.mxu1 %v10762_v38  ;;  %7960 = vmatprep.subr.bf16.mxu0 %v10765_v39  ;;  %v10841_v38 = vld [vmem:[#allocation13 + $0x6a8] ss:$60 sps:$4 sm:$0xff]   ;;  %v10846_v39 = vld [vmem:[#allocation13 + $0x71c] ss:$60 sps:$4 sm:$0xff]  }
 0x7c4   :  { %7879 = vmatpush1.bf16.msra.mxu1 %v10760_v40  ;;  %v10849_v40 = vld [vmem:[#allocation13 + $0x724] ss:$60 sps:$4 sm:$0xff]  }
 0x7c5   :  { %7961 = vmatpush1.bf16.msra.mxu0 %v10763_v41  ;;  %7880 = vmatprep.subr.bf16.mxu1 %v10768_v33  ;;  %v10844_v41 = vld [vmem:[#allocation13 + $0x718] ss:$60 sps:$4 sm:$0xff]   ;;  %v10847_v33 = vld [vmem:[#allocation13 + $0x720] ss:$60 sps:$4 sm:$0xff]  }
 0x7c6   :  { %7962 = vmatprep.subr.bf16.mxu0 %v10771_v42  ;;  %v10852_v42 = vld [vmem:[#allocation13 + $0x794] ss:$60 sps:$4 sm:$0xff]  }
 0x7c8   :  { %7881 = vmatpush1.bf16.msra.mxu1 %v10766_v43  ;;  %v10855_v43 = vld [vmem:[#allocation13 + $0x79c] ss:$60 sps:$4 sm:$0xff]  }
 0x7c9   :  { %7963 = vmatpush1.bf16.msra.mxu0 %v10769_v44  ;;  %7882 = vmatprep.subr.bf16.mxu1 %v10774_v45  ;;  %v10850_v44 = vld [vmem:[#allocation13 + $0x790] ss:$60 sps:$4 sm:$0xff]   ;;  %v10853_v45 = vld [vmem:[#allocation13 + $0x798] ss:$60 sps:$4 sm:$0xff]  }
 0x7ca   :  { %7964 = vmatprep.subr.bf16.mxu0 %v10777_v46  ;;  %v10858_v46 = vld [vmem:[#allocation13 + $0x80c] ss:$60 sps:$4 sm:$0xff]  }
 0x7cc   :  { %7883 = vmatpush1.bf16.msra.mxu1 %v10772_v47  ;;  %v10861_v47 = vld [vmem:[#allocation13 + $0x814] ss:$60 sps:$4 sm:$0xff]  }
 0x7cd   :  { %7965 = vmatpush1.bf16.msra.mxu0 %v10775_v48  ;;  %7884 = vmatprep.subr.bf16.mxu1 %v10780_v49  ;;  %v10856_v48 = vld [vmem:[#allocation13 + $0x808] ss:$60 sps:$4 sm:$0xff]   ;;  %v10859_v49 = vld [vmem:[#allocation13 + $0x810] ss:$60 sps:$4 sm:$0xff]  }
 0x7ce   :  { %7966 = vmatprep.subr.bf16.mxu0 %v10783_v50  ;;  %v10864_v50 = vld [vmem:[#allocation13 + $0x884] ss:$60 sps:$4 sm:$0xff]  }
 0x7d0   :  { %7885 = vmatpush1.bf16.msra.mxu1 %v10778_v51  ;;  %v10867_v51 = vld [vmem:[#allocation13 + $0x88c] ss:$60 sps:$4 sm:$0xff]  }
 0x7d1   :  { %7967 = vmatpush1.bf16.msra.mxu0 %v10781_v52  ;;  %7886 = vmatprep.subr.bf16.mxu1 %v10786_v53  ;;  %v10862_v52 = vld [vmem:[#allocation13 + $0x880] ss:$60 sps:$4 sm:$0xff]   ;;  %v10865_v53 = vld [vmem:[#allocation13 + $0x888] ss:$60 sps:$4 sm:$0xff]  }
 0x7d2   :  { %7968 = vmatprep.subr.bf16.mxu0 %v10789_v56  ;;  %v10870_v56 = vld [vmem:[#allocation13 + $0x8fc] ss:$60 sps:$4 sm:$0xff]  }
 0x7d4   :  { %7887 = vmatpush1.bf16.msra.mxu1 %v10784_v57  ;;  %v10873_v57 = vld [vmem:[#allocation13 + $0x904] ss:$60 sps:$4 sm:$0xff]  }
 0x7d5   :  { %7969 = vmatpush1.bf16.msra.mxu0 %v10787_v54  ;;  %7888 = vmatprep.subr.bf16.mxu1 %v10792_v58  ;;  %v10868_v54 = vld [vmem:[#allocation13 + $0x8f8] ss:$60 sps:$4 sm:$0xff]   ;;  %v10871_v58 = vld [vmem:[#allocation13 + $0x900] ss:$60 sps:$4 sm:$0xff]  }
 0x7d6   :  { %7970 = vmatprep.subr.bf16.mxu0 %v10795_v59  ;;  %v10876_v59 = vld [vmem:[#allocation13 + $0x974] ss:$60 sps:$4 sm:$0xff]  }
 0x7d8   :  { %7889 = vmatpush1.bf16.msra.mxu1 %v10790_v60  ;;  %v10879_v60 = vld [vmem:[#allocation13 + $0x97c] ss:$60 sps:$4 sm:$0xff]  }
 0x7d9   :  { %7971 = vmatpush1.bf16.msra.mxu0 %v10793_v55  ;;  %7890 = vmatprep.subr.bf16.mxu1 %v10798_v62  ;;  %v10874_v55 = vld [vmem:[#allocation13 + $0x970] ss:$60 sps:$4 sm:$0xff]   ;;  %v10877_v62 = vld [vmem:[#allocation13 + $0x978] ss:$60 sps:$4 sm:$0xff]  }
 0x7da   :  { %7972 = vmatprep.subr.bf16.mxu0 %v10801_v63  ;;  %v10882_v63 = vld [vmem:[#allocation13 + $0x9ec] ss:$60 sps:$4 sm:$0xff]  }
 0x7dc   :  { %7891 = vmatpush1.bf16.msra.mxu1 %v10796_v0  ;;  %v10885_v0 = vld [vmem:[#allocation13 + $0x9f4] ss:$60 sps:$4 sm:$0xff]  }
 0x7dd   :  { %7973 = vmatpush1.bf16.msra.mxu0 %v10799_v1  ;;  %7892 = vmatprep.subr.bf16.mxu1 %v10804_v3  ;;  %v10880_v1 = vld [vmem:[#allocation13 + $0x9e8] ss:$60 sps:$4 sm:$0xff]   ;;  %v10883_v3 = vld [vmem:[#allocation13 + $0x9f0] ss:$60 sps:$4 sm:$0xff]  }
 0x7de   :  { %7974 = vmatprep.subr.bf16.mxu0 %v10807_v4  ;;  %v10888_v4 = vld [vmem:[#allocation13 + $0xa64] ss:$60 sps:$4 sm:$0xff]  }
 0x7e0   :  { %7893 = vmatpush1.bf16.msra.mxu1 %v10802_v5  ;;  %v10891_v5 = vld [vmem:[#allocation13 + $0xa6c] ss:$60 sps:$4 sm:$0xff]  }
 0x7e1   :  { %7975 = vmatpush1.bf16.msra.mxu0 %v10805_v6  ;;  %7894 = vmatprep.subr.bf16.mxu1 %v10810_v7  ;;  %v10886_v6 = vld [vmem:[#allocation13 + $0xa60] ss:$60 sps:$4 sm:$0xff]   ;;  %v10889_v7 = vld [vmem:[#allocation13 + $0xa68] ss:$60 sps:$4 sm:$0xff]  }
 0x7e2   :  { %7976 = vmatprep.subr.bf16.mxu0 %v10813_v8  ;;  %v10894_v8 = vld [vmem:[#allocation13 + $0xadc] ss:$60 sps:$4 sm:$0xff]  }
 0x7e4   :  { %7895 = vmatpush1.bf16.msra.mxu1 %v10808_v11  ;;  %v10897_v11 = vld [vmem:[#allocation13 + $0xae4] ss:$60 sps:$4 sm:$0xff]  }
 0x7e5   :  { %7977 = vmatpush1.bf16.msra.mxu0 %v10811_v12  ;;  %7896 = vmatprep.subr.bf16.mxu1 %v10816_v13  ;;  %v10892_v12 = vld [vmem:[#allocation13 + $0xad8] ss:$60 sps:$4 sm:$0xff]   ;;  %v10895_v13 = vld [vmem:[#allocation13 + $0xae0] ss:$60 sps:$4 sm:$0xff]  }
 0x7e6   :  { %7978 = vmatprep.subr.bf16.mxu0 %v10819_v14  ;;  %v10900_v14 = vld [vmem:[#allocation13 + $0xb54] ss:$60 sps:$4 sm:$0xff]  }
 0x7e8   :  { %7897 = vmatpush1.bf16.msra.mxu1 %v10814_v15  ;;  %v10903_v15 = vld [vmem:[#allocation13 + $0xb5c] ss:$60 sps:$4 sm:$0xff]  }
 0x7e9   :  { %7979 = vmatpush1.bf16.msra.mxu0 %v10817_v16  ;;  %7898 = vmatprep.subr.bf16.mxu1 %v10822_v19  ;;  %v10898_v16 = vld [vmem:[#allocation13 + $0xb50] ss:$60 sps:$4 sm:$0xff]   ;;  %v10901_v19 = vld [vmem:[#allocation13 + $0xb58] ss:$60 sps:$4 sm:$0xff]  }
 0x7ea   :  { %7980 = vmatprep.subr.bf16.mxu0 %v10825_v20  ;;  %v10906_v20 = vld [vmem:[#allocation13 + $0xbcc] ss:$60 sps:$4 sm:$0xff]  }
 0x7ec   :  { %7899 = vmatpush1.bf16.msra.mxu1 %v10820_v22  ;;  %v10909_v22 = vld [vmem:[#allocation13 + $0xbd4] ss:$60 sps:$4 sm:$0xff]  }
 0x7ed   :  { %7981 = vmatpush1.bf16.msra.mxu0 %v10823_v24  ;;  %7900 = vmatprep.subr.bf16.mxu1 %v10828_v28  ;;  %v10904_v24 = vld [vmem:[#allocation13 + $0xbc8] ss:$60 sps:$4 sm:$0xff]   ;;  %v10907_v28 = vld [vmem:[#allocation13 + $0xbd0] ss:$60 sps:$4 sm:$0xff]  }
 0x7ee   :  { %7982 = vmatprep.subr.bf16.mxu0 %v10831_v29  ;;  %v10912_v29 = vld [vmem:[#allocation13 + $0xc44] ss:$60 sps:$4 sm:$0xff]  }
 0x7f0   :  { %7901 = vmatpush1.bf16.msra.mxu1 %v10826_v31  ;;  %v10915_v31 = vld [vmem:[#allocation13 + $0xc4c] ss:$60 sps:$4 sm:$0xff]  }
 0x7f1   :  { %7983 = vmatpush1.bf16.msra.mxu0 %v10829_v32  ;;  %7902 = vmatprep.subr.bf16.mxu1 %v10834_v34  ;;  %v10910_v32 = vld [vmem:[#allocation13 + $0xc40] ss:$60 sps:$4 sm:$0xff]   ;;  %v10913_v34 = vld [vmem:[#allocation13 + $0xc48] ss:$60 sps:$4 sm:$0xff]  }
 0x7f2   :  { %7984 = vmatprep.subr.bf16.mxu0 %v10837_v25  ;;  %v10918_v25 = vld [vmem:[#allocation13 + $0xcbc] ss:$60 sps:$4 sm:$0xff]  }
 0x7f4   :  { %7903 = vmatpush1.bf16.msra.mxu1 %v10832_v35  ;;  %v10921_v35 = vld [vmem:[#allocation13 + $0xcc4] ss:$60 sps:$4 sm:$0xff]  }
 0x7f5   :  { %7985 = vmatpush1.bf16.msra.mxu0 %v10835_v61  ;;  %7904 = vmatprep.subr.bf16.mxu1 %v10840_v30  ;;  %v10916_v61 = vld [vmem:[#allocation13 + $0xcb8] ss:$60 sps:$4 sm:$0xff]   ;;  %v10919_v30 = vld [vmem:[#allocation13 + $0xcc0] ss:$60 sps:$4 sm:$0xff]  }
 0x7f6   :  { %7986 = vmatprep.subr.bf16.mxu0 %v10843_v36  ;;  %v10924_v36 = vld [vmem:[#allocation13 + $0xd34] ss:$60 sps:$4 sm:$0xff]  }
 0x7f8   :  { %7905 = vmatpush1.bf16.msra.mxu1 %v10838_v2  ;;  %v10927_v2 = vld [vmem:[#allocation13 + $0xd3c] ss:$60 sps:$4 sm:$0xff]  }
 0x7f9   :  { %7987 = vmatpush1.bf16.msra.mxu0 %v10841_v38  ;;  %7906 = vmatprep.subr.bf16.mxu1 %v10846_v39  ;;  %v10922_v38 = vld [vmem:[#allocation13 + $0xd30] ss:$60 sps:$4 sm:$0xff]   ;;  %v10925_v39 = vld [vmem:[#allocation13 + $0xd38] ss:$60 sps:$4 sm:$0xff]  }
 0x7fa   :  { %7988 = vmatprep.subr.bf16.mxu0 %v10849_v40  ;;  %v10930_v40 = vld [vmem:[#allocation13 + $0xdac] ss:$60 sps:$4 sm:$0xff]  }
 0x7fc   :  { %7907 = vmatpush1.bf16.msra.mxu1 %v10844_v41  ;;  %v10933_v41 = vld [vmem:[#allocation13 + $0xdb4] ss:$60 sps:$4 sm:$0xff]  }
 0x7fd   :  { %7989 = vmatpush1.bf16.msra.mxu0 %v10847_v33  ;;  %7917 = vmatprep.subr.bf16.mxu1 %v10852_v42  ;;  %v10928_v33 = vld [vmem:[#allocation13 + $0xda8] ss:$60 sps:$4 sm:$0xff]   ;;  %v10931_v42 = vld [vmem:[#allocation13 + $0xdb0] ss:$60 sps:$4 sm:$0xff]  }
 0x7fe   :  { %7999 = vmatprep.subr.bf16.mxu0 %v10855_v43  ;;  %v10936_v43 = vld [vmem:[#allocation13 + $0xe24] ss:$60 sps:$4 sm:$0xff]  }
 0x7ff   :  { %7909 = vmatmul.mubr.bf16.vlgmr.msra.gmra.mrb[20].mxu1 %v11759_v21 }
 0x800   :  { %7991 = vmatmul.mubr.bf16.vlgmr.msra.gmra.mrb[24].mxu0 %v11759_v21  ;;  %7918 = vmatpush1.bf16.msra.mxu1 %v10850_v44  ;;  %v10939_v44 = vld [vmem:[#allocation13 + $0xe2c] ss:$60 sps:$4 sm:$0xff]  }
 0x801   :  { %7949 = vmatprep.mubr.bf16.mxu1 %v11763_v26  ;;  %8000 = vmatpush1.bf16.msra.mxu0 %v10853_v45  ;;  %v10934_v45 = vld [vmem:[#allocation13 + $0xe20] ss:$60 sps:$4 sm:$0xff]  }
 0x802   :  { %8031 = vmatprep.mubr.bf16.mxu0 %v11763_v26  ;;  %7919 = vmatprep.subr.bf16.mxu1 %v10858_v46  ;;  %v10937_v46 = vld [vmem:[#allocation13 + $0xe28] ss:$60 sps:$4 sm:$0xff]  }
 0x803   :  { %8001 = vmatprep.subr.bf16.mxu0 %v10861_v47  ;;  %v10942_v47 = vld [vmem:[#allocation13 + $0xe9c] ss:$60 sps:$4 sm:$0xff]  }
 0x804   :  { %7920 = vmatpush1.bf16.msra.mxu1 %v10856_v48  ;;  %v10945_v48 = vld [vmem:[#allocation13 + $0xea4] ss:$60 sps:$4 sm:$0xff]  }
 0x805   :  { %8002 = vmatpush1.bf16.msra.mxu0 %v10859_v49  ;;  %7921 = vmatprep.subr.bf16.mxu1 %v10864_v50  ;;  %v10940_v49 = vld [vmem:[#allocation13 + $0xe98] ss:$60 sps:$4 sm:$0xff]   ;;  %v10943_v50 = vld [vmem:[#allocation13 + $0xea0] ss:$60 sps:$4 sm:$0xff]  }
 0x806   :  { %8003 = vmatprep.subr.bf16.mxu0 %v10867_v51  ;;  %v10948_v51 = vld [vmem:[#allocation13 + $0x24] ss:$60 sps:$4 sm:$0xff]  }
 0x808   :  { %7922 = vmatpush1.bf16.msra.mxu1 %v10862_v52  ;;  %v10951_v52 = vld [vmem:[#allocation13 + $0x2c] ss:$60 sps:$4 sm:$0xff]  }
 0x809   :  { %8004 = vmatpush1.bf16.msra.mxu0 %v10865_v53  ;;  %7923 = vmatprep.subr.bf16.mxu1 %v10870_v56  ;;  %v10946_v53 = vld [vmem:[#allocation13 + $0x20] ss:$60 sps:$4 sm:$0xff]   ;;  %v10949_v56 = vld [vmem:[#allocation13 + $0x28] ss:$60 sps:$4 sm:$0xff]  }
 0x80a   :  { %8005 = vmatprep.subr.bf16.mxu0 %v10873_v57  ;;  %v10954_v57 = vld [vmem:[#allocation13 + $0x9c] ss:$60 sps:$4 sm:$0xff]  }
 0x80c   :  { %7924 = vmatpush1.bf16.msra.mxu1 %v10868_v54  ;;  %v10957_v54 = vld [vmem:[#allocation13 + $0xa4] ss:$60 sps:$4 sm:$0xff]  }
 0x80d   :  { %8006 = vmatpush1.bf16.msra.mxu0 %v10871_v58  ;;  %7925 = vmatprep.subr.bf16.mxu1 %v10876_v59  ;;  %v10952_v58 = vld [vmem:[#allocation13 + $0x98] ss:$60 sps:$4 sm:$0xff]   ;;  %v10955_v59 = vld [vmem:[#allocation13 + $0xa0] ss:$60 sps:$4 sm:$0xff]  }
 0x80e   :  { %8007 = vmatprep.subr.bf16.mxu0 %v10879_v60  ;;  %v10960_v60 = vld [vmem:[#allocation13 + $0x114] ss:$60 sps:$4 sm:$0xff]  }
 0x810   :  { %7926 = vmatpush1.bf16.msra.mxu1 %v10874_v55  ;;  %v10963_v55 = vld [vmem:[#allocation13 + $0x11c] ss:$60 sps:$4 sm:$0xff]  }
 0x811   :  { %8008 = vmatpush1.bf16.msra.mxu0 %v10877_v62  ;;  %7927 = vmatprep.subr.bf16.mxu1 %v10882_v63  ;;  %v10958_v62 = vld [vmem:[#allocation13 + $0x110] ss:$60 sps:$4 sm:$0xff]   ;;  %v10961_v63 = vld [vmem:[#allocation13 + $0x118] ss:$60 sps:$4 sm:$0xff]  }
 0x812   :  { %8009 = vmatprep.subr.bf16.mxu0 %v10885_v0  ;;  %v10966_v0 = vld [vmem:[#allocation13 + $0x18c] ss:$60 sps:$4 sm:$0xff]  }
 0x814   :  { %7928 = vmatpush1.bf16.msra.mxu1 %v10880_v1  ;;  %v10969_v1 = vld [vmem:[#allocation13 + $0x194] ss:$60 sps:$4 sm:$0xff]  }
 0x815   :  { %8010 = vmatpush1.bf16.msra.mxu0 %v10883_v3  ;;  %7929 = vmatprep.subr.bf16.mxu1 %v10888_v4  ;;  %v10964_v3 = vld [vmem:[#allocation13 + $0x188] ss:$60 sps:$4 sm:$0xff]   ;;  %v10967_v4 = vld [vmem:[#allocation13 + $0x190] ss:$60 sps:$4 sm:$0xff]  }
 0x816   :  { %8011 = vmatprep.subr.bf16.mxu0 %v10891_v5  ;;  %v10972_v5 = vld [vmem:[#allocation13 + $0x204] ss:$60 sps:$4 sm:$0xff]  }
 0x818   :  { %7930 = vmatpush1.bf16.msra.mxu1 %v10886_v6  ;;  %v10975_v6 = vld [vmem:[#allocation13 + $0x20c] ss:$60 sps:$4 sm:$0xff]  }
 0x819   :  { %8012 = vmatpush1.bf16.msra.mxu0 %v10889_v7  ;;  %7931 = vmatprep.subr.bf16.mxu1 %v10894_v8  ;;  %v10970_v7 = vld [vmem:[#allocation13 + $0x200] ss:$60 sps:$4 sm:$0xff]   ;;  %v10973_v8 = vld [vmem:[#allocation13 + $0x208] ss:$60 sps:$4 sm:$0xff]  }
 0x81a   :  { %8013 = vmatprep.subr.bf16.mxu0 %v10897_v11  ;;  %v10978_v11 = vld [vmem:[#allocation13 + $0x27c] ss:$60 sps:$4 sm:$0xff]  }
 0x81c   :  { %7932 = vmatpush1.bf16.msra.mxu1 %v10892_v12  ;;  %v10981_v12 = vld [vmem:[#allocation13 + $0x284] ss:$60 sps:$4 sm:$0xff]  }
 0x81d   :  { %8014 = vmatpush1.bf16.msra.mxu0 %v10895_v13  ;;  %7933 = vmatprep.subr.bf16.mxu1 %v10900_v14  ;;  %v10976_v13 = vld [vmem:[#allocation13 + $0x278] ss:$60 sps:$4 sm:$0xff]   ;;  %v10979_v14 = vld [vmem:[#allocation13 + $0x280] ss:$60 sps:$4 sm:$0xff]  }
 0x81e   :  { %8015 = vmatprep.subr.bf16.mxu0 %v10903_v15  ;;  %v10984_v15 = vld [vmem:[#allocation13 + $0x2f4] ss:$60 sps:$4 sm:$0xff]  }
 0x820   :  { %7934 = vmatpush1.bf16.msra.mxu1 %v10898_v16  ;;  %v10987_v16 = vld [vmem:[#allocation13 + $0x2fc] ss:$60 sps:$4 sm:$0xff]  }
 0x821   :  { %8016 = vmatpush1.bf16.msra.mxu0 %v10901_v19  ;;  %7935 = vmatprep.subr.bf16.mxu1 %v10906_v20  ;;  %v10982_v19 = vld [vmem:[#allocation13 + $0x2f0] ss:$60 sps:$4 sm:$0xff]   ;;  %v10985_v20 = vld [vmem:[#allocation13 + $0x2f8] ss:$60 sps:$4 sm:$0xff]  }
 0x822   :  { %8017 = vmatprep.subr.bf16.mxu0 %v10909_v22  ;;  %v10990_v22 = vld [vmem:[#allocation13 + $0x36c] ss:$60 sps:$4 sm:$0xff]  }
 0x824   :  { %7936 = vmatpush1.bf16.msra.mxu1 %v10904_v24  ;;  %v10993_v24 = vld [vmem:[#allocation13 + $0x374] ss:$60 sps:$4 sm:$0xff]  }
 0x825   :  { %8018 = vmatpush1.bf16.msra.mxu0 %v10907_v28  ;;  %7937 = vmatprep.subr.bf16.mxu1 %v10912_v29  ;;  %v10988_v28 = vld [vmem:[#allocation13 + $0x368] ss:$60 sps:$4 sm:$0xff]   ;;  %v10991_v29 = vld [vmem:[#allocation13 + $0x370] ss:$60 sps:$4 sm:$0xff]  }
 0x826   :  { %8019 = vmatprep.subr.bf16.mxu0 %v10915_v31  ;;  %v10996_v31 = vld [vmem:[#allocation13 + $0x3e4] ss:$60 sps:$4 sm:$0xff]  }
 0x828   :  { %7938 = vmatpush1.bf16.msra.mxu1 %v10910_v32  ;;  %v10999_v32 = vld [vmem:[#allocation13 + $0x3ec] ss:$60 sps:$4 sm:$0xff]  }
 0x829   :  { %8020 = vmatpush1.bf16.msra.mxu0 %v10913_v34  ;;  %7939 = vmatprep.subr.bf16.mxu1 %v10918_v25  ;;  %v10994_v34 = vld [vmem:[#allocation13 + $0x3e0] ss:$60 sps:$4 sm:$0xff]   ;;  %v10997_v25 = vld [vmem:[#allocation13 + $0x3e8] ss:$60 sps:$4 sm:$0xff]  }
 0x82a   :  { %8021 = vmatprep.subr.bf16.mxu0 %v10921_v35  ;;  %v11002_v35 = vld [vmem:[#allocation13 + $0x45c] ss:$60 sps:$4 sm:$0xff]  }
 0x82c   :  { %7940 = vmatpush1.bf16.msra.mxu1 %v10916_v61  ;;  %v11005_v61 = vld [vmem:[#allocation13 + $0x464] ss:$60 sps:$4 sm:$0xff]  }
 0x82d   :  { %8022 = vmatpush1.bf16.msra.mxu0 %v10919_v30  ;;  %7941 = vmatprep.subr.bf16.mxu1 %v10924_v36  ;;  %v11000_v30 = vld [vmem:[#allocation13 + $0x458] ss:$60 sps:$4 sm:$0xff]   ;;  %v11003_v36 = vld [vmem:[#allocation13 + $0x460] ss:$60 sps:$4 sm:$0xff]  }
 0x82e   :  { %8023 = vmatprep.subr.bf16.mxu0 %v10927_v2  ;;  %v11008_v2 = vld [vmem:[#allocation13 + $0x4d4] ss:$60 sps:$4 sm:$0xff]  }
 0x830   :  { %7942 = vmatpush1.bf16.msra.mxu1 %v10922_v38  ;;  %v11011_v38 = vld [vmem:[#allocation13 + $0x4dc] ss:$60 sps:$4 sm:$0xff]  }
 0x831   :  { %8024 = vmatpush1.bf16.msra.mxu0 %v10925_v39  ;;  %7943 = vmatprep.subr.bf16.mxu1 %v10930_v40  ;;  %v11006_v39 = vld [vmem:[#allocation13 + $0x4d0] ss:$60 sps:$4 sm:$0xff]   ;;  %v11009_v40 = vld [vmem:[#allocation13 + $0x4d8] ss:$60 sps:$4 sm:$0xff]  }
 0x832   :  { %8025 = vmatprep.subr.bf16.mxu0 %v10933_v41  ;;  %v11014_v41 = vld [vmem:[#allocation13 + $0x54c] ss:$60 sps:$4 sm:$0xff]  }
 0x834   :  { %7944 = vmatpush1.bf16.msra.mxu1 %v10928_v33  ;;  %v11017_v33 = vld [vmem:[#allocation13 + $0x554] ss:$60 sps:$4 sm:$0xff]  }
 0x835   :  { %8026 = vmatpush1.bf16.msra.mxu0 %v10931_v42  ;;  %7945 = vmatprep.subr.bf16.mxu1 %v10936_v43  ;;  %v11012_v42 = vld [vmem:[#allocation13 + $0x548] ss:$60 sps:$4 sm:$0xff]   ;;  %v11015_v43 = vld [vmem:[#allocation13 + $0x550] ss:$60 sps:$4 sm:$0xff]  }
 0x836   :  { %8027 = vmatprep.subr.bf16.mxu0 %v10939_v44  ;;  %v11020_v44 = vld [vmem:[#allocation13 + $0x5c4] ss:$60 sps:$4 sm:$0xff]  }
 0x838   :  { %7946 = vmatpush1.bf16.msra.mxu1 %v10934_v45  ;;  %v11023_v45 = vld [vmem:[#allocation13 + $0x5cc] ss:$60 sps:$4 sm:$0xff]  }
 0x839   :  { %8028 = vmatpush1.bf16.msra.mxu0 %v10937_v46  ;;  %7947 = vmatprep.subr.bf16.mxu1 %v10942_v47  ;;  %v11018_v46 = vld [vmem:[#allocation13 + $0x5c0] ss:$60 sps:$4 sm:$0xff]   ;;  %v11021_v47 = vld [vmem:[#allocation13 + $0x5c8] ss:$60 sps:$4 sm:$0xff]  }
 0x83a   :  { %8029 = vmatprep.subr.bf16.mxu0 %v10945_v48  ;;  %v11026_v48 = vld [vmem:[#allocation13 + $0x63c] ss:$60 sps:$4 sm:$0xff]  }
 0x83c   :  { %7948 = vmatpush1.bf16.msra.mxu1 %v10940_v49  ;;  %v11029_v49 = vld [vmem:[#allocation13 + $0x644] ss:$60 sps:$4 sm:$0xff]  }
 0x83d   :  { %8030 = vmatpush1.bf16.msra.mxu0 %v10943_v50  ;;  %8040 = vmatprep.subr.bf16.mxu1 %v10948_v51  ;;  %v11024_v50 = vld [vmem:[#allocation13 + $0x638] ss:$60 sps:$4 sm:$0xff]   ;;  %v11027_v51 = vld [vmem:[#allocation13 + $0x640] ss:$60 sps:$4 sm:$0xff]  }
 0x83e   :  { %8122 = vmatprep.subr.bf16.mxu0 %v10951_v52  ;;  %v11032_v52 = vld [vmem:[#allocation13 + $0x6b4] ss:$60 sps:$4 sm:$0xff]  }
 0x83f   :  { %7950 = vmatmul.mubr.bf16.vlgmr.msra.gmra.mrb[20].mxu1 %v11772_v37 }
 0x840   :  { %8032 = vmatmul.mubr.bf16.vlgmr.msra.gmra.mrb[24].mxu0 %v11772_v37  ;;  %8041 = vmatpush1.bf16.msra.mxu1 %v10946_v53  ;;  %v11035_v53 = vld [vmem:[#allocation13 + $0x6bc] ss:$60 sps:$4 sm:$0xff]  }
 0x841   :  { %8072 = vmatprep.mubr.bf16.mxu1 %v11757_v17  ;;  %8123 = vmatpush1.bf16.msra.mxu0 %v10949_v56  ;;  %v11030_v56 = vld [vmem:[#allocation13 + $0x6b0] ss:$60 sps:$4 sm:$0xff]  }
 0x842   :  { %8154 = vmatprep.mubr.bf16.mxu0 %v11757_v17  ;;  %8042 = vmatprep.subr.bf16.mxu1 %v10954_v57  ;;  %v11033_v57 = vld [vmem:[#allocation13 + $0x6b8] ss:$60 sps:$4 sm:$0xff]  }
 0x843   :  { %8124 = vmatprep.subr.bf16.mxu0 %v10957_v54  ;;  %v11038_v54 = vld [vmem:[#allocation13 + $0x72c] ss:$60 sps:$4 sm:$0xff]  }
 0x844   :  { %8043 = vmatpush1.bf16.msra.mxu1 %v10952_v58  ;;  %v11041_v58 = vld [vmem:[#allocation13 + $0x734] ss:$60 sps:$4 sm:$0xff]  }
 0x845   :  { %8125 = vmatpush1.bf16.msra.mxu0 %v10955_v59  ;;  %8044 = vmatprep.subr.bf16.mxu1 %v10960_v60  ;;  %v11036_v59 = vld [vmem:[#allocation13 + $0x728] ss:$60 sps:$4 sm:$0xff]   ;;  %v11039_v60 = vld [vmem:[#allocation13 + $0x730] ss:$60 sps:$4 sm:$0xff]  }
 0x846   :  { %8126 = vmatprep.subr.bf16.mxu0 %v10963_v55  ;;  %v11044_v55 = vld [vmem:[#allocation13 + $0x7a4] ss:$60 sps:$4 sm:$0xff]  }
 0x848   :  { %8045 = vmatpush1.bf16.msra.mxu1 %v10958_v62  ;;  %v11047_v62 = vld [vmem:[#allocation13 + $0x7ac] ss:$60 sps:$4 sm:$0xff]  }
 0x849   :  { %8127 = vmatpush1.bf16.msra.mxu0 %v10961_v63  ;;  %8046 = vmatprep.subr.bf16.mxu1 %v10966_v0  ;;  %v11042_v63 = vld [vmem:[#allocation13 + $0x7a0] ss:$60 sps:$4 sm:$0xff]   ;;  %v11045_v0 = vld [vmem:[#allocation13 + $0x7a8] ss:$60 sps:$4 sm:$0xff]  }
 0x84a   :  { %8128 = vmatprep.subr.bf16.mxu0 %v10969_v1  ;;  %v11050_v1 = vld [vmem:[#allocation13 + $0x81c] ss:$60 sps:$4 sm:$0xff]  }
 0x84c   :  { %8047 = vmatpush1.bf16.msra.mxu1 %v10964_v3  ;;  %v11053_v3 = vld [vmem:[#allocation13 + $0x824] ss:$60 sps:$4 sm:$0xff]  }
 0x84d   :  { %8129 = vmatpush1.bf16.msra.mxu0 %v10967_v4  ;;  %8048 = vmatprep.subr.bf16.mxu1 %v10972_v5  ;;  %v11048_v4 = vld [vmem:[#allocation13 + $0x818] ss:$60 sps:$4 sm:$0xff]   ;;  %v11051_v5 = vld [vmem:[#allocation13 + $0x820] ss:$60 sps:$4 sm:$0xff]  }
 0x84e   :  { %8130 = vmatprep.subr.bf16.mxu0 %v10975_v6  ;;  %v11056_v6 = vld [vmem:[#allocation13 + $0x894] ss:$60 sps:$4 sm:$0xff]  }
 0x850   :  { %8049 = vmatpush1.bf16.msra.mxu1 %v10970_v7  ;;  %v11059_v7 = vld [vmem:[#allocation13 + $0x89c] ss:$60 sps:$4 sm:$0xff]  }
 0x851   :  { %8131 = vmatpush1.bf16.msra.mxu0 %v10973_v8  ;;  %8050 = vmatprep.subr.bf16.mxu1 %v10978_v11  ;;  %v11054_v8 = vld [vmem:[#allocation13 + $0x890] ss:$60 sps:$4 sm:$0xff]   ;;  %v11057_v11 = vld [vmem:[#allocation13 + $0x898] ss:$60 sps:$4 sm:$0xff]  }
 0x852   :  { %8132 = vmatprep.subr.bf16.mxu0 %v10981_v12  ;;  %v11062_v12 = vld [vmem:[#allocation13 + $0x90c] ss:$60 sps:$4 sm:$0xff]  }
 0x854   :  { %8051 = vmatpush1.bf16.msra.mxu1 %v10976_v13  ;;  %v11065_v13 = vld [vmem:[#allocation13 + $0x914] ss:$60 sps:$4 sm:$0xff]  }
 0x855   :  { %8133 = vmatpush1.bf16.msra.mxu0 %v10979_v14  ;;  %8052 = vmatprep.subr.bf16.mxu1 %v10984_v15  ;;  %v11060_v14 = vld [vmem:[#allocation13 + $0x908] ss:$60 sps:$4 sm:$0xff]   ;;  %v11063_v15 = vld [vmem:[#allocation13 + $0x910] ss:$60 sps:$4 sm:$0xff]  }
 0x856   :  { %8134 = vmatprep.subr.bf16.mxu0 %v10987_v16  ;;  %v11068_v16 = vld [vmem:[#allocation13 + $0x984] ss:$60 sps:$4 sm:$0xff]  }
 0x858   :  { %8053 = vmatpush1.bf16.msra.mxu1 %v10982_v19  ;;  %v11071_v19 = vld [vmem:[#allocation13 + $0x98c] ss:$60 sps:$4 sm:$0xff]  }
 0x859   :  { %8135 = vmatpush1.bf16.msra.mxu0 %v10985_v20  ;;  %8054 = vmatprep.subr.bf16.mxu1 %v10990_v22  ;;  %v11066_v20 = vld [vmem:[#allocation13 + $0x980] ss:$60 sps:$4 sm:$0xff]   ;;  %v11790_v22 = vld [vmem:[#allocation2 + $0xf] sm:$0xff] }
 0x85a   :  { %8136 = vmatprep.subr.bf16.mxu0 %v10993_v24  ;;  %v11069_v24 = vld [vmem:[#allocation13 + $0x988] ss:$60 sps:$4 sm:$0xff]  }
 0x85c   :  { %8055 = vmatpush1.bf16.msra.mxu1 %v10988_v28  ;;  %v11074_v28 = vld [vmem:[#allocation13 + $0x9fc] ss:$60 sps:$4 sm:$0xff]  }
 0x85d   :  { %8137 = vmatpush1.bf16.msra.mxu0 %v10991_v29  ;;  %8056 = vmatprep.subr.bf16.mxu1 %v10996_v31  ;;  %v11077_v29 = vld [vmem:[#allocation13 + $0xa04] ss:$60 sps:$4 sm:$0xff]   ;;  %v5208_v31 = vrot.slane %v11790_v22, %v11713_v23 }
 0x85e   :  { %8138 = vmatprep.subr.bf16.mxu0 %v10999_v32  ;;  %v5216_v32 = vrot.slane %v11790_v22, %v11727_v9 }
 0x860   :  { %8057 = vmatpush1.bf16.msra.mxu1 %v10994_v34  ;;  %v5212_v34 = vrot.slane %v11790_v22, %v11718_v27 }
 0x861   :  { %8139 = vmatpush1.bf16.msra.mxu0 %v10997_v25  ;;  %8058 = vmatprep.subr.bf16.mxu1 %v11002_v35  ;;  %v5220_v25 = vrot.slane %v11790_v22, %v11730_v10  ;;  %v11072_v35 = vld [vmem:[#allocation13 + $0x9f8] ss:$60 sps:$4 sm:$0xff]  }
 0x862   :  { %8140 = vmatprep.subr.bf16.mxu0 %v11005_v61  ;;  %v11075_v61 = vld [vmem:[#allocation13 + $0xa00] ss:$60 sps:$4 sm:$0xff]  }
 0x864   :  { %8059 = vmatpush1.bf16.msra.mxu1 %v11000_v30  ;;  %v11080_v30 = vld [vmem:[#allocation13 + $0xa74] ss:$60 sps:$4 sm:$0xff]  }
 0x865   :  { %8141 = vmatpush1.bf16.msra.mxu0 %v11003_v36  ;;  %8060 = vmatprep.subr.bf16.mxu1 %v11008_v2 }
 0x866   :  { %8142 = vmatprep.subr.bf16.mxu0 %v11011_v38  ;;  %v11083_v38 = vld [vmem:[#allocation13 + $0xa7c] ss:$60 sps:$4 sm:$0xff]  }
 0x868   :  { %8061 = vmatpush1.bf16.msra.mxu1 %v11006_v39 }
 0x869   :  { %8143 = vmatpush1.bf16.msra.mxu0 %v11009_v40  ;;  %8062 = vmatprep.subr.bf16.mxu1 %v11014_v41 }
 0x86a   :  { %8144 = vmatprep.subr.bf16.mxu0 %v11017_v33 }
 0x86c   :  { %8063 = vmatpush1.bf16.msra.mxu1 %v11012_v42 }
 0x86d   :  { %8145 = vmatpush1.bf16.msra.mxu0 %v11015_v43  ;;  %8064 = vmatprep.subr.bf16.mxu1 %v11020_v44 }
 0x86e   :  { %8146 = vmatprep.subr.bf16.mxu0 %v11023_v45 }
 0x870   :  { %8065 = vmatpush1.bf16.msra.mxu1 %v11018_v46  ;;  %v11078_v46 = vld [vmem:[#allocation13 + $0xa70] ss:$60 sps:$4 sm:$0xff]  }
 0x871   :  { %8147 = vmatpush1.bf16.msra.mxu0 %v11021_v47  ;;  %8066 = vmatprep.subr.bf16.mxu1 %v11026_v48  ;;  %v11081_v47 = vld [vmem:[#allocation13 + $0xa78] ss:$60 sps:$4 sm:$0xff]  }
 0x872   :  { %8148 = vmatprep.subr.bf16.mxu0 %v11029_v49 }
 0x874   :  { %8067 = vmatpush1.bf16.msra.mxu1 %v11024_v50 }
 0x875   :  { %8149 = vmatpush1.bf16.msra.mxu0 %v11027_v51  ;;  %8068 = vmatprep.subr.bf16.mxu1 %v11032_v52  ;;  %v11086_v52 = vld [vmem:[#allocation13 + $0xaec] ss:$60 sps:$4 sm:$0xff]  }
 0x876   :  { %8150 = vmatprep.subr.bf16.mxu0 %v11035_v53 }
 0x878   :  { %8069 = vmatpush1.bf16.msra.mxu1 %v11030_v56 }
 0x879   :  { %8151 = vmatpush1.bf16.msra.mxu0 %v11033_v57  ;;  %8070 = vmatprep.subr.bf16.mxu1 %v11038_v54  ;;  %v11089_v57 = vld [vmem:[#allocation13 + $0xaf4] ss:$60 sps:$4 sm:$0xff]   ;;  %v11084_v54 = vld [vmem:[#allocation13 + $0xae8] ss:$60 sps:$4 sm:$0xff]  }
 0x87a   :  { %8152 = vmatprep.subr.bf16.mxu0 %v11041_v58  ;;  %v11087_v58 = vld [vmem:[#allocation13 + $0xaf0] ss:$60 sps:$4 sm:$0xff]  }
 0x87c   :  { %8071 = vmatpush1.bf16.msra.mxu1 %v11036_v59  ;;  %v11092_v59 = vld [vmem:[#allocation13 + $0xb64] ss:$60 sps:$4 sm:$0xff]  }
 0x87d   :  { %8153 = vmatpush1.bf16.msra.mxu0 %v11039_v60  ;;  %8081 = vmatprep.subr.bf16.mxu1 %v11044_v55  ;;  %v11095_v60 = vld [vmem:[#allocation13 + $0xb6c] ss:$60 sps:$4 sm:$0xff]   ;;  %v11090_v55 = vld [vmem:[#allocation13 + $0xb60] ss:$60 sps:$4 sm:$0xff]  }
 0x87e   :  { %8163 = vmatprep.subr.bf16.mxu0 %v11047_v62  ;;  %v11093_v62 = vld [vmem:[#allocation13 + $0xb68] ss:$60 sps:$4 sm:$0xff]  }
 0x87f   :  { %8073 = vmatmul.mubr.bf16.vlgmr.msra.gmra.mrb[24].mxu1 %v11759_v21 }
 0x880   :  { %8155 = vmatmul.mubr.bf16.vlgmr.msra.gmra.mrb[28].mxu0 %v11759_v21  ;;  %8082 = vmatpush1.bf16.msra.mxu1 %v11042_v63  ;;  %v11098_v63 = vld [vmem:[#allocation13 + $0xbdc] ss:$60 sps:$4 sm:$0xff]  }
 0x881   :  { %8113 = vmatprep.mubr.bf16.mxu1 %v11763_v26  ;;  %8164 = vmatpush1.bf16.msra.mxu0 %v11045_v0  ;;  %v11101_v0 = vld [vmem:[#allocation13 + $0xbe4] ss:$60 sps:$4 sm:$0xff]  }
 0x882   :  { %8195 = vmatprep.mubr.bf16.mxu0 %v11763_v26  ;;  %8083 = vmatprep.subr.bf16.mxu1 %v11050_v1  ;;  %v11096_v1 = vld [vmem:[#allocation13 + $0xbd8] ss:$60 sps:$4 sm:$0xff]  }
 0x883   :  { %8165 = vmatprep.subr.bf16.mxu0 %v11053_v3 }
 0x884   :  { %8084 = vmatpush1.bf16.msra.mxu1 %v11048_v4  ;;  %v11099_v4 = vld [vmem:[#allocation13 + $0xbe0] ss:$60 sps:$4 sm:$0xff]  }
 0x885   :  { %8166 = vmatpush1.bf16.msra.mxu0 %v11051_v5  ;;  %8085 = vmatprep.subr.bf16.mxu1 %v11056_v6  ;;  %v11104_v5 = vld [vmem:[#allocation13 + $0xc54] ss:$60 sps:$4 sm:$0xff]  }
 0x886   :  { %8167 = vmatprep.subr.bf16.mxu0 %v11059_v7 }
 0x888   :  { %8086 = vmatpush1.bf16.msra.mxu1 %v11054_v8  ;;  %v11107_v8 = vld [vmem:[#allocation13 + $0xc5c] ss:$60 sps:$4 sm:$0xff]  }
 0x889   :  { %8168 = vmatpush1.bf16.msra.mxu0 %v11057_v11  ;;  %8087 = vmatprep.subr.bf16.mxu1 %v11062_v12 }
 0x88a   :  { %8169 = vmatprep.subr.bf16.mxu0 %v11065_v13 }
 0x88c   :  { %8088 = vmatpush1.bf16.msra.mxu1 %v11060_v14 }
 0x88d   :  { %8170 = vmatpush1.bf16.msra.mxu0 %v11063_v15  ;;  %8089 = vmatprep.subr.bf16.mxu1 %v11068_v16  ;;  %v11102_v16 = vld [vmem:[#allocation13 + $0xc50] ss:$60 sps:$4 sm:$0xff]  }
 0x88e   :  { %8171 = vmatprep.subr.bf16.mxu0 %v11071_v19 }
 0x890   :  { %8090 = vmatpush1.bf16.msra.mxu1 %v11066_v20 }
 0x891   :  { %8172 = vmatpush1.bf16.msra.mxu0 %v11069_v24  ;;  %8091 = vmatprep.subr.bf16.mxu1 %v11074_v28  ;;  %v11105_v24 = vld [vmem:[#allocation13 + $0xc58] ss:$60 sps:$4 sm:$0xff]   ;;  %v11110_v28 = vld [vmem:[#allocation13 + $0xccc] ss:$60 sps:$4 sm:$0xff]  }
 0x892   :  { %v7787_v36 = vpop.f32.mrb[16].mxu1  ;;  %v7869_v2 = vpop.f32.mrb[20].mxu0  ;;  %8173 = vmatprep.subr.bf16.mxu0 %v11077_v29 }
 0x893   :  { %v9639_v39 = vadd.f32 %v7787_v36, %v5208_v31  ;;  %v9641_v40 = vadd.f32 %v7869_v2, %v5216_v32  ;;  %v7789_v41 = vpop.f32.mrb[17].mxu1  ;;  %v7871_v33 = vpop.f32.mrb[21].mxu0  ;;  %v11113_v31 = vld [vmem:[#allocation13 + $0xcd4] ss:$60 sps:$4 sm:$0xff]   ;;  %v11117_v36 = vld [vmem:[#allocation13 + $0xd48] ss:$60 sps:$4 sm:$0xff]  }
 0x894   :  { %v9640_v42 = vadd.f32 %v7789_v41, %v5212_v34  ;;  %v9642_v43 = vadd.f32 %v7871_v33, %v5220_v25  ;;  %v7791_v44 = vpop.f32.mrb[18].mxu1  ;;  %v7873_v45 = vpop.f32.mrb[22].mxu0  ;;  %8092 = vmatpush1.bf16.msra.mxu1 %v11072_v35  ;;  %v11108_v34 = vld [vmem:[#allocation13 + $0xcc8] ss:$60 sps:$4 sm:$0xff]   ;;  %v11111_v25 = vld [vmem:[#allocation13 + $0xcd0] ss:$60 sps:$4 sm:$0xff]  }
 0x895   :  { %v8366_v48 = vmul.f32 0.5, %v9639_v39  ;;  %v8368_v49 = vmul.f32 0.5, %v9641_v40  ;;  %8174 = vmatpush1.bf16.msra.mxu0 %v11075_v61  ;;  %v7792_v50 = vpop.f32.mrb[19].mxu1  ;;  %v7874_v51 = vpop.f32.mrb[23].mxu0  ;;  %8093 = vmatprep.subr.bf16.mxu1 %v11080_v30  ;;  %v11116_v35 = vld [vmem:[#allocation13 + $0xd44] ss:$60 sps:$4 sm:$0xff]  }
 0x896   :  { %v8367_v53 = vmul.f32 0.5, %v9640_v42  ;;  %v8369_v56 = vmul.f32 0.5, %v9642_v43  ;;  %8175 = vmatprep.subr.bf16.mxu0 %v11083_v38  ;;  %v11119_v61 = vld [vmem:[#allocation13 + $0xd4c] ss:$60 sps:$4 sm:$0xff]   ;;  %v11114_v30 = vld [vmem:[#allocation13 + $0xd40] ss:$60 sps:$4 sm:$0xff]  }
 0x897   :  { %11276 = vtanh.f32 %v8366_v48  ;;  %v11122_v2 = vld [vmem:[#allocation13 + $0xdbc] ss:$60 sps:$4 sm:$0xff]   ;;  %v11125_v38 = vld [vmem:[#allocation13 + $0xdc4] ss:$60 sps:$4 sm:$0xff]   ;;  %v11128_v41 = vld [vmem:[#allocation13 + $0xe34] ss:$60 sps:$4 sm:$0xff]  }
 0x898   :  { %11278 = vtanh.f32 %v8368_v49  ;;  %8094 = vmatpush1.bf16.msra.mxu1 %v11078_v46  ;;  %v11120_v39 = vld [vmem:[#allocation13 + $0xdb8] ss:$60 sps:$4 sm:$0xff]   ;;  %v11123_v40 = vld [vmem:[#allocation13 + $0xdc0] ss:$60 sps:$4 sm:$0xff]   ;;  %v11126_v42 = vld [vmem:[#allocation13 + $0xe30] ss:$60 sps:$4 sm:$0xff]  }
 0x899   :  { %11280 = vtanh.f32 %v8367_v53  ;;  %8176 = vmatpush1.bf16.msra.mxu0 %v11081_v47  ;;  %8095 = vmatprep.subr.bf16.mxu1 %v11086_v52  ;;  %v11131_v33 = vld [vmem:[#allocation13 + $0xe3c] ss:$60 sps:$4 sm:$0xff]   ;;  %v11134_v44 = vld [vmem:[#allocation13 + $0xeac] ss:$60 sps:$4 sm:$0xff]   ;;  %v11137_v45 = vld [vmem:[#allocation13 + $0xeb4] ss:$60 sps:$4 sm:$0xff]  }
 0x89a   :  { %11282 = vtanh.f32 %v8369_v56  ;;  %8177 = vmatprep.subr.bf16.mxu0 %v11089_v57  ;;  %v11129_v43 = vld [vmem:[#allocation13 + $0xe38] ss:$60 sps:$4 sm:$0xff]   ;;  %v11132_v46 = vld [vmem:[#allocation13 + $0xea8] ss:$60 sps:$4 sm:$0xff]   ;;  %v11135_v47 = vld [vmem:[#allocation13 + $0xeb0] ss:$60 sps:$4 sm:$0xff]  }
 0x89b   :  { %v11140_v48 = vld [vmem:[#allocation13 + $0x34] ss:$60 sps:$4 sm:$0xff]   ;;  %v11145_v52 = vld [vmem:[#allocation13 + $0xac] ss:$60 sps:$4 sm:$0xff]  }
 0x89c   :  { %8096 = vmatpush1.bf16.msra.mxu1 %v11084_v54  ;;  %v11141_v49 = vld [vmem:[#allocation13 + $0x3f8] ss:$60 sps:$4 sm:$0xff]   ;;  %v11138_v50 = vld [vmem:[#allocation13 + $0x30] ss:$60 sps:$4 sm:$0xff]   ;;  %v11143_v56 = vld [vmem:[#allocation13 + $0xa8] ss:$60 sps:$4 sm:$0xff]  }
 0x89d   :  { %8178 = vmatpush1.bf16.msra.mxu0 %v11087_v58  ;;  %8097 = vmatprep.subr.bf16.mxu1 %v11092_v59  ;;  %v11142_v51 = vld [vmem:[#allocation13 + $0x38] ss:$60 sps:$4 sm:$0xff]   ;;  %v11146_v53 = vld [vmem:[#allocation13 + $0x470] ss:$60 sps:$4 sm:$0xff]   ;;  %v11150_v54 = vld [vmem:[#allocation13 + $0x124] ss:$60 sps:$4 sm:$0xff]  }
 0x89e   :  { %8179 = vmatprep.subr.bf16.mxu0 %v11095_v60  ;;  %v11147_v57 = vld [vmem:[#allocation13 + $0xb0] ss:$60 sps:$4 sm:$0xff]   ;;  %v11151_v58 = vld [vmem:[#allocation13 + $0x4e8] ss:$60 sps:$4 sm:$0xff]   ;;  %v11148_v59 = vld [vmem:[#allocation13 + $0x120] ss:$60 sps:$4 sm:$0xff]  }
 0x89f   :  { %v11152_v60 = vld [vmem:[#allocation13 + $0x128] ss:$60 sps:$4 sm:$0xff]  }
 0x8a0   :  { %8098 = vmatpush1.bf16.msra.mxu1 %v11090_v55  ;;  %v11155_v55 = vld [vmem:[#allocation13 + $0x19c] ss:$60 sps:$4 sm:$0xff]  }
 0x8a1   :  { %v11277_v3 = vpop.eup %11276  ;;  %8180 = vmatpush1.bf16.msra.mxu0 %v11093_v62  ;;  %8099 = vmatprep.subr.bf16.mxu1 %v11098_v63  ;;  %v11156_v62 = vld [vmem:[#allocation13 + $0x560] ss:$60 sps:$4 sm:$0xff]   ;;  %v11153_v63 = vld [vmem:[#allocation13 + $0x198] ss:$60 sps:$4 sm:$0xff]  }
 0x8a2   :  { %v11279_v6 = vpop.eup %11278  ;;  %v8396_v7 = vadd.f32 1.0, %v11277_v3  ;;  %8181 = vmatprep.subr.bf16.mxu0 %v11101_v0  ;;  %v11157_v0 = vld [vmem:[#allocation13 + $0x1a0] ss:$60 sps:$4 sm:$0xff]   ;;  %v11161_v3 = vld [vmem:[#allocation13 + $0x5d8] ss:$60 sps:$4 sm:$0xff]  }
 0x8a3   :  { %v11281_v11 = vpop.eup %11280  ;;  %v8398_v12 = vadd.f32 1.0, %v11279_v6  ;;  %v11166_v6 = vld [vmem:[#allocation13 + $0x650] ss:$60 sps:$4 sm:$0xff]  }
 0x8a4   :  { %v11283_v13 = vpop.eup %11282  ;;  %v8411_v14 = vmul.f32 0.5, %v8396_v7  ;;  %v8397_v15 = vadd.f32 1.0, %v11281_v11  ;;  %8100 = vmatpush1.bf16.msra.mxu1 %v11096_v1  ;;  %v11160_v1 = vld [vmem:[#allocation13 + $0x214] ss:$60 sps:$4 sm:$0xff]   ;;  %v11163_v7 = vld [vmem:[#allocation13 + $0x288] ss:$60 sps:$4 sm:$0xff]  }
 0x8a5   :  { %v8413_v19 = vmul.f32 0.5, %v8398_v12  ;;  %v8399_v20 = vadd.f32 1.0, %v11283_v13  ;;  %8182 = vmatpush1.bf16.msra.mxu0 %v11099_v4  ;;  %8101 = vmatprep.subr.bf16.mxu1 %v11104_v5  ;;  %v11162_v4 = vld [vmem:[#allocation13 + $0x218] ss:$60 sps:$4 sm:$0xff]   ;;  %v11165_v5 = vld [vmem:[#allocation13 + $0x28c] ss:$60 sps:$4 sm:$0xff]  }
 0x8a6   :  { %8426 = vst [vmem:[#allocation14] sm:$0xff] %v8411_v14  ;;  %v8412_v29 = vmul.f32 0.5, %v8397_v15  ;;  %8183 = vmatprep.subr.bf16.mxu0 %v11107_v8  ;;  %v11167_v8 = vld [vmem:[#allocation13 + $0x290] ss:$60 sps:$4 sm:$0xff]   ;;  %v11170_v11 = vld [vmem:[#allocation13 + $0x304] ss:$60 sps:$4 sm:$0xff]  }
 0x8a7   :  { %8428 = vst [vmem:[#allocation14 + $0x10] sm:$0xff] %v8413_v19  ;;  %v8414_v32 = vmul.f32 0.5, %v8399_v20  ;;  %v11171_v12 = vld [vmem:[#allocation13 + $0x6c8] ss:$60 sps:$4 sm:$0xff]   ;;  %v11168_v13 = vld [vmem:[#allocation13 + $0x300] ss:$60 sps:$4 sm:$0xff]  }
 0x8a8   :  { %8427 = vst [vmem:[#allocation14 + $0x8] sm:$0xff] %v8412_v29  ;;  %8102 = vmatpush1.bf16.msra.mxu1 %v11102_v16  ;;  %v11172_v14 = vld [vmem:[#allocation13 + $0x308] ss:$60 sps:$4 sm:$0xff]   ;;  %v11175_v15 = vld [vmem:[#allocation13 + $0x37c] ss:$60 sps:$4 sm:$0xff]  }
 0x8a9   :  { %8429 = vst [vmem:[#allocation14 + $0x18] sm:$0xff] %v8414_v32  ;;  %8184 = vmatpush1.bf16.msra.mxu0 %v11105_v24  ;;  %8103 = vmatprep.subr.bf16.mxu1 %v11110_v28  ;;  %v11176_v16 = vld [vmem:[#allocation13 + $0x740] ss:$60 sps:$4 sm:$0xff]   ;;  %v11173_v19 = vld [vmem:[#allocation13 + $0x378] ss:$60 sps:$4 sm:$0xff]  }
 0x8aa   :  { %8185 = vmatprep.subr.bf16.mxu0 %v11113_v31  ;;  %v11177_v20 = vld [vmem:[#allocation13 + $0x380] ss:$60 sps:$4 sm:$0xff]   ;;  %v11180_v24 = vld [vmem:[#allocation13 + $0x3f4] ss:$60 sps:$4 sm:$0xff]   ;;  %v11185_v32 = vld [vmem:[#allocation13 + $0x46c] ss:$60 sps:$4 sm:$0xff]  }
 0x8ab   :  { %v11181_v28 = vld [vmem:[#allocation13 + $0xb78] ss:$60 sps:$4 sm:$0xff]   ;;  %v11178_v29 = vld [vmem:[#allocation13 + $0x3f0] ss:$60 sps:$4 sm:$0xff]  }
 0x8ac   :  { %8104 = vmatpush1.bf16.msra.mxu1 %v11108_v34  ;;  %v11182_v31 = vld [vmem:[#allocation13 + $0x7b8] ss:$60 sps:$4 sm:$0xff]   ;;  %v11186_v34 = vld [vmem:[#allocation13 + $0xbf0] ss:$60 sps:$4 sm:$0xff]  }
 0x8ad   :  { %8186 = vmatpush1.bf16.msra.mxu0 %v11111_v25  ;;  %8105 = vmatprep.subr.bf16.mxu1 %v11116_v35  ;;  %v11183_v25 = vld [vmem:[#allocation13 + $0x468] ss:$60 sps:$4 sm:$0xff]   ;;  %v11187_v35 = vld [vmem:[#allocation13 + $0x830] ss:$60 sps:$4 sm:$0xff]  }
 0x8ae   :  { %8187 = vmatprep.subr.bf16.mxu0 %v11119_v61  ;;  %v11190_v61 = vld [vmem:[#allocation13 + $0x4e4] ss:$60 sps:$4 sm:$0xff]  }
 0x8b0   :  { %8106 = vmatpush1.bf16.msra.mxu1 %v11114_v30  ;;  %v11191_v30 = vld [vmem:[#allocation13 + $0xc68] ss:$60 sps:$4 sm:$0xff]  }
 0x8b1   :  { %8188 = vmatpush1.bf16.msra.mxu0 %v11117_v36  ;;  %8107 = vmatprep.subr.bf16.mxu1 %v11122_v2  ;;  %v11188_v36 = vld [vmem:[#allocation13 + $0x4e0] ss:$60 sps:$4 sm:$0xff]   ;;  %v11192_v2 = vld [vmem:[#allocation13 + $0x8a8] ss:$60 sps:$4 sm:$0xff]  }
 0x8b2   :  { %8189 = vmatprep.subr.bf16.mxu0 %v11125_v38  ;;  %v11195_v38 = vld [vmem:[#allocation13 + $0x55c] ss:$60 sps:$4 sm:$0xff]  }
 0x8b4   :  { %8108 = vmatpush1.bf16.msra.mxu1 %v11120_v39  ;;  %v11196_v39 = vld [vmem:[#allocation13 + $0xce0] ss:$60 sps:$4 sm:$0xff]  }
 0x8b5   :  { %8190 = vmatpush1.bf16.msra.mxu0 %v11123_v40  ;;  %8109 = vmatprep.subr.bf16.mxu1 %v11128_v41  ;;  %v11193_v40 = vld [vmem:[#allocation13 + $0x558] ss:$60 sps:$4 sm:$0xff]   ;;  %v11197_v41 = vld [vmem:[#allocation13 + $0x920] ss:$60 sps:$4 sm:$0xff]  }
 0x8b6   :  { %8191 = vmatprep.subr.bf16.mxu0 %v11131_v33  ;;  %v11200_v33 = vld [vmem:[#allocation13 + $0x5d4] ss:$60 sps:$4 sm:$0xff]  }
 0x8b8   :  { %8110 = vmatpush1.bf16.msra.mxu1 %v11126_v42  ;;  %v11201_v42 = vld [vmem:[#allocation13 + $0xd58] ss:$60 sps:$4 sm:$0xff]  }
 0x8b9   :  { %8192 = vmatpush1.bf16.msra.mxu0 %v11129_v43  ;;  %8111 = vmatprep.subr.bf16.mxu1 %v11134_v44  ;;  %v11198_v43 = vld [vmem:[#allocation13 + $0x5d0] ss:$60 sps:$4 sm:$0xff]   ;;  %v11202_v44 = vld [vmem:[#allocation13 + $0x998] ss:$60 sps:$4 sm:$0xff]  }
 0x8ba   :  { %8193 = vmatprep.subr.bf16.mxu0 %v11137_v45  ;;  %v11205_v45 = vld [vmem:[#allocation13 + $0x64c] ss:$60 sps:$4 sm:$0xff]  }
 0x8bc   :  { %8112 = vmatpush1.bf16.msra.mxu1 %v11132_v46  ;;  %v11206_v46 = vld [vmem:[#allocation13 + $0xdd0] ss:$60 sps:$4 sm:$0xff]  }
 0x8bd   :  { %8194 = vmatpush1.bf16.msra.mxu0 %v11135_v47  ;;  %8204 = vmatprep.subr.bf16.mxu1 %v11140_v48  ;;  %v11203_v47 = vld [vmem:[#allocation13 + $0x648] ss:$60 sps:$4 sm:$0xff]   ;;  %v11207_v48 = vld [vmem:[#allocation13 + $0xa10] ss:$60 sps:$4 sm:$0xff]  }
 0x8be   :  { %9561 = vmatprep.subr.bf16.mxu0 %v11141_v49  ;;  %v11210_v49 = vld [vmem:[#allocation13 + $0x6c4] ss:$60 sps:$4 sm:$0xff]  }
 0x8bf   :  { %8114 = vmatmul.mubr.bf16.vlgmr.msra.gmra.mrb[24].mxu1 %v11772_v37 }
 0x8c0   :  { %8196 = vmatmul.mubr.bf16.vlgmr.msra.gmra.mrb[28].mxu0 %v11772_v37  ;;  %8205 = vmatpush1.bf16.msra.mxu1 %v11138_v50  ;;  %v11211_v50 = vld [vmem:[#allocation13 + $0xe48] ss:$60 sps:$4 sm:$0xff]  }
 0x8c1   :  { %8236 = vmatprep.mubr.bf16.mxu1 %v11757_v17  ;;  %9562 = vmatpush3.bf16.msra.mxu0 %v11142_v51  ;;  %v11208_v51 = vld [vmem:[#allocation13 + $0x6c0] ss:$60 sps:$4 sm:$0xff]  }
 0x8c2   :  { %8318 = vmatprep.mubr.bf16.mxu0 %v11757_v17  ;;  %8206 = vmatprep.subr.bf16.mxu1 %v11145_v52  ;;  %v11158_v17 = vld [vmem:[#allocation13 + $0x210] ss:$60 sps:$4 sm:$0xff]   ;;  %v11212_v52 = vld [vmem:[#allocation13 + $0xa88] ss:$60 sps:$4 sm:$0xff]  }
 0x8c3   :  { %9563 = vmatprep.subr.bf16.mxu0 %v11146_v53  ;;  %v11215_v53 = vld [vmem:[#allocation13 + $0x73c] ss:$60 sps:$4 sm:$0xff]  }
 0x8c4   :  { %8207 = vmatpush1.bf16.msra.mxu1 %v11143_v56  ;;  %v11216_v56 = vld [vmem:[#allocation13 + $0xec0] ss:$60 sps:$4 sm:$0xff]  }
 0x8c5   :  { %9564 = vmatpush3.bf16.msra.mxu0 %v11147_v57  ;;  %8208 = vmatprep.subr.bf16.mxu1 %v11150_v54  ;;  %v11213_v57 = vld [vmem:[#allocation13 + $0x738] ss:$60 sps:$4 sm:$0xff]   ;;  %v11217_v54 = vld [vmem:[#allocation13 + $0xb00] ss:$60 sps:$4 sm:$0xff]  }
 0x8c6   :  { %9565 = vmatprep.subr.bf16.mxu0 %v11151_v58  ;;  %v11220_v58 = vld [vmem:[#allocation13 + $0x7b4] ss:$60 sps:$4 sm:$0xff]  }
 0x8c8   :  { %8209 = vmatpush1.bf16.msra.mxu1 %v11148_v59  ;;  %v11218_v59 = vld [vmem:[#allocation13 + $0x7b0] ss:$60 sps:$4 sm:$0xff]  }
 0x8c9   :  { %9566 = vmatpush3.bf16.msra.mxu0 %v11152_v60  ;;  %8210 = vmatprep.subr.bf16.mxu1 %v11155_v55  ;;  %v11223_v60 = vld [vmem:[#allocation13 + $0x82c] ss:$60 sps:$4 sm:$0xff]  }
 0x8ca   :  { %9567 = vmatprep.subr.bf16.mxu0 %v11156_v62  ;;  %v11221_v55 = vld [vmem:[#allocation13 + $0x828] ss:$60 sps:$4 sm:$0xff]  }
 0x8cb   :  { %v11226_v62 = vld [vmem:[#allocation13 + $0x8a4] ss:$60 sps:$4 sm:$0xff]  }
 0x8cc   :  { %8211 = vmatpush1.bf16.msra.mxu1 %v11153_v63  ;;  %v11224_v63 = vld [vmem:[#allocation13 + $0x8a0] ss:$60 sps:$4 sm:$0xff]  }
 0x8cd   :  { %9568 = vmatpush3.bf16.msra.mxu0 %v11157_v0  ;;  %8212 = vmatprep.subr.bf16.mxu1 %v11160_v1  ;;  %v11229_v0 = vld [vmem:[#allocation13 + $0x91c] ss:$60 sps:$4 sm:$0xff]  }
 0x8ce   :  { %9569 = vmatprep.subr.bf16.mxu0 %v11161_v3  ;;  %v11227_v1 = vld [vmem:[#allocation13 + $0x918] ss:$60 sps:$4 sm:$0xff]  }
 0x8cf   :  { %v11232_v3 = vld [vmem:[#allocation13 + $0x994] ss:$60 sps:$4 sm:$0xff]  }
 0x8d0   :  { %8213 = vmatpush1.bf16.msra.mxu1 %v11158_v17  ;;  %v5223_v17 = vsub.s32 4, %v11710_v18 }
 0x8d1   :  { %9570 = vmatpush3.bf16.msra.mxu0 %v11162_v4  ;;  %8214 = vmatprep.subr.bf16.mxu1 %v11165_v5  ;;  %v5231_v4 = vsub.s32 6, %v11710_v18  ;;  %v5227_v5 = vsub.s32 5, %v11710_v18 }
 0x8d2   :  { %9571 = vmatprep.subr.bf16.mxu0 %v11166_v6  ;;  %v11235_v6 = vld [vmem:[#allocation13 + $0xa0c] ss:$60 sps:$4 sm:$0xff]  }
 0x8d4   :  { %8215 = vmatpush1.bf16.msra.mxu1 %v11163_v7  ;;  %v5224_v7 = vrot.slane %v11790_v22, %v5223_v17 }
 0x8d5   :  { %9572 = vmatpush3.bf16.msra.mxu0 %v11167_v8  ;;  %8216 = vmatprep.subr.bf16.mxu1 %v11170_v11  ;;  %v5232_v8 = vrot.slane %v11790_v22, %v5231_v4  ;;  %v5228_v11 = vrot.slane %v11790_v22, %v5227_v5 }
 0x8d6   :  { %9573 = vmatprep.subr.bf16.mxu0 %v11171_v12  ;;  %v11233_v12 = vld [vmem:[#allocation13 + $0xa08] ss:$60 sps:$4 sm:$0xff]  }
 0x8d8   :  { %8217 = vmatpush1.bf16.msra.mxu1 %v11168_v13 }
 0x8d9   :  { %9574 = vmatpush3.bf16.msra.mxu0 %v11172_v14  ;;  %8218 = vmatprep.subr.bf16.mxu1 %v11175_v15  ;;  %v11238_v14 = vld [vmem:[#allocation13 + $0xa84] ss:$60 sps:$4 sm:$0xff]  }
 0x8da   :  { %9575 = vmatprep.subr.bf16.mxu0 %v11176_v16 }
 0x8dc   :  { %8219 = vmatpush1.bf16.msra.mxu1 %v11173_v19 }
 0x8dd   :  { %9576 = vmatpush3.bf16.msra.mxu0 %v11177_v20  ;;  %8220 = vmatprep.subr.bf16.mxu1 %v11180_v24 }
 0x8de   :  { %9583 = vmatprep.subr.bf16.mxu0 %v11181_v28 }
 0x8e0   :  { %8319 = vmatmul.mubr.bf16.vlgmr.msra.gmra.mrb[32].mxu0 %v11759_v21  ;;  %8221 = vmatpush1.bf16.msra.mxu1 %v11178_v29 }
 0x8e1   :  { %9584 = vmatpush3.bf16.msra.mxu0 %v11182_v31  ;;  %8358 = vmatprep.mubr.bf16.mxu0 %v11763_v26 }
 0x8e2   :  { %8222 = vmatprep.subr.bf16.mxu1 %v11185_v32  ;;  %9585 = vmatprep.subr.bf16.mxu0 %v11186_v34  ;;  %v11236_v32 = vld [vmem:[#allocation13 + $0xa80] ss:$60 sps:$4 sm:$0xff]  }
 0x8e4   :  { %8223 = vmatpush1.bf16.msra.mxu1 %v11183_v25 }
 0x8e5   :  { %9586 = vmatpush3.bf16.msra.mxu0 %v11187_v35  ;;  %8224 = vmatprep.subr.bf16.mxu1 %v11190_v61 }
 0x8e6   :  { %9587 = vmatprep.subr.bf16.mxu0 %v11191_v30  ;;  %v11241_v30 = vld [vmem:[#allocation13 + $0xafc] ss:$60 sps:$4 sm:$0xff]  }
 0x8e8   :  { %8225 = vmatpush1.bf16.msra.mxu1 %v11188_v36 }
 0x8e9   :  { %9588 = vmatpush3.bf16.msra.mxu0 %v11192_v2  ;;  %8226 = vmatprep.subr.bf16.mxu1 %v11195_v38 }
 0x8ea   :  { %9589 = vmatprep.subr.bf16.mxu0 %v11196_v39  ;;  %v11239_v39 = vld [vmem:[#allocation13 + $0xaf8] ss:$60 sps:$4 sm:$0xff]  }
 0x8ec   :  { %8227 = vmatpush1.bf16.msra.mxu1 %v11193_v40  ;;  %v11244_v40 = vld [vmem:[#allocation13 + $0xb74] ss:$60 sps:$4 sm:$0xff]  }
 0x8ed   :  { %9590 = vmatpush3.bf16.msra.mxu0 %v11197_v41  ;;  %8228 = vmatprep.subr.bf16.mxu1 %v11200_v33  ;;  %v11242_v41 = vld [vmem:[#allocation13 + $0xb70] ss:$60 sps:$4 sm:$0xff]  }
 0x8ee   :  { %9591 = vmatprep.subr.bf16.mxu0 %v11201_v42  ;;  %v11247_v33 = vld [vmem:[#allocation13 + $0xbec] ss:$60 sps:$4 sm:$0xff]  }
 0x8ef   :  { %v11245_v42 = vld [vmem:[#allocation13 + $0xbe8] ss:$60 sps:$4 sm:$0xff]  }
 0x8f0   :  { %8229 = vmatpush1.bf16.msra.mxu1 %v11198_v43 }
 0x8f1   :  { %9592 = vmatpush3.bf16.msra.mxu0 %v11202_v44  ;;  %8230 = vmatprep.subr.bf16.mxu1 %v11205_v45  ;;  %v11250_v44 = vld [vmem:[#allocation13 + $0xc64] ss:$60 sps:$4 sm:$0xff]  }
 0x8f2   :  { %9593 = vmatprep.subr.bf16.mxu0 %v11206_v46 }
 0x8f4   :  { %8231 = vmatpush1.bf16.msra.mxu1 %v11203_v47 }
 0x8f5   :  { %9594 = vmatpush3.bf16.msra.mxu0 %v11207_v48  ;;  %8232 = vmatprep.subr.bf16.mxu1 %v11210_v49 }
 0x8f6   :  { %9595 = vmatprep.subr.bf16.mxu0 %v11211_v50 }
 0x8f8   :  { %8233 = vmatpush1.bf16.msra.mxu1 %v11208_v51 }
 0x8f9   :  { %9596 = vmatpush3.bf16.msra.mxu0 %v11212_v52  ;;  %8234 = vmatprep.subr.bf16.mxu1 %v11215_v53  ;;  %v11248_v52 = vld [vmem:[#allocation13 + $0xc60] ss:$60 sps:$4 sm:$0xff]  }
 0x8fa   :  { %9597 = vmatprep.subr.bf16.mxu0 %v11216_v56 }
 0x8fc   :  { %8235 = vmatpush1.bf16.msra.mxu1 %v11213_v57  ;;  %v11253_v57 = vld [vmem:[#allocation13 + $0xcdc] ss:$60 sps:$4 sm:$0xff]  }
 0x8fd   :  { %9598 = vmatpush3.bf16.msra.mxu0 %v11217_v54  ;;  %8245 = vmatprep.subr.bf16.mxu1 %v11220_v58 }
 0x8ff   :  { %8237 = vmatmul.mubr.bf16.vlgmr.msra.gmra.mrb[28].mxu1 %v11759_v21  ;;  %v11230_v21 = vld [vmem:[#allocation13 + $0x990] ss:$60 sps:$4 sm:$0xff]  }
 0x900   :  { %8359 = vmatmul.mubr.bf16.vlgmr.msra.gmra.mrb[36].mxu0 %v11772_v37  ;;  %8246 = vmatpush1.bf16.msra.mxu1 %v11218_v59  ;;  %v11251_v59 = vld [vmem:[#allocation13 + $0xcd8] ss:$60 sps:$4 sm:$0xff]  }
 0x901   :  { %8277 = vmatprep.mubr.bf16.mxu1 %v11763_v26  ;;  %8247 = vmatprep.subr.bf16.mxu1 %v11223_v60  ;;  %v5235_v26 = vsub.s32 7, %v11710_v18  ;;  %v11256_v60 = vld [vmem:[#allocation13 + $0xd54] ss:$60 sps:$4 sm:$0xff]  }
 0x903   :  { %v5236_v13 = vrot.slane %v11790_v22, %v5235_v26  ;;  %v136_v26 = vld [vmem:[#allocation2 + $0x17] sm:$0xff] }
 0x904   :  { %8248 = vmatpush1.bf16.msra.mxu1 %v11221_v55  ;;  %v11254_v55 = vld [vmem:[#allocation13 + $0xd50] ss:$60 sps:$4 sm:$0xff]  }
 0x905   :  { %8249 = vmatprep.subr.bf16.mxu1 %v11226_v62  ;;  %v11259_v62 = vld [vmem:[#allocation13 + $0xdcc] ss:$60 sps:$4 sm:$0xff]  }
 0x908   :  { %8250 = vmatpush1.bf16.msra.mxu1 %v11224_v63  ;;  %v11257_v63 = vld [vmem:[#allocation13 + $0xdc8] ss:$60 sps:$4 sm:$0xff]  }
 0x909   :  { %8251 = vmatprep.subr.bf16.mxu1 %v11229_v0  ;;  %v11262_v0 = vld [vmem:[#allocation13 + $0xe44] ss:$60 sps:$4 sm:$0xff]  }
 0x90c   :  { %8252 = vmatpush1.bf16.msra.mxu1 %v11227_v1  ;;  %v11260_v1 = vld [vmem:[#allocation13 + $0xe40] ss:$60 sps:$4 sm:$0xff]  }
 0x90d   :  { %8253 = vmatprep.subr.bf16.mxu1 %v11232_v3  ;;  %v11265_v3 = vld [vmem:[#allocation13 + $0xebc] ss:$60 sps:$4 sm:$0xff]  }
 0x910   :  { %8254 = vmatpush1.bf16.msra.mxu1 %v11230_v21  ;;  %v11263_v21 = vld [vmem:[#allocation13 + $0xeb8] ss:$60 sps:$4 sm:$0xff]  }
 0x911   :  { %8255 = vmatprep.subr.bf16.mxu1 %v11235_v6  ;;  %v5240_v6 = vrot.slane %v136_v26, %v11713_v23 }
 0x912   :  { %v7951_v15 = vpop.f32.mrb[20].mxu1 }
 0x913   :  { %v9643_v16 = vadd.f32 %v7951_v15, %v5224_v7  ;;  %v8033_v19 = vpop.f32.mrb[24].mxu0  ;;  %v7953_v20 = vpop.f32.mrb[21].mxu1  ;;  %v5248_v7 = vrot.slane %v136_v26, %v11727_v9 }
 0x914   :  { %v9645_v24 = vadd.f32 %v8033_v19, %v5232_v8  ;;  %v9644_v28 = vadd.f32 %v7953_v20, %v5228_v11  ;;  %v8035_v29 = vpop.f32.mrb[25].mxu0  ;;  %v7955_v31 = vpop.f32.mrb[22].mxu1  ;;  %8256 = vmatpush1.bf16.msra.mxu1 %v11233_v12  ;;  %v5244_v8 = vrot.slane %v136_v26, %v11718_v27  ;;  %v5252_v11 = vrot.slane %v136_v26, %v11730_v10 }
 0x915   :  { %v8370_v34 = vmul.f32 0.5, %v9643_v16  ;;  %v9646_v25 = vadd.f32 %v8035_v29, %v5236_v13  ;;  %v8037_v35 = vpop.f32.mrb[26].mxu0  ;;  %v7956_v61 = vpop.f32.mrb[23].mxu1  ;;  %8257 = vmatprep.subr.bf16.mxu1 %v11238_v14 }
 0x916   :  { %v8372_v36 = vmul.f32 0.5, %v9645_v24  ;;  %v8371_v22 = vmul.f32 0.5, %v9644_v28  ;;  %v8038_v2 = vpop.f32.mrb[27].mxu0 }
 0x917   :  { %11284 = vtanh.f32 %v8370_v34  ;;  %v8373_v38 = vmul.f32 0.5, %v9646_v25 }
 0x918   :  { %11286 = vtanh.f32 %v8372_v36  ;;  %8258 = vmatpush1.bf16.msra.mxu1 %v11236_v32 }
 0x919   :  { %11288 = vtanh.f32 %v8371_v22  ;;  %8259 = vmatprep.subr.bf16.mxu1 %v11241_v30 }
 0x91a   :  { %11290 = vtanh.f32 %v8373_v38 }
 0x91c   :  { %8260 = vmatpush1.bf16.msra.mxu1 %v11239_v39 }
 0x91d   :  { %8261 = vmatprep.subr.bf16.mxu1 %v11244_v40 }
 0x920   :  { %8262 = vmatpush1.bf16.msra.mxu1 %v11242_v41 }
 0x921   :  { %v11285_v43 = vpop.eup %11284  ;;  %8263 = vmatprep.subr.bf16.mxu1 %v11247_v33 }
 0x922   :  { %v11287_v45 = vpop.eup %11286  ;;  %v8400_v46 = vadd.f32 1.0, %v11285_v43 }
 0x923   :  { %v11289_v47 = vpop.eup %11288  ;;  %v8402_v48 = vadd.f32 1.0, %v11287_v45  ;;  %v5264_v45 = vrot.slane %v136_v26, %v5231_v4 }
 0x924   :  { %v11291_v49 = vpop.eup %11290  ;;  %v8415_v50 = vmul.f32 0.5, %v8400_v46  ;;  %v8401_v51 = vadd.f32 1.0, %v11289_v47  ;;  %8264 = vmatpush1.bf16.msra.mxu1 %v11245_v42 }
 0x925   :  { %v8417_v53 = vmul.f32 0.5, %v8402_v48  ;;  %v8403_v56 = vadd.f32 1.0, %v11291_v49  ;;  %8265 = vmatprep.subr.bf16.mxu1 %v11250_v44 }
 0x926   :  { %8430 = vst [vmem:[#allocation14 + $0x20] sm:$0xff] %v8415_v50  ;;  %v8416_v54 = vmul.f32 0.5, %v8401_v51 }
 0x927   :  { %8432 = vst [vmem:[#allocation14 + $0x30] sm:$0xff] %v8417_v53  ;;  %v8418_v58 = vmul.f32 0.5, %v8403_v56 }
 0x928   :  { %8431 = vst [vmem:[#allocation14 + $0x28] sm:$0xff] %v8416_v54  ;;  %8266 = vmatpush1.bf16.msra.mxu1 %v11248_v52 }
 0x929   :  { %8433 = vst [vmem:[#allocation14 + $0x38] sm:$0xff] %v8418_v58  ;;  %8267 = vmatprep.subr.bf16.mxu1 %v11253_v57  ;;  %v5256_v58 = vrot.slane %v136_v26, %v5223_v17 }
 0x92c   :  { %8268 = vmatpush1.bf16.msra.mxu1 %v11251_v59  ;;  %v5260_v59 = vrot.slane %v136_v26, %v5227_v5 }
 0x92d   :  { %8269 = vmatprep.subr.bf16.mxu1 %v11256_v60 }
 0x930   :  { %8270 = vmatpush1.bf16.msra.mxu1 %v11254_v55 }
 0x931   :  { %8271 = vmatprep.subr.bf16.mxu1 %v11259_v62 }
 0x934   :  { %8272 = vmatpush1.bf16.msra.mxu1 %v11257_v63 }
 0x935   :  { %8273 = vmatprep.subr.bf16.mxu1 %v11262_v0 }
 0x938   :  { %8274 = vmatpush1.bf16.msra.mxu1 %v11260_v1 }
 0x939   :  { %8275 = vmatprep.subr.bf16.mxu1 %v11265_v3 }
 0x93c   :  { %8276 = vmatpush1.bf16.msra.mxu1 %v11263_v21 }
 0x93f   :  { %8278 = vmatmul.mubr.bf16.vlgmr.msra.gmra.mrb[28].mxu1 %v11772_v37 }
 0x992   :  { %v8115_v12 = vpop.f32.mrb[24].mxu1 }
 0x993   :  { %v9647_v13 = vadd.f32 %v8115_v12, %v5240_v6  ;;  %v8197_v14 = vpop.f32.mrb[28].mxu0  ;;  %v8117_v15 = vpop.f32.mrb[25].mxu1 }
 0x994   :  { %v9649_v16 = vadd.f32 %v8197_v14, %v5248_v7  ;;  %v9648_v19 = vadd.f32 %v8117_v15, %v5244_v8  ;;  %v8199_v20 = vpop.f32.mrb[29].mxu0  ;;  %v8119_v24 = vpop.f32.mrb[26].mxu1 }
 0x995   :  { %v8374_v28 = vmul.f32 0.5, %v9647_v13  ;;  %v9650_v29 = vadd.f32 %v8199_v20, %v5252_v11  ;;  %v8201_v37 = vpop.f32.mrb[30].mxu0  ;;  %v8120_v31 = vpop.f32.mrb[27].mxu1 }
 0x996   :  { %v8376_v32 = vmul.f32 0.5, %v9649_v16  ;;  %v8375_v23 = vmul.f32 0.5, %v9648_v19  ;;  %v8202_v34 = vpop.f32.mrb[31].mxu0 }
 0x997   :  { %11292 = vtanh.f32 %v8374_v28  ;;  %v8377_v9 = vmul.f32 0.5, %v9650_v29 }
 0x998   :  { %11294 = vtanh.f32 %v8376_v32 }
 0x999   :  { %11296 = vtanh.f32 %v8375_v23 }
 0x99a   :  { %11298 = vtanh.f32 %v8377_v9 }
 0x9a1   :  { %v11293_v27 = vpop.eup %11292 }
 0x9a2   :  { %v11295_v10 = vpop.eup %11294  ;;  %v8404_v25 = vadd.f32 1.0, %v11293_v27 }
 0x9a3   :  { %v11297_v35 = vpop.eup %11296  ;;  %v8406_v61 = vadd.f32 1.0, %v11295_v10 }
 0x9a4   :  { %v11299_v30 = vpop.eup %11298  ;;  %v8419_v36 = vmul.f32 0.5, %v8404_v25  ;;  %v8405_v22 = vadd.f32 1.0, %v11297_v35 }
 0x9a5   :  { %v8421_v2 = vmul.f32 0.5, %v8406_v61  ;;  %v8407_v38 = vadd.f32 1.0, %v11299_v30 }
 0x9a6   :  { %8434 = vst [vmem:[#allocation14 + $0x40] sm:$0xff] %v8419_v36  ;;  %v8420_v39 = vmul.f32 0.5, %v8405_v22 }
 0x9a7   :  { %8436 = vst [vmem:[#allocation14 + $0x50] sm:$0xff] %v8421_v2  ;;  %v8422_v40 = vmul.f32 0.5, %v8407_v38 }
 0x9a8   :  { %8435 = vst [vmem:[#allocation14 + $0x48] sm:$0xff] %v8420_v39 }
 0x9a9   :  { %8437 = vst [vmem:[#allocation14 + $0x58] sm:$0xff] %v8422_v40 }
 0x9b3   :  { %v9577_v41 = vpop.f32.mrb[32].mxu0 }
 0x9b4   :  { %v9578_v33 = vpop.f32.mrb[33].mxu0 }
 0x9b5   :  { %v9579_v42 = vadd.f32 %v9578_v33, %v9577_v41  ;;  %v9580_v43 = vpop.f32.mrb[34].mxu0 }
 0x9b6   :  { %v9581_v44 = vpop.f32.mrb[35].mxu0 }
 0x9b7   :  { %v8321_v48 = vadd.f32 %v9579_v42, %v5264_v45 }
 0x9d3   :  { %v9599_v46 = vpop.f32.mrb[36].mxu0 }
 0x9d4   :  { %v9600_v47 = vpop.f32.mrb[37].mxu0 }
 0x9d5   :  { %v9601_v49 = vadd.f32 %v9600_v47, %v9599_v46  ;;  %v9602_v50 = vpop.f32.mrb[38].mxu0 }
 0x9d6   :  { %v9603_v51 = vpop.f32.mrb[39].mxu0 }
 0x9d7   :  { %v8361_v52 = vadd.f32 %v9601_v49, %v8321_v48 }
 0x9d9   :  { %v8380_v53 = vmul.f32 0.5, %v8361_v52 }
 0x9db   :  { %11300 = vtanh.f32 %v8380_v53 }
 0x9e5   :  { %v11301_v56 = vpop.eup %11300 }
 0x9e6   :  { %v8410_v57 = vadd.f32 1.0, %v11301_v56 }
 0x9e8   :  { %v8425_v54 = vmul.f32 0.5, %v8410_v57 }
 0x9ea   :  { %8440 = vst [vmem:[#allocation14 + $0x70] sm:$0xff] %v8425_v54 }
 0xa12   :  { %v8279_v4 = vpop.f32.mrb[28].mxu1 }
 0xa13   :  { %v9651_v60 = vadd.f32 %v8279_v4, %v5256_v58  ;;  %v8281_v55 = vpop.f32.mrb[29].mxu1 }
 0xa14   :  { %v9652_v62 = vadd.f32 %v8281_v55, %v5260_v59  ;;  %v8283_v63 = vpop.f32.mrb[30].mxu1 }
 0xa15   :  { %v8378_v0 = vmul.f32 0.5, %v9651_v60  ;;  %v8284_v1 = vpop.f32.mrb[31].mxu1 }
 0xa16   :  { %v8379_v3 = vmul.f32 0.5, %v9652_v62 }
 0xa17   :  { %11302 = vtanh.f32 %v8378_v0 }
 0xa18   :  { %11304 = vtanh.f32 %v8379_v3 }
 0xa21   :  { %v11303_v21 = vpop.eup %11302 }
 0xa22   :  { %v11305_v6 = vpop.eup %11304  ;;  %v8408_v7 = vadd.f32 1.0, %v11303_v21 }
 0xa23   :  { %v8409_v8 = vadd.f32 1.0, %v11305_v6 }
 0xa24   :  { %v8423_v17 = vmul.f32 0.5, %v8408_v7 }
 0xa25   :  { %v8424_v11 = vmul.f32 0.5, %v8409_v8 }
 0xa26   :  { %8438 = vst [vmem:[#allocation14 + $0x60] sm:$0xff] %v8423_v17 }
 0xa27   :  { %8439 = vst [vmem:[#allocation14 + $0x68] sm:$0xff] %v8424_v11 }
 0xa28   :  { %11471 = shalt.err (!%p11468_p4)
}
 0xa29   :  { %s11472_s23 = scalar_lea.hbm %s11855_s9, 1920 }
 0xa2a   :  { %p11473_p5 = scmp.ne.s32.totalorder %s11855_s9, %s11472_s23  ;;  %p11476_p6 = scmp.lt.u32.totalorder %s11472_s23, %s11855_s9 }
 0xa2c   :  { %p11478_p7 = pnand %p11476_p6, %p11473_p5 }
 0xa2e   :  { %11481 = shalt.err (!%p11478_p7)
}
 0xa2f   :  { %8450 = dma.vmem_to_hbm [thread:$0]  %s8448_s25, 1920, %s11855_s9, [#allocation4]  }
 0xa30   :  { %11490 = dma.done.wait [#allocation4], 1920  }
 0xa31   :  { %11491 = vsyncadd [#allocation4], 4294965376 }
 0xa32   :  { %8458 = vsyncpa [#allocation3], 1 }
 0xa33   :  { %8459 = vsyncpa [#allocation6], 1 }
 0xa34   :  { %8460 = vsyncpa [#allocation9], 1 }
 0xa35   :  { %8461 = vsyncpa [#allocation12], 1 }
 0xa36   :  { %8462 = vsyncpa [#allocation4], 1 }

</bundles_post_ra>
